<compile_context>
chip_gen: v5e
topology: v5e:2x2
jax: 0.10.0
libtpu: 0.0.40
codegen_flags: <defaults>
</compile_context>

<pallas_src>
import jax
import jax.numpy as jnp
from jax.experimental import pallas as pl
from jax.experimental.pallas import tpu as pltpu

_LANE = 128   # lane width: pad channel dims to a multiple of this
_SUBL = 16    # bf16 sublane packing: pad flat row counts to a multiple of this


def _round_up(x, m):
    return ((x + m - 1) // m) * m


def _pick_strip(H, W):
    """Largest even divisor of H whose strip has <= ~4096 matmul rows."""
    best = 2
    for s in range(2, H + 1, 2):
        if H % s == 0 and s * (W + 2) <= 4096:
            best = s
    return best


def _make_kernel(H, W, SH, tap_off1):
    """Build the fused kernel for static geometry (H, W), row-strip SH and
    conv1 tap offsets (a single 0 offset when the wrapper did im2col)."""
    Wp = W + 2                 # padded row width (flat layout period)
    Wo = W // 2
    NS = H // SH               # number of row strips
    SH2 = SH // 2
    Ms = SH * Wp               # matmul rows per strip
    MID0 = Wp + 1              # flat index of padded pixel (1, 1) in mid
    T1 = len(tap_off1)
    tap_off2 = tuple(dy * Wp + dx for dy in range(3) for dx in range(3))

    def kernel(x1_ref, w1_ref, s1_ref, b1_ref, w2_ref, s2_ref, b2_ref,
               o_ref, mid_ref, pool_ref):
        """Refs (one batch element per grid step):
          x1_ref  : (1, M1, K1)            bf16 flat conv1 input (im2col'd or
                                           zero-padded image, row = h*(W+2)+w)
          w1_ref  : (T1, K1, Cmid_p)       bf16 conv1 weights (per tap)
          s1/b1   : (1, Cmid_p)            f32 folded BN scale/bias
          w2_ref  : (9, Cmid_p, Cout_p)    bf16 conv2 weights (per tap)
          s2/b2   : (1, Cout_p)            f32
          o_ref   : (1, H/2, W/2, Cout_p)  f32 pooled output (lane-dense)
          mid_ref : (TOT, Cmid_p)          bf16 scratch, conv1 output in padded
                                           flat layout (pixel (r,c) at r*Wp+c)
          pool_ref: (SH/2, W+2, Cout_p)    f32 strip-sized pooling scratch
        """
        Cmid = mid_ref.shape[1]
        mdt = mid_ref.dtype
        mid_rows = mid_ref.shape[0]

        # Zero the head / tail pad regions of mid (read by conv2 as zero pad).
        mid_ref[0:MID0, :] = jnp.zeros((MID0, Cmid), mdt)
        tail0 = MID0 + H * Wp
        mid_ref[tail0:mid_rows, :] = jnp.zeros((mid_rows - tail0, Cmid), mdt)

        s1 = s1_ref[...]
        b1 = b1_ref[...]
        s2 = s2_ref[...]
        b2 = b2_ref[...]
        zrow2 = jnp.zeros((2, Cmid), mdt)

        # ---- conv1 + BN + ReLU, strip-mined over image rows ----------------
        for s in range(NS):
            base = s * Ms
            acc = None
            for t in range(T1):
                st = base + tap_off1[t]
                slab = x1_ref[0, st:st + Ms, :]          # contiguous view
                prod = jnp.dot(slab, w1_ref[t],
                               preferred_element_type=jnp.float32)
                acc = prod if acc is None else acc + prod
            act = jnp.maximum(acc * s1 + b1, 0.0).astype(mdt)
            d0 = MID0 + base
            mid_ref[d0:d0 + Ms, :] = act                 # one contiguous store
            # The wrap-contaminated columns (w = W, W+1) of each image row land
            # exactly on mid's border positions (c = W+1 then c = 0 of the next
            # row): zero those 2-row pairs so conv2 sees correct zero padding.
            for hl in range(SH):
                d = (s * SH + hl + 2) * Wp - 1
                mid_ref[d:d + 2, :] = zrow2

        # ---- conv2 + BN + ReLU + fused 2x2 max-pool, strip-mined ------------
        for s in range(NS):
            base = s * Ms
            acc = None
            for t in range(9):
                st = base + tap_off2[t]
                slab = mid_ref[st:st + Ms, :]            # contiguous view
                prod = jnp.dot(slab, w2_ref[t],
                               preferred_element_type=jnp.float32)
                acc = prod if acc is None else acc + prod
            y = jnp.maximum(acc * s2 + b2, 0.0)          # (Ms, Cout_p) f32
            # Vertical pair-max in registers; garbage columns never read below.
            yv = jnp.max(y.reshape(SH2, 2, Wp, y.shape[-1]), axis=1)
            pool_ref[...] = yv
            left = pool_ref[:, pl.ds(0, Wo, 2), :]       # even columns (< W)
            right = pool_ref[:, pl.ds(1, Wo, 2), :]      # odd columns  (< W)
            r0 = s * SH2
            o_ref[0, r0:r0 + SH2, :, :] = (
                jnp.maximum(left, right).astype(o_ref.dtype))

    return kernel


def downsample_pallas(x_nchw, w1_hwio, s1, b1, w2_hwio, s2, b2):
    """x_nchw: (N, Cin, H, W) f32; w*_hwio: (3,3,Ci,Co); s*/b*: folded BN
    scale/bias per channel.  Returns (N, Cout, H//2, W//2) f32 (NCHW)."""
    N, Cin, H, W = x_nchw.shape
    Cmid = w1_hwio.shape[3]
    Cout = w2_hwio.shape[3]
    assert H % 2 == 0 and W % 2 == 0, "MaxPool2d(2) path needs even H, W"
    Ho, Wo = H // 2, W // 2
    Wp = W + 2
    SH = _pick_strip(H, W)

    Cmid_p = _round_up(Cmid, _LANE)
    Cout_p = _round_up(Cout, _LANE)

    x = jnp.transpose(x_nchw, (0, 2, 3, 1)).astype(jnp.float32)  # NHWC

    use_im2col = (9 * Cin) <= _LANE
    if use_im2col:
        # First-layer special case: fold all 9 taps into K (one matmul/strip).
        K1 = _LANE
        M1 = _round_up(H * Wp, _SUBL)
        xpad = jnp.pad(x, ((0, 0), (1, 1), (1, 3), (0, 0)))       # W+4 wide
        cols = [xpad[:, dy:dy + H, dx:dx + Wp, :]
                for dy in range(3) for dx in range(3)]
        x1 = jnp.concatenate(cols, axis=-1).reshape(N, H * Wp, 9 * Cin)
        x1 = jnp.pad(x1, ((0, 0), (0, M1 - H * Wp), (0, K1 - 9 * Cin)))
        w1k = w1_hwio.reshape(9 * Cin, Cmid)
        w1k = jnp.pad(w1k, ((0, K1 - 9 * Cin), (0, Cmid_p - Cmid)))[None]
        tap_off1 = (0,)
    else:
        K1 = _round_up(Cin, _LANE)
        M1 = _round_up((H + 2) * Wp + 2, _SUBL)
        xpad = jnp.pad(x, ((0, 0), (1, 1), (1, 1), (0, 0)))
        x1 = xpad.reshape(N, (H + 2) * Wp, Cin)
        x1 = jnp.pad(x1, ((0, 0), (0, M1 - (H + 2) * Wp), (0, K1 - Cin)))
        w1k = w1_hwio.reshape(9, Cin, Cmid)
        w1k = jnp.pad(w1k, ((0, 0), (0, K1 - Cin), (0, Cmid_p - Cmid)))
        tap_off1 = tuple(dy * Wp + dx for dy in range(3) for dx in range(3))

    x1 = x1.astype(jnp.bfloat16)
    w1k = w1k.astype(jnp.bfloat16)
    T1 = w1k.shape[0]

    w2k = w2_hwio.reshape(9, Cmid, Cout)
    w2k = jnp.pad(w2k, ((0, 0), (0, Cmid_p - Cmid), (0, Cout_p - Cout)))
    w2k = w2k.astype(jnp.bfloat16)

    def pad_v(v, c, cp):
        return jnp.pad(v.astype(jnp.float32), (0, cp - c)).reshape(1, cp)

    s1p, b1p = pad_v(s1, Cmid, Cmid_p), pad_v(b1, Cmid, Cmid_p)
    s2p, b2p = pad_v(s2, Cout, Cout_p), pad_v(b2, Cout, Cout_p)

    TOT_mid = _round_up((H + 2) * Wp + 2, _SUBL)
    Ms = SH * Wp

    kernel = _make_kernel(H=H, W=W, SH=SH, tap_off1=tap_off1)

    # Explicit scoped-VMEM budget: double-buffered operands + scratch + strip
    # accumulator headroom (defaults of 16/32 MiB are too small at real sizes).
    vmem_bytes = (
        2 * M1 * K1 * 2                         # x1 (bf16, double-buffered)
        + 2 * T1 * K1 * Cmid_p * 2              # w1
        + 2 * 9 * Cmid_p * Cout_p * 2           # w2
        + 8 * (Cmid_p + Cout_p) * 4             # scales / biases
        + 2 * Ho * Wo * Cout_p * 4              # output (f32, double-buffered)
        + TOT_mid * Cmid_p * 2                  # mid scratch (bf16)
        + (SH // 2) * Wp * Cout_p * 4           # pool scratch
        + 6 * Ms * max(Cmid_p, Cout_p) * 4)     # in-flight strip accumulators
    vmem_limit = int(min(max(vmem_bytes, 32 << 20), 100 << 20))

    out = pl.pallas_call(
        kernel,
        out_shape=jax.ShapeDtypeStruct((N, Ho, Wo, Cout_p), jnp.float32),
        grid=(N,),
        in_specs=[
            pl.BlockSpec((1, M1, K1), lambda n: (n, 0, 0)),
            pl.BlockSpec((T1, K1, Cmid_p), lambda n: (0, 0, 0)),
            pl.BlockSpec((1, Cmid_p), lambda n: (0, 0)),
            pl.BlockSpec((1, Cmid_p), lambda n: (0, 0)),
            pl.BlockSpec((9, Cmid_p, Cout_p), lambda n: (0, 0, 0)),
            pl.BlockSpec((1, Cout_p), lambda n: (0, 0)),
            pl.BlockSpec((1, Cout_p), lambda n: (0, 0)),
        ],
        out_specs=pl.BlockSpec((1, Ho, Wo, Cout_p), lambda n: (n, 0, 0, 0)),
        scratch_shapes=[
            pltpu.VMEM((TOT_mid, Cmid_p), jnp.bfloat16),       # mid (flat)
            pltpu.VMEM((SH // 2, Wp, Cout_p), jnp.float32),    # pool strip
        ],
        compiler_params=pltpu.CompilerParams(
            dimension_semantics=("parallel",),
            vmem_limit_bytes=vmem_limit),
    )(x1, w1k, s1p, b1p, w2k, s2p, b2p)

    # Drop the channel padding, convert back to NCHW.
    return jnp.transpose(out[:, :, :, :Cout], (0, 3, 1, 2))


if __name__ == "__main__":
    N, Cin, H, W = 2, 4, 16, 16
    Cmid, Cout = 8, 8
    eps = 1e-5

    key = jax.random.PRNGKey(0)
    keys = jax.random.split(key, 13)

    x = jax.random.normal(keys[0], (N, Cin, H, W), jnp.float32)

    # Deterministic parameter init (shapes as in the nn.Module __init__).
    w1_hwio = 0.2 * jax.random.normal(keys[1], (3, 3, Cin, Cmid), jnp.float32)
    cb1 = 0.1 * jax.random.normal(keys[2], (Cmid,), jnp.float32)
    g1 = 1.0 + 0.1 * jax.random.normal(keys[3], (Cmid,), jnp.float32)
    be1 = 0.1 * jax.random.normal(keys[4], (Cmid,), jnp.float32)
    m1 = 0.05 * jax.random.normal(keys[5], (Cmid,), jnp.float32)
    v1 = 0.5 + jnp.abs(jax.random.normal(keys[6], (Cmid,), jnp.float32))

    w2_hwio = 0.2 * jax.random.normal(keys[7], (3, 3, Cmid, Cout), jnp.float32)
    cb2 = 0.1 * jax.random.normal(keys[8], (Cout,), jnp.float32)
    g2 = 1.0 + 0.1 * jax.random.normal(keys[9], (Cout,), jnp.float32)
    be2 = 0.1 * jax.random.normal(keys[10], (Cout,), jnp.float32)
    m2 = 0.05 * jax.random.normal(keys[11], (Cout,), jnp.float32)
    v2 = 0.5 + jnp.abs(jax.random.normal(keys[12], (Cout,), jnp.float32))

    # Fold conv bias + (inference-mode) BatchNorm into per-channel scale/bias.
    s1 = g1 / jnp.sqrt(v1 + eps)
    bb1 = be1 + s1 * (cb1 - m1)
    s2 = g2 / jnp.sqrt(v2 + eps)
    bb2 = be2 + s2 * (cb2 - m2)

    out = downsample_pallas(x, w1_hwio, s1, bb1, w2_hwio, s2, bb2)
    out = jax.block_until_ready(out)

    # Pure-JAX f32 reference for correctness.
    def ref(x_nchw):
        xh = jnp.transpose(x_nchw, (0, 2, 3, 1))
        y = jax.lax.conv_general_dilated(
            xh, w1_hwio, (1, 1), "SAME",
            dimension_numbers=("NHWC", "HWIO", "NHWC"))
        y = jnp.maximum(y * s1 + bb1, 0.0)
        y = jax.lax.conv_general_dilated(
            y, w2_hwio, (1, 1), "SAME",
            dimension_numbers=("NHWC", "HWIO", "NHWC"))
        y = jnp.maximum(y * s2 + bb2, 0.0)
        y = y.reshape(N, H // 2, 2, W // 2, 2, Cout).max(axis=(2, 4))
        return jnp.transpose(y, (0, 3, 1, 2))

    expected = ref(x)
    assert out.shape == (N, Cout, H // 2, W // 2), out.shape
    # Tolerance relaxed vs the f32 reference because matmul operands (input,
    # weights, conv1 intermediate) are bf16 (f32 accumulation) in the kernel.
    max_err = float(jnp.max(jnp.abs(out - expected)))
    assert jnp.allclose(out, expected, rtol=5e-2, atol=5e-2), max_err
    print("KERNEL_OK")
</pallas_src>

<mosaic_0001>
module attributes {stable_mosaic.version = 11 : i64} {
  func.func @kernel(%arg0: i32, %arg1: memref<1x288x128xbf16, #tpu.memory_space<vmem>>, %arg2: memref<1x128x128xbf16, #tpu.memory_space<vmem>>, %arg3: memref<1x128xf32, #tpu.memory_space<vmem>>, %arg4: memref<1x128xf32, #tpu.memory_space<vmem>>, %arg5: memref<9x128x128xbf16, #tpu.memory_space<vmem>>, %arg6: memref<1x128xf32, #tpu.memory_space<vmem>>, %arg7: memref<1x128xf32, #tpu.memory_space<vmem>>, %arg8: memref<1x8x8x128xf32, #tpu.memory_space<vmem>>, %arg9: memref<336x128xbf16, #tpu.memory_space<vmem>>, %arg10: memref<8x18x128xf32, #tpu.memory_space<vmem>>) attributes {dimension_semantics = [#tpu.dimension_semantics<parallel>], iteration_bounds = array<i64: 2>, scalar_prefetch = 0 : i64, scratch_operands = 2 : i64, tpu.core_type = #tpu.core_type<tc>, window_params = [{transform_indices = @transform_0, window_bounds = array<i64: 1, 288, 128>}, {pipeline_mode = #tpu.pipeline_mode<synchronous>, transform_indices = @transform_1, window_bounds = array<i64: 1, 128, 128>}, {pipeline_mode = #tpu.pipeline_mode<synchronous>, transform_indices = @transform_2, window_bounds = array<i64: 1, 128>}, {pipeline_mode = #tpu.pipeline_mode<synchronous>, transform_indices = @transform_3, window_bounds = array<i64: 1, 128>}, {pipeline_mode = #tpu.pipeline_mode<synchronous>, transform_indices = @transform_4, window_bounds = array<i64: 9, 128, 128>}, {pipeline_mode = #tpu.pipeline_mode<synchronous>, transform_indices = @transform_5, window_bounds = array<i64: 1, 128>}, {pipeline_mode = #tpu.pipeline_mode<synchronous>, transform_indices = @transform_6, window_bounds = array<i64: 1, 128>}, {transform_indices = @transform_7, window_bounds = array<i64: 1, 8, 8, 128>}]} {
    %cst = arith.constant 0.000000e+00 : bf16
    %0 = vector.broadcast %cst : bf16 to vector<19x128xbf16>
    %c0 = arith.constant 0 : index
    %c0_0 = arith.constant 0 : index
    %1 = vector.load %arg9[%c0, %c0_0] : memref<336x128xbf16, #tpu.memory_space<vmem>>, vector<19x128xbf16>
    tpu.vector_store %arg9[%c0, %c0_0], %0 {strides = array<i32>} : memref<336x128xbf16, #tpu.memory_space<vmem>>, vector<19x128xbf16>,
    %cst_1 = arith.constant 0.000000e+00 : bf16
    %2 = vector.broadcast %cst_1 : bf16 to vector<29x128xbf16>
    %c307 = arith.constant 307 : index
    %c0_2 = arith.constant 0 : index
    %3 = vector.load %arg9[%c307, %c0_2] : memref<336x128xbf16, #tpu.memory_space<vmem>>, vector<29x128xbf16>
    tpu.vector_store %arg9[%c307, %c0_2], %2 {strides = array<i32>} : memref<336x128xbf16, #tpu.memory_space<vmem>>, vector<29x128xbf16>,
    %c0_3 = arith.constant 0 : index
    %c0_4 = arith.constant 0 : index
    %4 = vector.load %arg3[%c0_3, %c0_4] : memref<1x128xf32, #tpu.memory_space<vmem>>, vector<1x128xf32>
    %c0_5 = arith.constant 0 : index
    %c0_6 = arith.constant 0 : index
    %5 = vector.load %arg4[%c0_5, %c0_6] : memref<1x128xf32, #tpu.memory_space<vmem>>, vector<1x128xf32>
    %c0_7 = arith.constant 0 : index
    %c0_8 = arith.constant 0 : index
    %6 = vector.load %arg6[%c0_7, %c0_8] : memref<1x128xf32, #tpu.memory_space<vmem>>, vector<1x128xf32>
    %c0_9 = arith.constant 0 : index
    %c0_10 = arith.constant 0 : index
    %7 = vector.load %arg7[%c0_9, %c0_10] : memref<1x128xf32, #tpu.memory_space<vmem>>, vector<1x128xf32>
    %cst_11 = arith.constant 0.000000e+00 : bf16
    %8 = vector.broadcast %cst_11 : bf16 to vector<2x128xbf16>
    %c0_12 = arith.constant 0 : index
    %c0_13 = arith.constant 0 : index
    %c0_14 = arith.constant 0 : index
    %9 = vector.load %arg1[%c0_12, %c0_13, %c0_14] : memref<1x288x128xbf16, #tpu.memory_space<vmem>>, vector<1x288x128xbf16>
    %10 = vector.shape_cast %9 : vector<1x288x128xbf16> to vector<288x128xbf16>
    %c0_15 = arith.constant 0 : index
    %c0_16 = arith.constant 0 : index
    %c0_17 = arith.constant 0 : index
    %11 = vector.load %arg2[%c0_15, %c0_16, %c0_17] : memref<1x128x128xbf16, #tpu.memory_space<vmem>>, vector<1x128x128xbf16>
    %12 = vector.shape_cast %11 : vector<1x128x128xbf16> to vector<128x128xbf16>
    %cst_18 = arith.constant dense<0.000000e+00> : vector<288x128xf32>
    %13 = tpu.matmul %10, %12, %cst_18 {dimension_numbers = #tpu.dot_dimension_numbers<[1], [0], [0], [1], [0, 0, 1, 1], [], []>} : vector<288x128xbf16>, vector<128x128xbf16>, vector<288x128xf32> -> vector<288x128xf32>
    %14 = vector.broadcast %4 : vector<1x128xf32> to vector<288x128xf32>
    %15 = arith.mulf %13, %14 : vector<288x128xf32>
    %16 = vector.broadcast %5 : vector<1x128xf32> to vector<288x128xf32>
    %17 = arith.addf %15, %16 : vector<288x128xf32>
    %cst_19 = arith.constant 0.000000e+00 : f32
    %18 = vector.broadcast %cst_19 : f32 to vector<288x128xf32>
    %19 = arith.maximumf %17, %18 : vector<288x128xf32>
    %20 = arith.truncf %19 : vector<288x128xf32> to vector<288x128xbf16>
    %c19 = arith.constant 19 : index
    %c0_20 = arith.constant 0 : index
    %21 = vector.load %arg9[%c19, %c0_20] : memref<336x128xbf16, #tpu.memory_space<vmem>>, vector<288x128xbf16>
    tpu.vector_store %arg9[%c19, %c0_20], %20 {strides = array<i32>} : memref<336x128xbf16, #tpu.memory_space<vmem>>, vector<288x128xbf16>,
    %c35 = arith.constant 35 : index
    %c0_21 = arith.constant 0 : index
    %22 = vector.load %arg9[%c35, %c0_21] : memref<336x128xbf16, #tpu.memory_space<vmem>>, vector<2x128xbf16>
    tpu.vector_store %arg9[%c35, %c0_21], %8 {strides = array<i32>} : memref<336x128xbf16, #tpu.memory_space<vmem>>, vector<2x128xbf16>,
    %c53 = arith.constant 53 : index
    %c0_22 = arith.constant 0 : index
    %23 = vector.load %arg9[%c53, %c0_22] : memref<336x128xbf16, #tpu.memory_space<vmem>>, vector<2x128xbf16>
    tpu.vector_store %arg9[%c53, %c0_22], %8 {strides = array<i32>} : memref<336x128xbf16, #tpu.memory_space<vmem>>, vector<2x128xbf16>,
    %c71 = arith.constant 71 : index
    %c0_23 = arith.constant 0 : index
    %24 = vector.load %arg9[%c71, %c0_23] : memref<336x128xbf16, #tpu.memory_space<vmem>>, vector<2x128xbf16>
    tpu.vector_store %arg9[%c71, %c0_23], %8 {strides = array<i32>} : memref<336x128xbf16, #tpu.memory_space<vmem>>, vector<2x128xbf16>,
    %c89 = arith.constant 89 : index
    %c0_24 = arith.constant 0 : index
    %25 = vector.load %arg9[%c89, %c0_24] : memref<336x128xbf16, #tpu.memory_space<vmem>>, vector<2x128xbf16>
    tpu.vector_store %arg9[%c89, %c0_24], %8 {strides = array<i32>} : memref<336x128xbf16, #tpu.memory_space<vmem>>, vector<2x128xbf16>,
    %c107 = arith.constant 107 : index
    %c0_25 = arith.constant 0 : index
    %26 = vector.load %arg9[%c107, %c0_25] : memref<336x128xbf16, #tpu.memory_space<vmem>>, vector<2x128xbf16>
    tpu.vector_store %arg9[%c107, %c0_25], %8 {strides = array<i32>} : memref<336x128xbf16, #tpu.memory_space<vmem>>, vector<2x128xbf16>,
    %c125 = arith.constant 125 : index
    %c0_26 = arith.constant 0 : index
    %27 = vector.load %arg9[%c125, %c0_26] : memref<336x128xbf16, #tpu.memory_space<vmem>>, vector<2x128xbf16>
    tpu.vector_store %arg9[%c125, %c0_26], %8 {strides = array<i32>} : memref<336x128xbf16, #tpu.memory_space<vmem>>, vector<2x128xbf16>,
    %c143 = arith.constant 143 : index
    %c0_27 = arith.constant 0 : index
    %28 = vector.load %arg9[%c143, %c0_27] : memref<336x128xbf16, #tpu.memory_space<vmem>>, vector<2x128xbf16>
    tpu.vector_store %arg9[%c143, %c0_27], %8 {strides = array<i32>} : memref<336x128xbf16, #tpu.memory_space<vmem>>, vector<2x128xbf16>,
    %c161 = arith.constant 161 : index
    %c0_28 = arith.constant 0 : index
    %29 = vector.load %arg9[%c161, %c0_28] : memref<336x128xbf16, #tpu.memory_space<vmem>>, vector<2x128xbf16>
    tpu.vector_store %arg9[%c161, %c0_28], %8 {strides = array<i32>} : memref<336x128xbf16, #tpu.memory_space<vmem>>, vector<2x128xbf16>,
    %c179 = arith.constant 179 : index
    %c0_29 = arith.constant 0 : index
    %30 = vector.load %arg9[%c179, %c0_29] : memref<336x128xbf16, #tpu.memory_space<vmem>>, vector<2x128xbf16>
    tpu.vector_store %arg9[%c179, %c0_29], %8 {strides = array<i32>} : memref<336x128xbf16, #tpu.memory_space<vmem>>, vector<2x128xbf16>,
    %c197 = arith.constant 197 : index
    %c0_30 = arith.constant 0 : index
    %31 = vector.load %arg9[%c197, %c0_30] : memref<336x128xbf16, #tpu.memory_space<vmem>>, vector<2x128xbf16>
    tpu.vector_store %arg9[%c197, %c0_30], %8 {strides = array<i32>} : memref<336x128xbf16, #tpu.memory_space<vmem>>, vector<2x128xbf16>,
    %c215 = arith.constant 215 : index
    %c0_31 = arith.constant 0 : index
    %32 = vector.load %arg9[%c215, %c0_31] : memref<336x128xbf16, #tpu.memory_space<vmem>>, vector<2x128xbf16>
    tpu.vector_store %arg9[%c215, %c0_31], %8 {strides = array<i32>} : memref<336x128xbf16, #tpu.memory_space<vmem>>, vector<2x128xbf16>,
    %c233 = arith.constant 233 : index
    %c0_32 = arith.constant 0 : index
    %33 = vector.load %arg9[%c233, %c0_32] : memref<336x128xbf16, #tpu.memory_space<vmem>>, vector<2x128xbf16>
    tpu.vector_store %arg9[%c233, %c0_32], %8 {strides = array<i32>} : memref<336x128xbf16, #tpu.memory_space<vmem>>, vector<2x128xbf16>,
    %c251 = arith.constant 251 : index
    %c0_33 = arith.constant 0 : index
    %34 = vector.load %arg9[%c251, %c0_33] : memref<336x128xbf16, #tpu.memory_space<vmem>>, vector<2x128xbf16>
    tpu.vector_store %arg9[%c251, %c0_33], %8 {strides = array<i32>} : memref<336x128xbf16, #tpu.memory_space<vmem>>, vector<2x128xbf16>,
    %c269 = arith.constant 269 : index
    %c0_34 = arith.constant 0 : index
    %35 = vector.load %arg9[%c269, %c0_34] : memref<336x128xbf16, #tpu.memory_space<vmem>>, vector<2x128xbf16>
    tpu.vector_store %arg9[%c269, %c0_34], %8 {strides = array<i32>} : memref<336x128xbf16, #tpu.memory_space<vmem>>, vector<2x128xbf16>,
    %c287 = arith.constant 287 : index
    %c0_35 = arith.constant 0 : index
    %36 = vector.load %arg9[%c287, %c0_35] : memref<336x128xbf16, #tpu.memory_space<vmem>>, vector<2x128xbf16>
    tpu.vector_store %arg9[%c287, %c0_35], %8 {strides = array<i32>} : memref<336x128xbf16, #tpu.memory_space<vmem>>, vector<2x128xbf16>,
    %c305 = arith.constant 305 : index
    %c0_36 = arith.constant 0 : index
    %37 = vector.load %arg9[%c305, %c0_36] : memref<336x128xbf16, #tpu.memory_space<vmem>>, vector<2x128xbf16>
    tpu.vector_store %arg9[%c305, %c0_36], %8 {strides = array<i32>} : memref<336x128xbf16, #tpu.memory_space<vmem>>, vector<2x128xbf16>,
    %c0_37 = arith.constant 0 : index
    %c0_38 = arith.constant 0 : index
    %38 = vector.load %arg9[%c0_37, %c0_38] : memref<336x128xbf16, #tpu.memory_space<vmem>>, vector<288x128xbf16>
    %c0_39 = arith.constant 0 : index
    %c0_40 = arith.constant 0 : index
    %c0_41 = arith.constant 0 : index
    %39 = vector.load %arg5[%c0_39, %c0_40, %c0_41] : memref<9x128x128xbf16, #tpu.memory_space<vmem>>, vector<1x128x128xbf16>
    %40 = vector.shape_cast %39 : vector<1x128x128xbf16> to vector<128x128xbf16>
    %cst_42 = arith.constant dense<0.000000e+00> : vector<288x128xf32>
    %41 = tpu.matmul %38, %40, %cst_42 {dimension_numbers = #tpu.dot_dimension_numbers<[1], [0], [0], [1], [0, 0, 1, 1], [], []>} : vector<288x128xbf16>, vector<128x128xbf16>, vector<288x128xf32> -> vector<288x128xf32>
    %c1 = arith.constant 1 : index
    %c0_43 = arith.constant 0 : index
    %42 = vector.load %arg9[%c1, %c0_43] : memref<336x128xbf16, #tpu.memory_space<vmem>>, vector<288x128xbf16>
    %c1_44 = arith.constant 1 : index
    %c0_45 = arith.constant 0 : index
    %c0_46 = arith.constant 0 : index
    %43 = vector.load %arg5[%c1_44, %c0_45, %c0_46] : memref<9x128x128xbf16, #tpu.memory_space<vmem>>, vector<1x128x128xbf16>
    %44 = vector.shape_cast %43 : vector<1x128x128xbf16> to vector<128x128xbf16>
    %cst_47 = arith.constant dense<0.000000e+00> : vector<288x128xf32>
    %45 = tpu.matmul %42, %44, %cst_47 {dimension_numbers = #tpu.dot_dimension_numbers<[1], [0], [0], [1], [0, 0, 1, 1], [], []>} : vector<288x128xbf16>, vector<128x128xbf16>, vector<288x128xf32> -> vector<288x128xf32>
    %46 = arith.addf %41, %45 : vector<288x128xf32>
    %c2 = arith.constant 2 : index
    %c0_48 = arith.constant 0 : index
    %47 = vector.load %arg9[%c2, %c0_48] : memref<336x128xbf16, #tpu.memory_space<vmem>>, vector<288x128xbf16>
    %c2_49 = arith.constant 2 : index
    %c0_50 = arith.constant 0 : index
    %c0_51 = arith.constant 0 : index
    %48 = vector.load %arg5[%c2_49, %c0_50, %c0_51] : memref<9x128x128xbf16, #tpu.memory_space<vmem>>, vector<1x128x128xbf16>
    %49 = vector.shape_cast %48 : vector<1x128x128xbf16> to vector<128x128xbf16>
    %cst_52 = arith.constant dense<0.000000e+00> : vector<288x128xf32>
    %50 = tpu.matmul %47, %49, %cst_52 {dimension_numbers = #tpu.dot_dimension_numbers<[1], [0], [0], [1], [0, 0, 1, 1], [], []>} : vector<288x128xbf16>, vector<128x128xbf16>, vector<288x128xf32> -> vector<288x128xf32>
    %51 = arith.addf %46, %50 : vector<288x128xf32>
    %c18 = arith.constant 18 : index
    %c0_53 = arith.constant 0 : index
    %52 = vector.load %arg9[%c18, %c0_53] : memref<336x128xbf16, #tpu.memory_space<vmem>>, vector<288x128xbf16>
    %c3 = arith.constant 3 : index
    %c0_54 = arith.constant 0 : index
    %c0_55 = arith.constant 0 : index
    %53 = vector.load %arg5[%c3, %c0_54, %c0_55] : memref<9x128x128xbf16, #tpu.memory_space<vmem>>, vector<1x128x128xbf16>
    %54 = vector.shape_cast %53 : vector<1x128x128xbf16> to vector<128x128xbf16>
    %cst_56 = arith.constant dense<0.000000e+00> : vector<288x128xf32>
    %55 = tpu.matmul %52, %54, %cst_56 {dimension_numbers = #tpu.dot_dimension_numbers<[1], [0], [0], [1], [0, 0, 1, 1], [], []>} : vector<288x128xbf16>, vector<128x128xbf16>, vector<288x128xf32> -> vector<288x128xf32>
    %56 = arith.addf %51, %55 : vector<288x128xf32>
    %c19_57 = arith.constant 19 : index
    %c0_58 = arith.constant 0 : index
    %57 = vector.load %arg9[%c19_57, %c0_58] : memref<336x128xbf16, #tpu.memory_space<vmem>>, vector<288x128xbf16>
    %c4 = arith.constant 4 : index
    %c0_59 = arith.constant 0 : index
    %c0_60 = arith.constant 0 : index
    %58 = vector.load %arg5[%c4, %c0_59, %c0_60] : memref<9x128x128xbf16, #tpu.memory_space<vmem>>, vector<1x128x128xbf16>
    %59 = vector.shape_cast %58 : vector<1x128x128xbf16> to vector<128x128xbf16>
    %cst_61 = arith.constant dense<0.000000e+00> : vector<288x128xf32>
    %60 = tpu.matmul %57, %59, %cst_61 {dimension_numbers = #tpu.dot_dimension_numbers<[1], [0], [0], [1], [0, 0, 1, 1], [], []>} : vector<288x128xbf16>, vector<128x128xbf16>, vector<288x128xf32> -> vector<288x128xf32>
    %61 = arith.addf %56, %60 : vector<288x128xf32>
    %c20 = arith.constant 20 : index
    %c0_62 = arith.constant 0 : index
    %62 = vector.load %arg9[%c20, %c0_62] : memref<336x128xbf16, #tpu.memory_space<vmem>>, vector<288x128xbf16>
    %c5 = arith.constant 5 : index
    %c0_63 = arith.constant 0 : index
    %c0_64 = arith.constant 0 : index
    %63 = vector.load %arg5[%c5, %c0_63, %c0_64] : memref<9x128x128xbf16, #tpu.memory_space<vmem>>, vector<1x128x128xbf16>
    %64 = vector.shape_cast %63 : vector<1x128x128xbf16> to vector<128x128xbf16>
    %cst_65 = arith.constant dense<0.000000e+00> : vector<288x128xf32>
    %65 = tpu.matmul %62, %64, %cst_65 {dimension_numbers = #tpu.dot_dimension_numbers<[1], [0], [0], [1], [0, 0, 1, 1], [], []>} : vector<288x128xbf16>, vector<128x128xbf16>, vector<288x128xf32> -> vector<288x128xf32>
    %66 = arith.addf %61, %65 : vector<288x128xf32>
    %c36 = arith.constant 36 : index
    %c0_66 = arith.constant 0 : index
    %67 = vector.load %arg9[%c36, %c0_66] : memref<336x128xbf16, #tpu.memory_space<vmem>>, vector<288x128xbf16>
    %c6 = arith.constant 6 : index
    %c0_67 = arith.constant 0 : index
    %c0_68 = arith.constant 0 : index
    %68 = vector.load %arg5[%c6, %c0_67, %c0_68] : memref<9x128x128xbf16, #tpu.memory_space<vmem>>, vector<1x128x128xbf16>
    %69 = vector.shape_cast %68 : vector<1x128x128xbf16> to vector<128x128xbf16>
    %cst_69 = arith.constant dense<0.000000e+00> : vector<288x128xf32>
    %70 = tpu.matmul %67, %69, %cst_69 {dimension_numbers = #tpu.dot_dimension_numbers<[1], [0], [0], [1], [0, 0, 1, 1], [], []>} : vector<288x128xbf16>, vector<128x128xbf16>, vector<288x128xf32> -> vector<288x128xf32>
    %71 = arith.addf %66, %70 : vector<288x128xf32>
    %c37 = arith.constant 37 : index
    %c0_70 = arith.constant 0 : index
    %72 = vector.load %arg9[%c37, %c0_70] : memref<336x128xbf16, #tpu.memory_space<vmem>>, vector<288x128xbf16>
    %c7 = arith.constant 7 : index
    %c0_71 = arith.constant 0 : index
    %c0_72 = arith.constant 0 : index
    %73 = vector.load %arg5[%c7, %c0_71, %c0_72] : memref<9x128x128xbf16, #tpu.memory_space<vmem>>, vector<1x128x128xbf16>
    %74 = vector.shape_cast %73 : vector<1x128x128xbf16> to vector<128x128xbf16>
    %cst_73 = arith.constant dense<0.000000e+00> : vector<288x128xf32>
    %75 = tpu.matmul %72, %74, %cst_73 {dimension_numbers = #tpu.dot_dimension_numbers<[1], [0], [0], [1], [0, 0, 1, 1], [], []>} : vector<288x128xbf16>, vector<128x128xbf16>, vector<288x128xf32> -> vector<288x128xf32>
    %76 = arith.addf %71, %75 : vector<288x128xf32>
    %c38 = arith.constant 38 : index
    %c0_74 = arith.constant 0 : index
    %77 = vector.load %arg9[%c38, %c0_74] : memref<336x128xbf16, #tpu.memory_space<vmem>>, vector<288x128xbf16>
    %c8 = arith.constant 8 : index
    %c0_75 = arith.constant 0 : index
    %c0_76 = arith.constant 0 : index
    %78 = vector.load %arg5[%c8, %c0_75, %c0_76] : memref<9x128x128xbf16, #tpu.memory_space<vmem>>, vector<1x128x128xbf16>
    %79 = vector.shape_cast %78 : vector<1x128x128xbf16> to vector<128x128xbf16>
    %cst_77 = arith.constant dense<0.000000e+00> : vector<288x128xf32>
    %80 = tpu.matmul %77, %79, %cst_77 {dimension_numbers = #tpu.dot_dimension_numbers<[1], [0], [0], [1], [0, 0, 1, 1], [], []>} : vector<288x128xbf16>, vector<128x128xbf16>, vector<288x128xf32> -> vector<288x128xf32>
    %81 = arith.addf %76, %80 : vector<288x128xf32>
    %82 = vector.broadcast %6 : vector<1x128xf32> to vector<288x128xf32>
    %83 = arith.mulf %81, %82 : vector<288x128xf32>
    %84 = vector.broadcast %7 : vector<1x128xf32> to vector<288x128xf32>
    %85 = arith.addf %83, %84 : vector<288x128xf32>
    %cst_78 = arith.constant 0.000000e+00 : f32
    %86 = vector.broadcast %cst_78 : f32 to vector<288x128xf32>
    %87 = arith.maximumf %85, %86 : vector<288x128xf32>
    %88 = vector.shape_cast %87 : vector<288x128xf32> to vector<8x2x18x128xf32>
    %cst_79 = arith.constant dense<0xFF800000> : vector<8x18x128xf32>
    %89 = vector.multi_reduction <maximumf>, %88, %cst_79 [1] : vector<8x2x18x128xf32> to vector<8x18x128xf32>
    %c0_80 = arith.constant 0 : index
    %c0_81 = arith.constant 0 : index
    %c0_82 = arith.constant 0 : index
    %90 = vector.load %arg10[%c0_80, %c0_81, %c0_82] : memref<8x18x128xf32, #tpu.memory_space<vmem>>, vector<8x18x128xf32>
    tpu.vector_store %arg10[%c0_80, %c0_81, %c0_82], %89 {strides = array<i32>} : memref<8x18x128xf32, #tpu.memory_space<vmem>>, vector<8x18x128xf32>,
    %c0_83 = arith.constant 0 : index
    %c0_84 = arith.constant 0 : index
    %c0_85 = arith.constant 0 : index
    %91 = tpu.strided_load %arg10[%c0_83, %c0_84, %c0_85] {strides = array<i32: 1, 2, 1>} : memref<8x18x128xf32, #tpu.memory_space<vmem>>, vector<8x8x128xf32>
    %c0_86 = arith.constant 0 : index
    %c1_87 = arith.constant 1 : index
    %c0_88 = arith.constant 0 : index
    %92 = tpu.strided_load %arg10[%c0_86, %c1_87, %c0_88] {strides = array<i32: 1, 2, 1>} : memref<8x18x128xf32, #tpu.memory_space<vmem>>, vector<8x8x128xf32>
    %93 = arith.maximumf %91, %92 : vector<8x8x128xf32>
    %c0_89 = arith.constant 0 : index
    %c0_90 = arith.constant 0 : index
    %c0_91 = arith.constant 0 : index
    %c0_92 = arith.constant 0 : index
    %94 = vector.load %arg8[%c0_89, %c0_90, %c0_91, %c0_92] : memref<1x8x8x128xf32, #tpu.memory_space<vmem>>, vector<1x8x8x128xf32>
    %95 = vector.shape_cast %94 : vector<1x8x8x128xf32> to vector<8x8x128xf32>
    %96 = vector.shape_cast %93 : vector<8x8x128xf32> to vector<1x8x8x128xf32>
    tpu.vector_store %arg8[%c0_89, %c0_90, %c0_91, %c0_92], %96 {strides = array<i32>} : memref<1x8x8x128xf32, #tpu.memory_space<vmem>>, vector<1x8x8x128xf32>,
    return
  }
  func.func @transform_0(%arg0: i32) -> (i32, i32, i32) {
    %c0_i32 = arith.constant 0 : i32
    %c0_i32_0 = arith.constant 0 : i32
    %c0_i32_1 = arith.constant 0 : i32
    return %arg0, %c0_i32, %c0_i32_0 : i32, i32, i32
  }
  func.func @transform_1(%arg0: i32) -> (i32, i32, i32) {
    %c0_i32 = arith.constant 0 : i32
    %c0_i32_0 = arith.constant 0 : i32
    %c0_i32_1 = arith.constant 0 : i32
    %c0_i32_2 = arith.constant 0 : i32
    return %c0_i32, %c0_i32_0, %c0_i32_1 : i32, i32, i32
  }
  func.func @transform_2(%arg0: i32) -> (i32, i32) {
    %c0_i32 = arith.constant 0 : i32
    %c0_i32_0 = arith.constant 0 : i32
    %c0_i32_1 = arith.constant 0 : i32
    return %c0_i32, %c0_i32_0 : i32, i32
  }
  func.func @transform_3(%arg0: i32) -> (i32, i32) {
    %c0_i32 = arith.constant 0 : i32
    %c0_i32_0 = arith.constant 0 : i32
    %c0_i32_1 = arith.constant 0 : i32
    return %c0_i32, %c0_i32_0 : i32, i32
  }
  func.func @transform_4(%arg0: i32) -> (i32, i32, i32) {
    %c0_i32 = arith.constant 0 : i32
    %c0_i32_0 = arith.constant 0 : i32
    %c0_i32_1 = arith.constant 0 : i32
    %c0_i32_2 = arith.constant 0 : i32
    return %c0_i32, %c0_i32_0, %c0_i32_1 : i32, i32, i32
  }
  func.func @transform_5(%arg0: i32) -> (i32, i32) {
    %c0_i32 = arith.constant 0 : i32
    %c0_i32_0 = arith.constant 0 : i32
    %c0_i32_1 = arith.constant 0 : i32
    return %c0_i32, %c0_i32_0 : i32, i32
  }
  func.func @transform_6(%arg0: i32) -> (i32, i32) {
    %c0_i32 = arith.constant 0 : i32
    %c0_i32_0 = arith.constant 0 : i32
    %c0_i32_1 = arith.constant 0 : i32
    return %c0_i32, %c0_i32_0 : i32, i32
  }
  func.func @transform_7(%arg0: i32) -> (i32, i32, i32, i32) {
    %c0_i32 = arith.constant 0 : i32
    %c0_i32_0 = arith.constant 0 : i32
    %c0_i32_1 = arith.constant 0 : i32
    %c0_i32_2 = arith.constant 0 : i32
    return %arg0, %c0_i32, %c0_i32_0, %c0_i32_1 : i32, i32, i32, i32
  }
}

</mosaic_0001>

<bundles_post_ra>
// kernel: tpu_custom_call.1
= control target key start
LH: loop header
LB: loop body
LE: loop exit
PB: predicated region body
PF: predicated region fallthrough
CT: control target
= control target key end

     0   :  { %s8552_s0 = inlined_call_operand.hbm [shape: bf16[2,288,128], index: 0, kind: input, shape index: {}]   ;;  %s8553_s1 = inlined_call_operand.hbm [shape: bf16[1,128,128], index: 1, kind: input, shape index: {}]   ;;  %s8554_s2 = inlined_call_operand.vmem [shape: f32[1,128], index: 2, kind: input, shape index: {}]   ;;  %s8555_s3 = inlined_call_operand.vmem [shape: f32[1,128], index: 3, kind: input, shape index: {}]   ;;  %s8556_s4 = inlined_call_operand.hbm [shape: bf16[9,128,128], index: 4, kind: input, shape index: {}]   ;;  %s8557_s5 = inlined_call_operand.vmem [shape: f32[1,128], index: 5, kind: input, shape index: {}]   ;;  %s8558_s6 = inlined_call_operand.vmem [shape: f32[1,128], index: 6, kind: input, shape index: {}]   ;;  %s8559_s7 = inlined_call_operand.hbm [shape: f32[2,8,8,128], index: 7, kind: output, shape index: {}]  }
   0x1   :  { %8581 = sst [smem:[#allocation125_spill]] %s8553_s1 }
   0x2   :  { %8582 = sst [smem:[#allocation126_spill]] %s8556_s4 }
   0x3   :  { %12 = vsyncpa [#allocation5], 0 }
   0x4   :  { %14 = vsyncpa [#allocation5 + $0x1], 0 }
   0x5   :  { %15 = vsyncpa [#allocation8], 0 }
   0x6   :  { %16 = vsyncpa [#allocation6], 0 }
   0x7   :  { %18 = vsyncpa [#allocation6 + $0x1], 0  ;;  %s6349_s24 = smov 0   ;;  %s6351_s25 = smov 0  }
   0x8   :  { %s6353_s26 = smov 0   ;;  %s6355_s27 = smov 0  }
   0x9 LB: > { %s6370_s28 = sadd.s32 4294967295, %s6300_s27   ;;  %s5263_s29 = sadd.s32 4294967294, %s6300_s27   ;;  %s6300_s27 = sphi %s6355_s27, %s8924_s27   ;;  %s6296_s26 = sphi %s6353_s26, %s8923_s26   ;;  %s6292_s25 = sphi %s6351_s25, %s8922_s25   ;;  %s6288_s24 = sphi %s6349_s24, %s8921_s24  }
   0xa   : > { %p44_p0 = scmp.ne.s32.totalorder %s6292_s25, %s6288_s24  ;;  %p45_p1 = scmp.eq.s32.totalorder %s6370_s28, 0 }
   0xb   : > { %p194_p2 = scmp.eq.s32.totalorder %s6370_s28, 1  ;;  %p200_p3 = scmp.eq.s32.totalorder %s5263_s29, 1 }
   0xc   : > { %p6379_p4 = por %p45_p1, %p44_p0  ;;  %p5264_p5 = scmp.ge.s32.totalorder %s6300_s27, 1 }
   0xd   : > { %p6384_p6 = por %p200_p3, %p44_p0  ;;  %p207_p7 = scmp.lt.s32.totalorder %s6300_s27, 3 }
   0xe   : > { %s8585_s1 = sld [smem:[#allocation125_spill]]  ;;  %s6302_s13 = smov [#allocation7]  }
   0xf   : > { %p6392_p8 = pnand %p5264_p5, %p207_p7  ;;  %s220_s14 = sshll.u32 %s6302_s13, 4  ;;  %s221_s14 = int_to_ptr.vmem [resolvable:$true] %s220_s14 }
  0x10   : > { %s8587_s4 = sld [smem:[#allocation126_spill]]  ;;  %s8560_s18 = smov 64  }
  0x11   : > { %p6062_p9 = pneg %p6392_p8  ;;  %s8561_s19 = smov 4  }
  0x12   : > { %s6305_s20 = smov [#allocation9]   ;;  %s6411_s22 = sadd.s32 1, %s6300_s27  }
  0x13   : > { %p6063_p10 = pnand %p6062_p9, %p45_p1  ;;  %s240_s21 = sshll.u32 %s6305_s20, 4  ;;  %s241_s21 = int_to_ptr.vmem [resolvable:$true] %s240_s21 }
  0x14   : > { %s218_s11 = sshll.u32 %s8585_s1, 4  ;;  %s31_s23 = sadd.s32 1, %s6296_s26  ;;  %s219_s11 = int_to_ptr.hbm [resolvable:$true] %s218_s11 }
  0x15   : > { %6065 = dma.hbm_to_vmem [thread:$0]  (!%p6063_p10), %s219_s11, 1024, %s221_s14, [#allocation8], %s8560_s18, %s8560_s18, %s8561_s19  }
  0x16   : > { %s238_s17 = sshll.u32 %s8587_s4, 4  ;;  %s28_s29 = ssub.s32 %s6300_s27, %s6411_s22  ;;  %s239_s17 = int_to_ptr.hbm [resolvable:$true] %s238_s17 }
  0x17   : > { %6068 = dma.hbm_to_vmem [thread:$0]  (!%p6063_p10), %s239_s17, 9216, %s241_s21, [#allocation8], %s8560_s18, %s8560_s18, %s8561_s19  }
  0x18   : > { %p38_p12 = scmp.ne.s32.totalorder %s6296_s26, %s6292_s25  ;;  %p29_p13 = scmp.eq.s32.totalorder %s28_s29, 0 }
  0x19   : > { %p39_p0 = scmp.eq.s32.totalorder %s6300_s27, 0  ;;  %p6079_p5 = scmp.lt.s32.totalorder %s6300_s27, 2 }
  0x1a   : > { %p6421_p3 = por %p194_p2, %p38_p12  ;;  %s260_s11 = sand.u32 1, %s6296_s26  }
  0x1b   : > { %s6427_s10 = scalar_select %p29_p13, %s6296_s26, %s31_s23  }
  0x1c   : > { %p40_p7 = por %p39_p0, %p38_p12  ;;  %s6047_s13 = smul.u32 144, %s260_s11 }
  0x1d   : > { %8589 = sst [smem:[#allocation14_spill]] %s6427_s10  ;;  %s6048_s14 = smul.u32 144, %s6300_s27 }
  0x1e   : > { %p6431_p9 = pnand %p6079_p5, %p40_p7  ;;  %s264_s21 = scalar_lea.vmem [#allocation4], %s6047_s13 }
  0x1f   : > { %s269_s20 = scalar_lea.hbm %s8552_s0, %s6048_s14  ;;  %s272_s29 = sshll.u32 %s264_s21, 4  ;;  %s273_s29 = int_to_ptr.vmem [resolvable:$true] %s272_s29 }
  0x20   : > { %s270_s18 = sshll.u32 %s269_s20, 4  ;;  %s261_s23 = scalar_lea.sflag [#allocation5], %s260_s11  ;;  %s271_s18 = int_to_ptr.hbm [resolvable:$true] %s270_s18 }
  0x21   : > { %s6200_s19 = sshra.s32 %s271_s18, 4  ;;  %p6204_p10 = pneg %p6431_p9  ;;  %s6201_s19 = int_to_ptr.hbm [resolvable:$true] %s6200_s19 }
  0x22   : > { %s6202_s1 = scalar_lea.hbm %s6201_s19, 144  ;;  %s6207_s16 = scalar_lea.hbm %s8552_s0, 288 }
  0x23   : > { %p6203_p2 = scmp.ne.s32.totalorder %s6201_s19, %s6202_s1  ;;  %p6208_p0 = scmp.lt.s32.totalorder %s6201_s19, %s8552_s0 }
  0x24   : > { %p6209_p5 = scmp.lt.s32.totalorder %s6207_s16, %s6202_s1 }
  0x25   : > { %p6205_p12 = pnand %p6204_p10, %p6203_p2 }
  0x26   : > { %p6210_p7 = por %p6209_p5, %p6208_p0 }
  0x27   : > { %p6206_p13 = pneg %p6205_p12 }
  0x29   : > { %p6211_p11 = pnand %p6210_p7, %p6206_p13 }
  0x2b   : > { %6214 = shalt.err (!%p6211_p11)
}
  0x2c   : > { %s8591_s11 = smov 4   ;;  %s8592_s13 = smov 64  }
  0x2d   : > { %6072 = dma.hbm_to_vmem [thread:$0]  (!%p6431_p9), %s271_s18, 2304, %s273_s29, %s261_s23, %s8592_s13, %s8592_s13, %s8591_s11  }
  0x2e   : > { %284 = sbr.rel (%p6392_p8) target bundleno = 1277 (0x4fd), region = 48 }
  0x33   : > { %s6454_s4 = sand.u32 1, %s6292_s25  }
  0x34   : > { %s6049_s19 = smul.u32 144, %s6454_s4  ;;  %s287_s1 = scalar_lea.sflag [#allocation5], %s6454_s4 }
  0x36   : > { %s6458_s10 = scalar_lea.vmem [#allocation4], %s6049_s19 }
  0x37   : > { %6275 = dma.done.wait (%p6379_p4), %s287_s1, 2304  }
  0x38   : > { %6277 = vsyncadd (%p6379_p4), %s287_s1, 4294964992 }
  0x39   : > { %6279 = dma.done.wait (%p45_p1), [#allocation8], 10240  }
  0x3a   : > { %6281 = vsyncadd (%p45_p1), [#allocation8], 4294957056  ;;  %v5899_v0 = vld [vmem:[#allocation7 + $0x38] sm:$0xff]  ;;  %v5898_v1 = vld [vmem:[#allocation7 + $0x30] sm:$0xff]  ;;  %vm335_vm0 = vcmask 1041408   ;;  %vm341_vm2 = vcmask 1043457  }
  0x3b   : > { %562 = vmatpush.bf16.msra.mxu0 %v5899_v0  ;;  %6031 = vmatpush.bf16.msra.mxu2 %v5899_v0  ;;  %v5897_v2 = vld [vmem:[#allocation7 + $0x28] sm:$0xff]  ;;  %v5896_v3 = vld [vmem:[#allocation7 + $0x20] sm:$0xff]  ;;  %v5895_v4 = vld [vmem:[#allocation7 + $0x18] sm:$0xff]  ;;  %vm336_vm1 = vsmask.f32 1280  ;;  %v6306_v37 = vmov 0  }
  0x3c   : > { %v5894_v5 = vld [vmem:[#allocation7 + $0x10] sm:$0xff]  ;;  %v5893_v6 = vld [vmem:[#allocation7 + $0x8] sm:$0xff]  ;;  %v5892_v7 = vld [vmem:[#allocation7] sm:$0xff]  ;;  %vm342_vm4 = vsmask.f32 7942  ;;  %vm1250_vm9 = vcmask 1042433  }
  0x3d   : > { %v5874_v8 = vld [vmem:[%s6458_s10] sm:$0xff]  ;;  %v5883_v9 = vld [vmem:[%s6458_s10 + $0x48] sm:$0xff]  ;;  %v5884_v11 = vld [vmem:[%s6458_s10 + $0x50] sm:$0xff]  ;;  %333 = vst [vmem:[#allocation2] sm:$0xf] %v6306_v37  ;;  %vm1256_vm12 = vcmask 1043458  }
  0x3e   : > { %v5875_v10 = vld [vmem:[%s6458_s10 + $0x8] sm:$0xff]  ;;  %v5876_v12 = vld [vmem:[%s6458_s10 + $0x10] sm:$0xff]  ;;  %v5885_v13 = vld [vmem:[%s6458_s10 + $0x58] sm:$0xff]  ;;  %334 = vst [vmem:[#allocation2 + $0x4] sm:$0xf] %v6306_v37  ;;  %vm1987_vm14 = vcmask 1046528  }
  0x3f   : > { %563 = vmatpush.bf16.msra.mxu0 %v5898_v1  ;;  %6032 = vmatpush.bf16.msra.mxu2 %v5898_v1  ;;  %v5877_v14 = vld [vmem:[%s6458_s10 + $0x18] sm:$0xff]  ;;  %v5886_v15 = vld [vmem:[%s6458_s10 + $0x60] sm:$0xff]  ;;  %v5887_v17 = vld [vmem:[%s6458_s10 + $0x68] sm:$0xff]  ;;  %347 = vst [vmem:[#allocation2 + $0x9c] sm:$0xf] %v6306_v37  ;;  %s5272_s13 = sshll.u32 %s6454_s4, 6 }
  0x40   : > { %v5878_v16 = vld [vmem:[%s6458_s10 + $0x20] sm:$0xff]  ;;  %v5879_v18 = vld [vmem:[%s6458_s10 + $0x28] sm:$0xff]  ;;  %v5888_v19 = vld [vmem:[%s6458_s10 + $0x70] sm:$0xff]  ;;  %348 = vst [vmem:[#allocation2 + $0xa0] sm:$0xf] %v6306_v37  ;;  %s8272_s19 = scalar_lea.vmem [#allocation10], %s5272_s13 }
  0x41   : > { %v5924_v20 = vld [vmem:[#allocation9 + $0x38] sm:$0xff]  ;;  %v5923_v21 = vld [vmem:[#allocation9 + $0x30] sm:$0xff]  ;;  %vm6482_vm3 = vmand %vm335_vm0, %vm336_vm1  ;;  %vm811_vm6 = vsmask.f32 5392  ;;  %vm1251_vm8 = vsmask.f32 2310 }
  0x42   : > { %v338_v23 = vld [vmem:[#allocation2 + $0x8] sm:$0x3]  ;;  %v344_v24 = vld [vmem:[#allocation2 + $0x98] sm:$0xe]  ;;  %vm6488_vm5 = vmand %vm341_vm2, %vm342_vm4  ;;  %vm1487_vm10 = vsmask.f32 7424 }
  0x43   : > { %564 = vmatpush.bf16.msra.mxu0 %v5897_v2  ;;  %6033 = vmatpush.bf16.msra.mxu2 %v5897_v2  ;;  %v339_v25 = vsel %vm6482_vm3, 0, %v338_v23  ;;  %v345_v27 = vsel %vm6488_vm5, 0, %v344_v24  ;;  %v5922_v28 = vld [vmem:[#allocation9 + $0x28] sm:$0xff]  ;;  %v5921_v29 = vld [vmem:[#allocation9 + $0x20] sm:$0xff]  ;;  %v5920_v32 = vld [vmem:[#allocation9 + $0x18] sm:$0xff]  ;;  %vm1262_vm2 = vcmask 1043459  }
  0x44   : > { %340 = vst [vmem:[#allocation2 + $0x8] sm:$0x3] %v339_v25  ;;  %v5880_v30 = vld [vmem:[%s6458_s10 + $0x30] sm:$0xff]  ;;  %v5889_v31 = vld [vmem:[%s6458_s10 + $0x78] sm:$0xff]  ;;  %v5890_v40 = vld [vmem:[%s6458_s10 + $0x80] sm:$0xff]  ;;  %s6023_s18 = sshll.u32 %s6370_s28, 6 }
  0x45   : > { %346 = vst [vmem:[#allocation2 + $0x98] sm:$0xe] %v345_v27  ;;  %v5932_v33 = vld [vmem:[#allocation9 + $0x78] sm:$0xff]  ;;  %v5919_v34 = vld [vmem:[#allocation9 + $0x10] sm:$0xff]  ;;  %v5918_v36 = vld [vmem:[#allocation9 + $0x8] sm:$0xff]  ;;  %s5167_s21 = scalar_lea.hbm %s8559_s7, %s6023_s18  ;;  %s5168_s29 = sshll.u32 %s8272_s19, 4  ;;  %s5169_s29 = int_to_ptr.vmem [resolvable:$true] %s5168_s29 }
  0x46   : > { %1702 = vmatpush.bf16.msra.mxu1 %v5932_v33  ;;  %6039 = vmatpush.bf16.msra.mxu3 %v5932_v33  ;;  %v5931_v35 = vld [vmem:[#allocation9 + $0x70] sm:$0xff]  ;;  %v5930_v38 = vld [vmem:[#allocation9 + $0x68] sm:$0xff]  ;;  %v5917_v41 = vld [vmem:[#allocation9] sm:$0xff]  ;;  %vm1257_vm13 = vsmask.f32 3338  ;;  %s5170_s23 = sshll.u32 %s5167_s21, 4  ;;  %s5171_s23 = int_to_ptr.hbm [resolvable:$true] %s5170_s23 }
  0x47   : > { %565 = vmatpush.bf16.msra.mxu0 %v5896_v3  ;;  %6034 = vmatpush.bf16.msra.mxu2 %v5896_v3  ;;  %v5881_v39 = vld [vmem:[%s6458_s10 + $0x38] sm:$0xff]  ;;  %v5929_v42 = vld [vmem:[#allocation9 + $0x60] sm:$0xff]  ;;  %v5964_v45 = vld [vmem:[#allocation9 + $0xf0] sm:$0xff]  ;;  %vm1263_vm4 = vsmask.f32 7950  ;;  %s5156_s16 = scalar_lea.sflag [#allocation6], %s6454_s4 }
  0x48   : > { %v5965_v43 = vld [vmem:[#allocation9 + $0xf8] sm:$0xff]  ;;  %v5927_v46 = vld [vmem:[#allocation9 + $0x50] sm:$0xff]  ;;  %v5963_v49 = vld [vmem:[#allocation9 + $0xe8] sm:$0xff]  ;;  %s6244_s17 = sshra.s32 %s5171_s23, 4  ;;  %s6250_s13 = scalar_lea.hbm %s8559_s7, 128  ;;  %s6245_s17 = int_to_ptr.hbm [resolvable:$true] %s6244_s17 }
  0x49   : > { %v5928_v44 = vld [vmem:[#allocation9 + $0x58] sm:$0xff]  ;;  %v6501_v47 = vld [vmem:[%s8554_s2] ss:$0 sm:$0xff]  ;;  %v5926_v52 = vld [vmem:[#allocation9 + $0x48] sm:$0xff]  ;;  %s6246_s14 = scalar_lea.hbm %s6245_s17, 64  ;;  %p6251_p11 = scmp.lt.s32.totalorder %s6245_s17, %s8559_s7 }
  0x4a   : > { %1703 = vmatpush.bf16.msra.mxu1 %v5931_v35  ;;  %6040 = vmatpush.bf16.msra.mxu3 %v5931_v35  ;;  %v6506_v48 = vld [vmem:[%s8555_s3] ss:$0 sm:$0xff]  ;;  %v5891_v51 = vld [vmem:[%s6458_s10 + $0x88] sm:$0xff]  ;;  %v5962_v55 = vld [vmem:[#allocation9 + $0xe0] sm:$0xff]  ;;  %p6247_p1 = scmp.ne.s32.totalorder %s6245_s17, %s6246_s14  ;;  %p6252_p9 = scmp.lt.s32.totalorder %s6250_s13, %s6246_s14 }
  0x4b   : > { %566 = vmatpush.bf16.msra.mxu0 %v5895_v4  ;;  %6035 = vmatpush.bf16.msra.mxu2 %v5895_v4  ;;  %v5882_v50 = vld [vmem:[%s6458_s10 + $0x40] sm:$0xff]  ;;  %v5961_v60 = vld [vmem:[#allocation9 + $0xd8] sm:$0xff]  ;;  %vm6526_vm7 = vmor %vm336_vm1, %vm811_vm6  ;;  %vm3025_vm1 = vcmask 1045504   ;;  %vm1268_vm6 = vcmask 1040384  }
  0x4c   : > { %v5925_v57 = vld [vmem:[#allocation9 + $0x40] sm:$0xff]  ;;  %v5960_v4 = vld [vmem:[#allocation9 + $0xd0] sm:$0xff]  ;;  %vm6558_vm11 = vmand %vm1250_vm9, %vm1251_vm8  ;;  %vm1269_vm9 = vsmask.f32 256  ;;  %p6248_p4 = pnand %p6247_p1, %p6421_p3  ;;  %p6253_p2 = por %p6252_p9, %p6251_p11 }
  0x4d   : > { %vm6612_vm15 = vmand %vm1256_vm12, %vm1257_vm13  ;;  %vm1274_vm13 = vsmask.f32 1282 }
  0x4e   : > { %1704 = vmatpush.bf16.msra.mxu1 %v5930_v38  ;;  %6041 = vmatpush.bf16.msra.mxu3 %v5930_v38  ;;  %vm6677_vm8 = vmand %vm1262_vm2, %vm1263_vm4  ;;  %p6249_p8 = pneg %p6248_p4 }
  0x4f   : > { %567 = vmatpush.bf16.msra.mxu0 %v5894_v5  ;;  %6036 = vmatpush.bf16.msra.mxu2 %v5894_v5  ;;  %vm6714_vm12 = vmand %vm1268_vm6, %vm1269_vm9 }
  0x50   : > { %vm6755_vm2 = vmand %vm335_vm0, %vm1274_vm13  ;;  %p6254_p10 = pnand %p6253_p2, %p6249_p8 }
  0x52   : > { %1705 = vmatpush.bf16.msra.mxu1 %v5929_v42  ;;  %6042 = vmatpush.bf16.msra.mxu3 %v5929_v42 }
  0x53   : > { %568 = vmatpush.bf16.msra.mxu0 %v5893_v6  ;;  %6037 = vmatpush.bf16.msra.mxu2 %v5893_v6 }
  0x56   : > { %1706 = vmatpush.bf16.msra.mxu1 %v5928_v44  ;;  %6043 = vmatpush.bf16.msra.mxu3 %v5928_v44 }
  0x57   : > { %569 = vmatpush.bf16.msra.mxu0 %v5892_v7  ;;  %6038 = vmatpush.bf16.msra.mxu2 %v5892_v7 }
  0x5a   : > { %570 = vmatmul.bf16.vlgmr.msra.gmra.mxu0 %v5874_v8  ;;  %615 = vmatmul.bf16.vlgmr.msra.gmra.mxu2 %v5883_v9  ;;  %v1209_v9 = vld [vmem:[#allocation2 + $0x8] sm:$0xe] }
  0x5b   : > { %1867 = vmatpush.bf16.msrb.mxu2 %v5924_v20  ;;  %2476 = vmatpush.bf16.msrb.mxu0 %v5965_v43 }
  0x5c   : > { %1707 = vmatpush.bf16.msra.mxu1 %v5927_v46  ;;  %6044 = vmatpush.bf16.msra.mxu3 %v5927_v46 }
  0x5f   : > { %1868 = vmatpush.bf16.msrb.mxu2 %v5923_v21  ;;  %2477 = vmatpush.bf16.msrb.mxu0 %v5964_v45  ;;  %v6519_v21 = vld [vmem:[#allocation2] sm:$0xff]  }
  0x60   : > { %1708 = vmatpush.bf16.msra.mxu1 %v5926_v52  ;;  %6045 = vmatpush.bf16.msra.mxu3 %v5926_v52  ;;  %v1491_v46 = vshll.u32 %v6519_v21, 16 }
  0x63   : > { %1869 = vmatpush.bf16.msrb.mxu2 %v5922_v28  ;;  %2478 = vmatpush.bf16.msrb.mxu0 %v5963_v49 }
  0x64   : > { %1709 = vmatpush.bf16.msra.mxu1 %v5925_v57  ;;  %6046 = vmatpush.bf16.msra.mxu3 %v5925_v57 }
  0x67   : > { %1870 = vmatpush.bf16.msrb.mxu2 %v5921_v29  ;;  %2479 = vmatpush.bf16.msrb.mxu0 %v5962_v55  ;;  %v5958_v29 = vld [vmem:[#allocation9 + $0xc0] sm:$0xff] }
  0x6a   : > { %575 = vmatmul.bf16.gmra.mxu0 %v5875_v10  ;;  %620 = vmatmul.bf16.gmra.mxu2 %v5884_v11 }
  0x6b   : > { %1871 = vmatpush.bf16.msrb.mxu2 %v5920_v32  ;;  %2480 = vmatpush.bf16.msrb.mxu0 %v5961_v60 }
  0x6f   : > { %1872 = vmatpush.bf16.msrb.mxu2 %v5919_v34  ;;  %2481 = vmatpush.bf16.msrb.mxu0 %v5960_v4 }
  0x73   : > { %1873 = vmatpush.bf16.msrb.mxu2 %v5918_v36 }
  0x77   : > { %1874 = vmatpush.bf16.msrb.mxu2 %v5917_v41 }
  0x7a   : > { %580 = vmatmul.bf16.gmra.mxu0 %v5876_v12  ;;  %625 = vmatmul.bf16.gmra.mxu2 %v5885_v13 }
  0x8a   : > { %585 = vmatmul.bf16.gmra.mxu0 %v5877_v14  ;;  %630 = vmatmul.bf16.gmra.mxu2 %v5886_v15  ;;  %v5959_v14 = vld [vmem:[#allocation9 + $0xc8] sm:$0xff] }
  0x8b   : > { %2482 = vmatpush.bf16.msrb.mxu0 %v5959_v14 }
  0x8f   : > { %2483 = vmatpush.bf16.msrb.mxu0 %v5958_v29 }
  0x9a   : > { %590 = vmatmul.bf16.gmra.mxu0 %v5878_v16  ;;  %635 = vmatmul.bf16.gmra.mxu2 %v5887_v17 }
  0xaa   : > { %595 = vmatmul.bf16.gmra.mxu0 %v5879_v18  ;;  %640 = vmatmul.bf16.gmra.mxu2 %v5888_v19 }
  0xba   : > { %600 = vmatmul.bf16.gmra.mxu0 %v5880_v30  ;;  %645 = vmatmul.bf16.gmra.mxu2 %v5889_v31 }
  0xca   : > { %605 = vmatmul.bf16.gmra.mxu0 %v5881_v39  ;;  %650 = vmatmul.bf16.gmra.mxu2 %v5890_v40 }
  0xd7   : > { %v571_v53 = vpop.f32.mrf.mxu0 }
  0xd8   : > { %v664_v54 = vmul.f32 %v6501_v47, %v571_v53 }
  0xda   : > { %v703_v56 = vadd.f32 %v6506_v48, %v664_v54  ;;  %610 = vmatmul.bf16.gmra.mxu0 %v5882_v50  ;;  %655 = vmatmul.bf16.gmra.mxu2 %v5891_v51 }
  0xdc   : > { %v739_v58 = vmax.f32 %v703_v56, 0.0 }
  0xdd   : > { %v616_v59 = vpop.f32.mrf.mxu2 }
  0xde   : > { %v775_v61 = vpack.c.bf16 %v739_v58, %v739_v58  ;;  %v682_v62 = vmul.f32 %v6501_v47, %v616_v59 }
  0xdf   : > { %v573_v63 = vpop.f32.mrf.mxu0 }
  0xe0   : > { %v814_v0 = vshrl.u32 %v775_v61, 16  ;;  %v817_v1 = vshll.u32 %v775_v61, 16  ;;  %v721_v2 = vadd.f32 %v6506_v48, %v682_v62  ;;  %v665_v3 = vmul.f32 %v6501_v47, %v573_v63 }
  0xe1   : > { %v1489_v62 = vshrl.u32 %v6519_v21, 16  ;;  %v1493_v63 = vrot.slane %v1491_v46, 1 }
  0xe2   : > { %v816_v5 = vrot.slane %v814_v0, 6  ;;  %v819_v6 = vrot.slane %v817_v1, 7  ;;  %v757_v7 = vmax.f32 %v721_v2, 0.0  ;;  %v704_v8 = vadd.f32 %v6506_v48, %v665_v3 }
  0xe4   : > { %v820_v10 = vor.u32 %v819_v6, %v816_v5  ;;  %v793_v11 = vpack.c.bf16 %v757_v7, %v757_v7  ;;  %v740_v12 = vmax.f32 %v704_v8, 0.0 }
  0xe5   : > { %v618_v13 = vpop.f32.mrf.mxu2 }
  0xe6   : > { %v1210_v15 = vsel %vm6488_vm5, %v820_v10, %v1209_v9  ;;  %v993_v16 = vshrl.u32 %v793_v11, 16  ;;  %v996_v17 = vshll.u32 %v793_v11, 16  ;;  %v776_v18 = vpack.c.bf16 %v740_v12, %v740_v12 }
  0xe7   : > { %1211 = vst [vmem:[#allocation2 + $0x8] sm:$0xe] %v1210_v15  ;;  %v683_v19 = vmul.f32 %v6501_v47, %v618_v13  ;;  %v576_v20 = vpop.f32.mrf.mxu0  ;;  %v821_v36 = vrot.slane %v820_v10, 4  ;;  %v1494_v13 = vor.u32 %v1493_v63, %v1489_v62  ;;  %vm2632_vm5 = vsmask.f32 6400 }
  0xe8   : > { %v995_v23 = vrot.slane %v993_v16, 6  ;;  %v666_v24 = vmul.f32 %v6501_v47, %v576_v20  ;;  %v998_v25 = vrot.slane %v996_v17, 7  ;;  %v823_v27 = vshrl.u32 %v776_v18, 16 }
  0xe9   : > { %v826_v28 = vshll.u32 %v776_v18, 16  ;;  %v722_v26 = vadd.f32 %v6506_v48, %v683_v19 }
  0xea   : > { %v705_v30 = vadd.f32 %v6506_v48, %v666_v24  ;;  %1875 = vmatmul.bf16.vlgmr.msrb.gmra.mxu2 %v6519_v21  ;;  %v825_v31 = vrot.slane %v823_v27, 6  ;;  %v6530_v37 = vor.u32 %v998_v25, %v995_v23 }
  0xeb   : > { %v828_v32 = vrot.slane %v826_v28, 7  ;;  %v758_v33 = vmax.f32 %v722_v26, 0.0 }
  0xec   : > { %v741_v35 = vmax.f32 %v705_v30, 0.0  ;;  %v1001_v54 = vrot.slane %v6530_v37, 4 }
  0xed   : > { %v829_v38 = vor.u32 %v828_v32, %v825_v31  ;;  %v794_v39 = vpack.c.bf16 %v758_v33, %v758_v33  ;;  %v621_v40 = vpop.f32.mrf.mxu2 }
  0xee   : > { %v777_v41 = vpack.c.bf16 %v741_v35, %v741_v35  ;;  %v684_v42 = vmul.f32 %v6501_v47, %v621_v40  ;;  %v2226_v24 = vld [vmem:[#allocation2 + $0x8] sm:$0xe] }
  0xef   : > { %v830_v43 = vsel %vm6526_vm7, %v821_v36, %v829_v38  ;;  %v1003_v44 = vshrl.u32 %v794_v39, 16  ;;  %v1006_v45 = vshll.u32 %v794_v39, 16  ;;  %v578_v49 = vpop.f32.mrf.mxu0  ;;  %v831_v0 = vrot.slane %v829_v38, 4 }
  0xf0   : > { %1212 = vst [vmem:[#allocation2 + $0xc] sm:$0xf] %v830_v43  ;;  %v833_v50 = vshrl.u32 %v777_v41, 16  ;;  %v836_v51 = vshll.u32 %v777_v41, 16  ;;  %v723_v52 = vadd.f32 %v6506_v48, %v684_v42  ;;  %v667_v53 = vmul.f32 %v6501_v47, %v578_v49 }
  0xf1   : > { %v1005_v55 = vrot.slane %v1003_v44, 6  ;;  %v1008_v56 = vrot.slane %v1006_v45, 7  ;;  %v2317_v36 = vunpack.c.l.b16 %v2226_v24 }
  0xf2   : > { %v835_v57 = vrot.slane %v833_v50, 6  ;;  %v838_v58 = vrot.slane %v836_v51, 7  ;;  %v759_v59 = vmax.f32 %v723_v52, 0.0  ;;  %v706_v60 = vadd.f32 %v6506_v48, %v667_v53 }
  0xf3   : > { %v1009_v61 = vor.u32 %v1008_v56, %v1005_v55 }
  0xf4   : > { %v839_v1 = vor.u32 %v838_v58, %v835_v57  ;;  %v795_v2 = vpack.c.bf16 %v759_v59, %v759_v59  ;;  %v742_v3 = vmax.f32 %v706_v60, 0.0 }
  0xf5   : > { %v1010_v4 = vsel %vm6526_vm7, %v1001_v54, %v1009_v61  ;;  %v623_v5 = vpop.f32.mrf.mxu2  ;;  %v1011_v15 = vrot.slane %v1009_v61, 4 }
  0xf6   : > { %1230 = vst [vmem:[#allocation2 + $0x54] sm:$0xf] %v1010_v4  ;;  %v840_v6 = vsel %vm6526_vm7, %v831_v0, %v839_v1  ;;  %v1013_v7 = vshrl.u32 %v795_v2, 16  ;;  %v1016_v8 = vshll.u32 %v795_v2, 16  ;;  %v778_v9 = vpack.c.bf16 %v742_v3, %v742_v3  ;;  %v3004_v0 = vld [vmem:[#allocation2 + $0x8] sm:$0xc] }
  0xf7   : > { %1213 = vst [vmem:[#allocation2 + $0x10] sm:$0xf] %v840_v6  ;;  %v685_v10 = vmul.f32 %v6501_v47, %v623_v5  ;;  %v581_v11 = vpop.f32.mrf.mxu0  ;;  %v6546_v12 = vld [vmem:[#allocation2 + $0x8] sm:$0xff]  ;;  %v841_v38 = vrot.slane %v839_v1, 4 }
  0xf8   : > { %v6548_v14 = vld [vmem:[#allocation2 + $0xc] sm:$0xf]  ;;  %v1015_v16 = vrot.slane %v1013_v7, 6  ;;  %v1018_v17 = vrot.slane %v1016_v8, 7  ;;  %v668_v18 = vmul.f32 %v6501_v47, %v581_v11  ;;  %v843_v19 = vshrl.u32 %v778_v9, 16 }
  0xf9   : > { %v846_v20 = vshll.u32 %v778_v9, 16  ;;  %v724_v21 = vadd.f32 %v6506_v48, %v685_v10  ;;  %v1496_v23 = vshll.u32 %v6546_v12, 16  ;;  %v2318_v28 = vunpack.c.l.b16 %v6548_v14 }
  0xfa   : > { %v1019_v25 = vor.u32 %v1018_v17, %v1015_v16  ;;  %v707_v27 = vadd.f32 %v6506_v48, %v668_v18  ;;  %1880 = vmatmul.bf16.gmra.mxu2 %v6546_v12  ;;  %v845_v26 = vrot.slane %v843_v19, 6  ;;  %v1500_v2 = vshrl.u32 %v6546_v12, 16 }
  0xfb   : > { %v848_v29 = vrot.slane %v846_v20, 7  ;;  %v760_v30 = vmax.f32 %v724_v21, 0.0  ;;  %v1498_v31 = vrot.slane %v1496_v23, 1  ;;  %v6572_v52 = vpack.c.b16 %v2318_v28, %v2317_v36 }
  0xfc   : > { %v1020_v33 = vsel %vm6526_vm7, %v1011_v15, %v1019_v25  ;;  %v743_v35 = vmax.f32 %v707_v27, 0.0  ;;  %v1021_v57 = vrot.slane %v1019_v25, 4  ;;  %v3023_v15 = vunpack.c.l.b16 %v3004_v0 }
  0xfd   : > { %1231 = vst [vmem:[#allocation2 + $0x58] sm:$0xf] %v1020_v33  ;;  %v849_v39 = vor.u32 %v848_v29, %v845_v26  ;;  %v796_v40 = vpack.c.bf16 %v760_v30, %v760_v30  ;;  %v626_v41 = vpop.f32.mrf.mxu2  ;;  %v1499_v42 = vsel %vm1487_vm10, %v1494_v13, %v1498_v31  ;;  %v2634_v3 = vshrl.u32 %v6572_v52, 16 }
  0xfe   : > { %v1253_v43 = vld [vmem:[#allocation2 + $0x10] sm:$0x6]  ;;  %v779_v44 = vpack.c.bf16 %v743_v35, %v743_v35  ;;  %v686_v45 = vmul.f32 %v6501_v47, %v626_v41  ;;  %1710 = vmatmul.bf16.vlgmr.msra.gmra.mxu1 %v1499_v42  ;;  %v2373_v13 = vrot.slane %v6572_v52, 1  ;;  %v1502_v18 = vor.u32 %v1500_v2, %v1498_v31 }
  0xff   : > { %v1254_v46 = vsel %vm6558_vm11, 0, %v1253_v43  ;;  %v850_v49 = vsel %vm6526_vm7, %v841_v38, %v849_v39  ;;  %v1023_v50 = vshrl.u32 %v796_v40, 16  ;;  %v583_v51 = vpop.f32.mrf.mxu0  ;;  %v1026_v53 = vshll.u32 %v796_v40, 16 }
 0x100   : > { %1255 = vst [vmem:[#allocation2 + $0x10] sm:$0x6] %v1254_v46  ;;  %v853_v54 = vshrl.u32 %v779_v44, 16  ;;  %v856_v55 = vshll.u32 %v779_v44, 16  ;;  %v725_v56 = vadd.f32 %v6506_v48, %v686_v45  ;;  %v669_v59 = vmul.f32 %v6501_v47, %v583_v51 }
 0x101   : > { %1214 = vst [vmem:[#allocation2 + $0x14] sm:$0xf] %v850_v49  ;;  %v1025_v58 = vrot.slane %v1023_v50, 6  ;;  %v1028_v60 = vrot.slane %v1026_v53, 7  ;;  %v851_v5 = vrot.slane %v849_v39, 4  ;;  %v2637_v19 = vshll.u32 %v6572_v52, 16 }
 0x102   : > { %v855_v61 = vrot.slane %v853_v54, 6  ;;  %v858_v62 = vrot.slane %v856_v55, 7  ;;  %v761_v63 = vmax.f32 %v725_v56, 0.0  ;;  %v708_v1 = vadd.f32 %v6506_v48, %v669_v59 }
 0x103   : > { %v1029_v6 = vor.u32 %v1028_v60, %v1025_v58  ;;  %v6593_v33 = vrot.slane %v2634_v3, 1  ;;  %v6597_v31 = vpack.c.b16 %v2318_v28, %v3023_v15  ;;  %v6603_v43 = vrot.slane %v2637_v19, 2 }
 0x104   : > { %v1294_v4 = vld [vmem:[#allocation2 + $0x58] sm:$0x6]  ;;  %v859_v7 = vor.u32 %v858_v62, %v855_v61  ;;  %v797_v8 = vpack.c.bf16 %v761_v63, %v761_v63  ;;  %v744_v10 = vmax.f32 %v708_v1, 0.0  ;;  %v8565_v51 = vrot.slane %v6546_v12, 1 }
 0x105   : > { %v1295_v9 = vsel %vm6558_vm11, 0, %v1294_v4  ;;  %v628_v11 = vpop.f32.mrf.mxu2  ;;  %v1030_v16 = vsel %vm6526_vm7, %v1021_v57, %v1029_v6  ;;  %v1031_v27 = vrot.slane %v1029_v6, 4  ;;  %v3026_v61 = vrot.slane %v6597_v31, 2 }
 0x106   : > { %1296 = vst [vmem:[#allocation2 + $0x58] sm:$0x6] %v1295_v9  ;;  %v860_v17 = vsel %vm6526_vm7, %v851_v5, %v859_v7  ;;  %v1033_v20 = vshrl.u32 %v797_v8, 16  ;;  %v1036_v21 = vshll.u32 %v797_v8, 16  ;;  %v780_v23 = vpack.c.bf16 %v744_v10, %v744_v10 }
 0x107   : > { %1232 = vst [vmem:[#allocation2 + $0x5c] sm:$0xf] %v1030_v16  ;;  %v687_v24 = vmul.f32 %v6501_v47, %v628_v11  ;;  %v586_v25 = vpop.f32.mrf.mxu0  ;;  %v861_v52 = vrot.slane %v859_v7, 4  ;;  %v2640_v3 = vor.u32 %v6603_v43, %v6593_v33 }
 0x108   : > { %1215 = vst [vmem:[#allocation2 + $0x18] sm:$0xf] %v860_v17  ;;  %v670_v26 = vmul.f32 %v6501_v47, %v586_v25  ;;  %v6589_v29 = vld [vmem:[#allocation2 + $0x10] sm:$0xff]  ;;  %v1035_v35 = vrot.slane %v1033_v20, 6  ;;  %v1038_v36 = vrot.slane %v1036_v21, 7  ;;  %v863_v38 = vshrl.u32 %v780_v23, 16 }
 0x109   : > { %v6591_v30 = vld [vmem:[#allocation2 + $0x10] sm:$0xff]  ;;  %v866_v39 = vshll.u32 %v780_v23, 16  ;;  %v726_v40 = vadd.f32 %v6506_v48, %v687_v24  ;;  %v1504_v14 = vshll.u32 %v6589_v29, 16  ;;  %v1508_v2 = vshrl.u32 %v6589_v29, 16 }
 0x10a   : > { %v709_v41 = vadd.f32 %v6506_v48, %v670_v26  ;;  %1885 = vmatmul.bf16.gmra.mxu2 %v6589_v29  ;;  %v2374_v42 = vrot.slane %v6591_v30, 1  ;;  %v1039_v44 = vor.u32 %v1038_v36, %v1035_v35  ;;  %v865_v45 = vrot.slane %v863_v38, 6 }
 0x10b   : > { %v868_v46 = vrot.slane %v866_v39, 7  ;;  %v762_v28 = vmax.f32 %v726_v40, 0.0  ;;  %v1506_v57 = vrot.slane %v1504_v14, 1  ;;  %v2642_v17 = vshrl.u32 %v6591_v30, 16 }
 0x10c   : > { %v745_v49 = vmax.f32 %v709_v41, 0.0  ;;  %v2375_v50 = vsel %vm1987_vm14, %v2373_v13, %v2374_v42  ;;  %v1040_v54 = vsel %vm6526_vm7, %v1031_v27, %v1039_v44  ;;  %v1041_v8 = vrot.slane %v1039_v44, 4 }
 0x10d   : > { %v869_v55 = vor.u32 %v868_v46, %v865_v45  ;;  %v631_v56 = vpop.f32.mrf.mxu2  ;;  %2484 = vmatmul.bf16.vlgmr.msrb.gmra.mxu0 %v2375_v50  ;;  %1233 = vst [vmem:[#allocation2 + $0x60] sm:$0xf] %v1040_v54  ;;  %v798_v58 = vpack.c.bf16 %v762_v28, %v762_v28  ;;  %v1507_v1 = vsel %vm1487_vm10, %v1502_v18, %v1506_v57  ;;  %v2645_v21 = vshll.u32 %v6591_v30, 16 }
 0x10e   : > { %v781_v59 = vpack.c.bf16 %v745_v49, %v745_v49  ;;  %v688_v60 = vmul.f32 %v6501_v47, %v631_v56  ;;  %1715 = vmatmul.bf16.gmra.mxu1 %v1507_v1  ;;  %v1510_v25 = vor.u32 %v1508_v2, %v1506_v57  ;;  %v3027_v27 = vrot.slane %v6591_v30, 2 }
 0x10f   : > { %v1259_v62 = vld [vmem:[#allocation2 + $0x18] sm:$0xc]  ;;  %v870_v63 = vsel %vm6526_vm7, %v861_v52, %v869_v55  ;;  %v588_v0 = vpop.f32.mrf.mxu0  ;;  %v1043_v5 = vshrl.u32 %v798_v58, 16  ;;  %v1046_v6 = vshll.u32 %v798_v58, 16  ;;  %v871_v23 = vrot.slane %v869_v55, 4 }
 0x110   : > { %v1260_v4 = vsel %vm6612_vm15, 0, %v1259_v62  ;;  %1216 = vst [vmem:[#allocation2 + $0x1c] sm:$0xf] %v870_v63  ;;  %v873_v7 = vshrl.u32 %v781_v59, 16  ;;  %v876_v9 = vshll.u32 %v781_v59, 16  ;;  %v727_v10 = vadd.f32 %v6506_v48, %v688_v60 }
 0x111   : > { %1261 = vst [vmem:[#allocation2 + $0x18] sm:$0xc] %v1260_v4  ;;  %v671_v11 = vmul.f32 %v6501_v47, %v588_v0  ;;  %v1045_v13 = vrot.slane %v1043_v5, 6  ;;  %v1048_v15 = vrot.slane %v1046_v6, 7  ;;  %v1991_v39 = vrot.slane %v6589_v29, 1 }
 0x112   : > { %v875_v16 = vrot.slane %v873_v7, 6  ;;  %v878_v18 = vrot.slane %v876_v9, 7  ;;  %v763_v19 = vmax.f32 %v727_v10, 0.0  ;;  %v2644_v45 = vrot.slane %v2642_v17, 1 }
 0x113   : > { %v710_v20 = vadd.f32 %v6506_v48, %v671_v11  ;;  %v1049_v24 = vor.u32 %v1048_v15, %v1045_v13  ;;  %v2647_v50 = vrot.slane %v2645_v21, 2  ;;  %v6651_v62 = vsel %vm3025_vm1, %v3026_v61, %v3027_v27 }
 0x114   : > { %v1297_v26 = vld [vmem:[#allocation2 + $0x60] sm:$0xc]  ;;  %v879_v31 = vor.u32 %v878_v18, %v875_v16  ;;  %v799_v35 = vpack.c.bf16 %v763_v19, %v763_v19  ;;  %v6658_v63 = vsel %vm1987_vm14, %v8565_v51, %v1991_v39 }
 0x115   : > { %v746_v36 = vmax.f32 %v710_v20, 0.0  ;;  %v633_v38 = vpop.f32.mrf.mxu2  ;;  %v1298_v40 = vsel %vm6612_vm15, 0, %v1297_v26  ;;  %v1050_v41 = vsel %vm6526_vm7, %v1041_v8, %v1049_v24  ;;  %v1051_v52 = vrot.slane %v1049_v24, 4 }
 0x116   : > { %v689_v44 = vmul.f32 %v6501_v47, %v633_v38  ;;  %1299 = vst [vmem:[#allocation2 + $0x60] sm:$0xc] %v1298_v40  ;;  %v880_v46 = vsel %vm6526_vm7, %v871_v23, %v879_v31  ;;  %v1053_v14 = vshrl.u32 %v799_v35, 16  ;;  %v1056_v28 = vshll.u32 %v799_v35, 16 }
 0x117   : > { %v591_v49 = vpop.f32.mrf.mxu0  ;;  %1234 = vst [vmem:[#allocation2 + $0x64] sm:$0xf] %v1050_v41  ;;  %v782_v54 = vpack.c.bf16 %v746_v36, %v746_v36  ;;  %v6664_v7 = vor.u32 %v2647_v50, %v2644_v45  ;;  %v881_v13 = vrot.slane %v879_v31, 4 }
 0x118   : > { %v728_v55 = vadd.f32 %v6506_v48, %v689_v44  ;;  %v672_v56 = vmul.f32 %v6501_v47, %v591_v49  ;;  %v6644_v57 = vld [vmem:[#allocation2 + $0x18] sm:$0xff]  ;;  %1217 = vst [vmem:[#allocation2 + $0x20] sm:$0xf] %v880_v46  ;;  %v1055_v59 = vrot.slane %v1053_v14, 6  ;;  %v1058_v60 = vrot.slane %v1056_v28, 7 }
 0x119   : > { %v6646_v58 = vld [vmem:[#allocation2 + $0x18] sm:$0xff]  ;;  %v883_v0 = vshrl.u32 %v782_v54, 16  ;;  %v886_v1 = vshll.u32 %v782_v54, 16  ;;  %v1512_v61 = vshll.u32 %v6644_v57, 16  ;;  %v6689_v35 = vsel %vm2632_vm5, %v2640_v3, %v6664_v7 }
 0x11a   : > { %v764_v2 = vmax.f32 %v728_v55, 0.0  ;;  %v711_v4 = vadd.f32 %v6506_v48, %v672_v56  ;;  %1890 = vmatmul.bf16.gmra.mxu2 %v6644_v57  ;;  %v1059_v5 = vor.u32 %v1058_v60, %v1055_v59  ;;  %v2376_v6 = vrot.slane %v6646_v58, 1 }
 0x11b   : > { %v885_v8 = vrot.slane %v883_v0, 6  ;;  %v888_v9 = vrot.slane %v886_v1, 7  ;;  %v6673_v18 = vrot.slane %v1512_v61, 1  ;;  %v2651_v3 = vshrl.u32 %v6646_v58, 16 }
 0x11c   : > { %v800_v10 = vpack.c.bf16 %v764_v2, %v764_v2  ;;  %v747_v11 = vmax.f32 %v711_v4, 0.0  ;;  %v1060_v15 = vsel %vm6526_vm7, %v1051_v52, %v1059_v5  ;;  %v2377_v17 = vsel %vm1987_vm14, %v2374_v42, %v2376_v6 }
 0x11d   : > { %v636_v16 = vpop.f32.mrf.mxu2  ;;  %1235 = vst [vmem:[#allocation2 + $0x68] sm:$0xf] %v1060_v15  ;;  %v889_v20 = vor.u32 %v888_v9, %v885_v8  ;;  %2489 = vmatmul.bf16.gmra.mxu0 %v2377_v17  ;;  %v1515_v42 = vsel %vm1487_vm10, %v1510_v25, %v6673_v18  ;;  %v1061_v38 = vrot.slane %v1059_v5, 4  ;;  %v2654_v28 = vshll.u32 %v6646_v58, 16  ;;  %v6996_v9 = vld [vmem:[#allocation2 + $0x58] sm:$0xff] }
 0x11e   : > { %v1063_v21 = vshrl.u32 %v800_v10, 16  ;;  %v1066_v23 = vshll.u32 %v800_v10, 16  ;;  %v783_v24 = vpack.c.bf16 %v747_v11, %v747_v11  ;;  %v690_v26 = vmul.f32 %v6501_v47, %v636_v16  ;;  %1720 = vmatmul.bf16.gmra.mxu1 %v1515_v42 }
 0x11f   : > { %v593_v31 = vpop.f32.mrf.mxu0  ;;  %v1265_v36 = vld [vmem:[#allocation2 + $0x20] sm:$0x8]  ;;  %v890_v40 = vsel %vm6526_vm7, %v881_v13, %v889_v20  ;;  %v3029_v54 = vrot.slane %v6646_v58, 2  ;;  %v891_v55 = vrot.slane %v889_v20, 4  ;;  %v2653_v60 = vrot.slane %v2651_v3, 1 }
 0x120   : > { %v1065_v41 = vrot.slane %v1063_v21, 6  ;;  %v1068_v44 = vrot.slane %v1066_v23, 7  ;;  %v1266_v45 = vsel %vm6677_vm8, 0, %v1265_v36  ;;  %1218 = vst [vmem:[#allocation2 + $0x24] sm:$0xf] %v890_v40  ;;  %v893_v25 = vshrl.u32 %v783_v24, 16 }
 0x121   : > { %v896_v46 = vshll.u32 %v783_v24, 16  ;;  %v729_v14 = vadd.f32 %v6506_v48, %v690_v26  ;;  %1267 = vst [vmem:[#allocation2 + $0x20] sm:$0x8] %v1266_v45  ;;  %v673_v43 = vmul.f32 %v6501_v47, %v593_v31  ;;  %v2656_v5 = vrot.slane %v2654_v28, 2 }
 0x122   : > { %v1069_v33 = vor.u32 %v1068_v44, %v1065_v41  ;;  %v895_v49 = vrot.slane %v893_v25, 6  ;;  %v6708_v61 = vsel %vm3025_vm1, %v3027_v27, %v3029_v54 }
 0x123   : > { %v898_v50 = vrot.slane %v896_v46, 7  ;;  %v765_v52 = vmax.f32 %v729_v14, 0.0  ;;  %v712_v59 = vadd.f32 %v6506_v48, %v673_v43  ;;  %v6723_v23 = vor.u32 %v2656_v5, %v2653_v60 }
 0x124   : > { %v1070_v56 = vsel %vm6526_vm7, %v1061_v38, %v1069_v33  ;;  %v1300_v0 = vld [vmem:[#allocation2 + $0x68] sm:$0x8]  ;;  %v1071_v26 = vrot.slane %v1069_v33, 4 }
 0x125   : > { %1236 = vst [vmem:[#allocation2 + $0x6c] sm:$0xf] %v1070_v56  ;;  %v899_v1 = vor.u32 %v898_v50, %v895_v49  ;;  %v801_v2 = vpack.c.bf16 %v765_v52, %v765_v52  ;;  %v638_v4 = vpop.f32.mrf.mxu2  ;;  %v1301_v8 = vsel %vm6677_vm8, 0, %v1300_v0  ;;  %v748_v10 = vmax.f32 %v712_v59, 0.0 }
 0x126   : > { %v691_v11 = vmul.f32 %v6501_v47, %v638_v4  ;;  %1302 = vst [vmem:[#allocation2 + $0x68] sm:$0x8] %v1301_v8  ;;  %v6731_v45 = vsel %vm2632_vm5, %v6664_v7, %v6723_v23 }
 0x127   : > { %v900_v13 = vsel %vm6526_vm7, %v891_v55, %v899_v1  ;;  %v1073_v30 = vshrl.u32 %v801_v2, 16  ;;  %v1076_v15 = vshll.u32 %v801_v2, 16  ;;  %v596_v27 = vpop.f32.mrf.mxu0  ;;  %v1271_v16 = vld [vmem:[#allocation2 + $0x24] sm:$0x1]  ;;  %v784_v17 = vpack.c.bf16 %v748_v10, %v748_v10 }
 0x128   : > { %1219 = vst [vmem:[#allocation2 + $0x28] sm:$0xf] %v900_v13  ;;  %v730_v20 = vadd.f32 %v6506_v48, %v691_v11  ;;  %v674_v21 = vmul.f32 %v6501_v47, %v596_v27  ;;  %v1272_v24 = vsel %vm6714_vm12, 0, %v1271_v16  ;;  %v901_v28 = vrot.slane %v899_v1, 4 }
 0x129   : > { %v1075_v31 = vrot.slane %v1073_v30, 6  ;;  %v1078_v42 = vrot.slane %v1076_v15, 7  ;;  %1273 = vst [vmem:[#allocation2 + $0x24] sm:$0x1] %v1272_v24  ;;  %v903_v36 = vshrl.u32 %v784_v17, 16  ;;  %v906_v38 = vshll.u32 %v784_v17, 16 }
 0x12a   : > { %v766_v40 = vmax.f32 %v730_v20, 0.0  ;;  %v713_v41 = vadd.f32 %v6506_v48, %v674_v21 }
 0x12b   : > { %v1079_v44 = vor.u32 %v1078_v42, %v1075_v31  ;;  %v905_v46 = vrot.slane %v903_v36, 6  ;;  %v908_v14 = vrot.slane %v906_v38, 7 }
 0x12c   : > { %v1303_v25 = vld [vmem:[#allocation2 + $0x6c] sm:$0x1]  ;;  %v802_v43 = vpack.c.bf16 %v766_v40, %v766_v40  ;;  %v749_v3 = vmax.f32 %v713_v41, 0.0 }
 0x12d   : > { %v1304_v33 = vsel %vm6714_vm12, 0, %v1303_v25  ;;  %v1080_v49 = vsel %vm6526_vm7, %v1071_v26, %v1079_v44  ;;  %v641_v50 = vpop.f32.mrf.mxu2  ;;  %v909_v52 = vor.u32 %v908_v14, %v905_v46  ;;  %v1081_v0 = vrot.slane %v1079_v44, 4 }
 0x12e   : > { %1305 = vst [vmem:[#allocation2 + $0x6c] sm:$0x1] %v1304_v33  ;;  %v1083_v55 = vshrl.u32 %v802_v43, 16  ;;  %v1086_v56 = vshll.u32 %v802_v43, 16  ;;  %v785_v59 = vpack.c.bf16 %v749_v3, %v749_v3  ;;  %v692_v7 = vmul.f32 %v6501_v47, %v641_v50 }
 0x12f   : > { %1237 = vst [vmem:[#allocation2 + $0x70] sm:$0xf] %v1080_v49  ;;  %v598_v60 = vpop.f32.mrf.mxu0  ;;  %v910_v2 = vsel %vm6526_vm7, %v901_v28, %v909_v52  ;;  %v1516_v26 = vshrl.u32 %v6644_v57, 16  ;;  %v911_v42 = vrot.slane %v909_v52, 4 }
 0x130   : > { %v1085_v4 = vrot.slane %v1083_v55, 6  ;;  %v1088_v5 = vrot.slane %v1086_v56, 7  ;;  %1220 = vst [vmem:[#allocation2 + $0x2c] sm:$0xf] %v910_v2  ;;  %v913_v1 = vshrl.u32 %v785_v59, 16  ;;  %v916_v8 = vshll.u32 %v785_v59, 16 }
 0x131   : > { %v731_v10 = vadd.f32 %v6506_v48, %v692_v7  ;;  %v675_v11 = vmul.f32 %v6501_v47, %v598_v60  ;;  %v6742_v13 = vld [vmem:[#allocation2 + $0x20] sm:$0xff]  ;;  %v1518_v14 = vor.u32 %v1516_v26, %v6673_v18 }
 0x132   : > { %v6744_v30 = vld [vmem:[#allocation2 + $0x20] sm:$0xff]  ;;  %v1089_v15 = vor.u32 %v1088_v5, %v1085_v4  ;;  %v915_v27 = vrot.slane %v913_v1, 6  ;;  %v918_v16 = vrot.slane %v916_v8, 7  ;;  %1895 = vmatmul.bf16.gmra.mxu2 %v6742_v13  ;;  %v1520_v31 = vshll.u32 %v6742_v13, 16 }
 0x133   : > { %v767_v17 = vmax.f32 %v731_v10, 0.0  ;;  %v714_v20 = vadd.f32 %v6506_v48, %v675_v11  ;;  %v2378_v24 = vrot.slane %v6744_v30, 1  ;;  %v2660_v50 = vshrl.u32 %v6744_v30, 16 }
 0x134   : > { %v1090_v21 = vsel %vm6526_vm7, %v1081_v0, %v1089_v15  ;;  %v919_v36 = vor.u32 %v918_v16, %v915_v27  ;;  %v6766_v43 = vrot.slane %v1520_v31, 1  ;;  %v1091_v7 = vrot.slane %v1089_v15, 4 }
 0x135   : > { %1238 = vst [vmem:[#allocation2 + $0x74] sm:$0xf] %v1090_v21  ;;  %v803_v38 = vpack.c.bf16 %v767_v17, %v767_v17  ;;  %v750_v40 = vmax.f32 %v714_v20, 0.0  ;;  %v643_v41 = vpop.f32.mrf.mxu2  ;;  %v2379_v46 = vsel %vm1987_vm14, %v2376_v6, %v2378_v24  ;;  %v2662_v10 = vrot.slane %v2660_v50, 1 }
 0x136   : > { %v693_v25 = vmul.f32 %v6501_v47, %v643_v41  ;;  %v920_v3 = vsel %vm6526_vm7, %v911_v42, %v919_v36  ;;  %2494 = vmatmul.bf16.gmra.mxu0 %v2379_v46  ;;  %v1523_v18 = vsel %vm1487_vm10, %v1518_v14, %v6766_v43  ;;  %v2663_v11 = vshll.u32 %v6744_v30, 16 }
 0x137   : > { %v1093_v33 = vshrl.u32 %v803_v38, 16  ;;  %v1096_v28 = vshll.u32 %v803_v38, 16  ;;  %v601_v49 = vpop.f32.mrf.mxu0  ;;  %v1276_v52 = vld [vmem:[#allocation2 + $0x2c] sm:$0x3]  ;;  %1221 = vst [vmem:[#allocation2 + $0x30] sm:$0xf] %v920_v3  ;;  %v786_v55 = vpack.c.bf16 %v750_v40, %v750_v40  ;;  %1725 = vmatmul.bf16.gmra.mxu1 %v1523_v18 }
 0x138   : > { %v732_v56 = vadd.f32 %v6506_v48, %v693_v25  ;;  %v676_v6 = vmul.f32 %v6501_v47, %v601_v49  ;;  %v1277_v59 = vsel %vm6755_vm2, 0, %v1276_v52  ;;  %v3031_v27 = vrot.slane %v6744_v30, 2 }
 0x139   : > { %v1095_v60 = vrot.slane %v1093_v33, 6  ;;  %v1098_v0 = vrot.slane %v1096_v28, 7  ;;  %1278 = vst [vmem:[#allocation2 + $0x2c] sm:$0x3] %v1277_v59  ;;  %v923_v2 = vshrl.u32 %v786_v55, 16  ;;  %v926_v4 = vshll.u32 %v786_v55, 16 }
 0x13a   : > { %v768_v5 = vmax.f32 %v732_v56, 0.0  ;;  %v715_v1 = vadd.f32 %v6506_v48, %v676_v6  ;;  %v921_v31 = vrot.slane %v919_v36, 4  ;;  %v2665_v40 = vrot.slane %v2663_v11, 2 }
 0x13b   : > { %v1099_v8 = vor.u32 %v1098_v0, %v1095_v60  ;;  %v925_v17 = vrot.slane %v923_v2, 6  ;;  %v928_v20 = vrot.slane %v926_v4, 7  ;;  %v6792_v36 = vsel %vm3025_vm1, %v3029_v54, %v3031_v27 }
 0x13c   : > { %v1306_v16 = vld [vmem:[#allocation2 + $0x74] sm:$0x3]  ;;  %v804_v21 = vpack.c.bf16 %v768_v5, %v768_v5  ;;  %v751_v15 = vmax.f32 %v715_v1, 0.0  ;;  %v6785_v28 = vor.u32 %v2665_v40, %v2662_v10  ;;  %v1524_v10 = vshrl.u32 %v6742_v13, 16 }
 0x13d   : > { %v1307_v26 = vsel %vm6755_vm2, 0, %v1306_v16  ;;  %v1100_v42 = vsel %vm6526_vm7, %v1091_v7, %v1099_v8  ;;  %v646_v38 = vpop.f32.mrf.mxu2  ;;  %v929_v41 = vor.u32 %v928_v20, %v925_v17  ;;  %v1101_v49 = vrot.slane %v1099_v8, 4 }
 0x13e   : > { %1308 = vst [vmem:[#allocation2 + $0x74] sm:$0x3] %v1307_v26  ;;  %v1103_v25 = vshrl.u32 %v804_v21, 16  ;;  %v1106_v46 = vshll.u32 %v804_v21, 16  ;;  %v787_v14 = vpack.c.bf16 %v751_v15, %v751_v15  ;;  %v694_v3 = vmul.f32 %v6501_v47, %v646_v38 }
 0x13f   : > { %1239 = vst [vmem:[#allocation2 + $0x78] sm:$0xf] %v1100_v42  ;;  %v603_v33 = vpop.f32.mrf.mxu0  ;;  %v930_v50 = vsel %vm6526_vm7, %v921_v31, %v929_v41  ;;  %v6805_v54 = vsel %vm2632_vm5, %v6723_v23, %v6785_v28  ;;  %v931_v16 = vrot.slane %v929_v41, 4  ;;  %v1526_v26 = vor.u32 %v1524_v10, %v6766_v43 }
 0x140   : > { %v1105_v52 = vrot.slane %v1103_v25, 6  ;;  %v1108_v55 = vrot.slane %v1106_v46, 7  ;;  %1222 = vst [vmem:[#allocation2 + $0x34] sm:$0xf] %v930_v50  ;;  %v933_v56 = vshrl.u32 %v787_v14, 16  ;;  %v936_v6 = vshll.u32 %v787_v14, 16 }
 0x141   : > { %v733_v18 = vadd.f32 %v6506_v48, %v694_v3  ;;  %v677_v59 = vmul.f32 %v6501_v47, %v603_v33  ;;  %v6798_v7 = vld [vmem:[#allocation2 + $0x28] sm:$0xff]  ;;  %v6835_v46 = vld [vmem:[%s8554_s2] ss:$0 sm:$0xff] }
 0x142   : > { %v6800_v60 = vld [vmem:[#allocation2 + $0x28] sm:$0xff]  ;;  %v1109_v58 = vor.u32 %v1108_v55, %v1105_v52  ;;  %v935_v0 = vrot.slane %v933_v56, 6  ;;  %v938_v2 = vrot.slane %v936_v6, 7  ;;  %1900 = vmatmul.bf16.gmra.mxu2 %v6798_v7  ;;  %v1528_v11 = vshll.u32 %v6798_v7, 16 }
 0x143   : > { %v769_v4 = vmax.f32 %v733_v18, 0.0  ;;  %v716_v5 = vadd.f32 %v6506_v48, %v677_v59  ;;  %v2380_v8 = vrot.slane %v6800_v60, 1  ;;  %v2669_v41 = vshrl.u32 %v6800_v60, 16 }
 0x144   : > { %v1110_v1 = vsel %vm6526_vm7, %v1101_v49, %v1109_v58  ;;  %v939_v23 = vor.u32 %v938_v2, %v935_v0  ;;  %v6821_v31 = vrot.slane %v1528_v11, 1  ;;  %v1111_v49 = vrot.slane %v1109_v58, 4 }
 0x145   : > { %1240 = vst [vmem:[#allocation2 + $0x7c] sm:$0xf] %v1110_v1  ;;  %v805_v17 = vpack.c.bf16 %v769_v4, %v769_v4  ;;  %v752_v20 = vmax.f32 %v716_v5, 0.0  ;;  %v648_v21 = vpop.f32.mrf.mxu2  ;;  %v2381_v48 = vsel %vm1987_vm14, %v2378_v24, %v2380_v8  ;;  %v6829_v24 = vld [vmem:[%s8555_s3] ss:$0 sm:$0xff]  ;;  %v2671_v0 = vrot.slane %v2669_v41, 1 }
 0x146   : > { %v695_v15 = vmul.f32 %v6501_v47, %v648_v21  ;;  %v940_v13 = vsel %vm6526_vm7, %v931_v16, %v939_v23  ;;  %2499 = vmatmul.bf16.gmra.mxu0 %v2381_v48  ;;  %v1531_v3 = vsel %vm1487_vm10, %v1526_v26, %v6821_v31  ;;  %v2672_v2 = vshll.u32 %v6800_v60, 16 }
 0x147   : > { %v1113_v42 = vshrl.u32 %v805_v17, 16  ;;  %v1116_v38 = vshll.u32 %v805_v17, 16  ;;  %v606_v40 = vpop.f32.mrf.mxu0  ;;  %v1279_v47 = vld [vmem:[#allocation2 + $0x34] sm:$0x6]  ;;  %1223 = vst [vmem:[#allocation2 + $0x38] sm:$0xf] %v940_v13  ;;  %v788_v25 = vpack.c.bf16 %v752_v20, %v752_v20  ;;  %1730 = vmatmul.bf16.gmra.mxu1 %v1531_v3 }
 0x148   : > { %v734_v43 = vadd.f32 %v6829_v24, %v695_v15  ;;  %v678_v14 = vmul.f32 %v6835_v46, %v606_v40  ;;  %v1280_v33 = vsel %vm6558_vm11, 0, %v1279_v47  ;;  %v8564_v4 = vrot.slane %v6644_v57, 1 }
 0x149   : > { %v1115_v50 = vrot.slane %v1113_v42, 6  ;;  %v1118_v52 = vrot.slane %v1116_v38, 7  ;;  %1281 = vst [vmem:[#allocation2 + $0x34] sm:$0x6] %v1280_v33  ;;  %v943_v55 = vshrl.u32 %v788_v25, 16  ;;  %v946_v56 = vshll.u32 %v788_v25, 16 }
 0x14a   : > { %v770_v6 = vmax.f32 %v734_v43, 0.0  ;;  %v717_v18 = vadd.f32 %v6829_v24, %v678_v14  ;;  %v941_v17 = vrot.slane %v939_v23, 4  ;;  %v2674_v15 = vrot.slane %v2672_v2, 2 }
 0x14b   : > { %v1119_v59 = vor.u32 %v1118_v52, %v1115_v50  ;;  %v945_v1 = vrot.slane %v943_v55, 6  ;;  %v948_v10 = vrot.slane %v946_v56, 7  ;;  %v6857_v32 = vsel %vm1987_vm14, %v1991_v39, %v8564_v4 }
 0x14c   : > { %v1309_v5 = vld [vmem:[#allocation2 + $0x7c] sm:$0x6]  ;;  %v806_v11 = vpack.c.bf16 %v770_v6, %v770_v6  ;;  %v753_v58 = vmax.f32 %v717_v18, 0.0  ;;  %v6850_v41 = vor.u32 %v2674_v15, %v2671_v0  ;;  %v1532_v2 = vshrl.u32 %v6798_v7, 16 }
 0x14d   : > { %v1310_v16 = vsel %vm6558_vm11, 0, %v1309_v5  ;;  %v1120_v20 = vsel %vm6526_vm7, %v1111_v49, %v1119_v59  ;;  %v651_v21 = vpop.f32.mrf.mxu2  ;;  %v949_v48 = vor.u32 %v948_v10, %v945_v1  ;;  %v1121_v23 = vrot.slane %v1119_v59, 4 }
 0x14e   : > { %1311 = vst [vmem:[#allocation2 + $0x7c] sm:$0x6] %v1310_v16  ;;  %v1123_v26 = vshrl.u32 %v806_v11, 16  ;;  %v1126_v13 = vshll.u32 %v806_v11, 16  ;;  %v789_v42 = vpack.c.bf16 %v753_v58, %v753_v58  ;;  %v696_v38 = vmul.f32 %v6835_v46, %v651_v21 }
 0x14f   : > { %1241 = vst [vmem:[#allocation2 + $0x80] sm:$0xf] %v1120_v20  ;;  %v608_v40 = vpop.f32.mrf.mxu0  ;;  %v950_v47 = vsel %vm6526_vm7, %v941_v17, %v949_v48  ;;  %v6870_v39 = vsel %vm2632_vm5, %v6785_v28, %v6850_v41  ;;  %v951_v1 = vrot.slane %v949_v48, 4  ;;  %v1534_v20 = vor.u32 %v1532_v2, %v6821_v31 }
 0x150   : > { %v1125_v25 = vrot.slane %v1123_v26, 6  ;;  %v1128_v43 = vrot.slane %v1126_v13, 7  ;;  %1224 = vst [vmem:[#allocation2 + $0x3c] sm:$0xf] %v950_v47  ;;  %v953_v14 = vshrl.u32 %v789_v42, 16  ;;  %v956_v3 = vshll.u32 %v789_v42, 16 }
 0x151   : > { %v735_v33 = vadd.f32 %v6829_v24, %v696_v38  ;;  %v679_v49 = vmul.f32 %v6835_v46, %v608_v40  ;;  %v6863_v50 = vld [vmem:[#allocation2 + $0x30] sm:$0xff]  ;;  %v3033_v2 = vrot.slane %v6800_v60, 2 }
 0x152   : > { %v6865_v52 = vld [vmem:[#allocation2 + $0x30] sm:$0xff]  ;;  %v1129_v29 = vor.u32 %v1128_v43, %v1125_v25  ;;  %v955_v55 = vrot.slane %v953_v14, 6  ;;  %v958_v56 = vrot.slane %v956_v3, 7  ;;  %1905 = vmatmul.bf16.gmra.mxu2 %v6863_v50  ;;  %v1536_v5 = vshll.u32 %v6863_v50, 16 }
 0x153   : > { %v771_v6 = vmax.f32 %v735_v33, 0.0  ;;  %v718_v18 = vadd.f32 %v6829_v24, %v679_v49  ;;  %v2382_v0 = vrot.slane %v6865_v52, 1  ;;  %v2678_v42 = vshrl.u32 %v6865_v52, 16 }
 0x154   : > { %v1130_v59 = vsel %vm6526_vm7, %v1121_v23, %v1129_v29  ;;  %v959_v28 = vor.u32 %v958_v56, %v955_v55  ;;  %v6886_v21 = vrot.slane %v1536_v5, 1  ;;  %v1131_v25 = vrot.slane %v1129_v29, 4  ;;  %v5973_v56 = vld [vmem:[#allocation9 + $0x138] sm:$0xff] }
 0x155   : > { %1242 = vst [vmem:[#allocation2 + $0x84] sm:$0xf] %v1130_v59  ;;  %v807_v10 = vpack.c.bf16 %v771_v6, %v771_v6  ;;  %v754_v11 = vmax.f32 %v718_v18, 0.0  ;;  %v653_v58 = vpop.f32.mrf.mxu2  ;;  %v2383_v17 = vsel %vm1987_vm14, %v2380_v8, %v2382_v0  ;;  %v2680_v18 = vrot.slane %v2678_v42, 1  ;;  %2869 = vmatpush.bf16.msrb.mxu1 %v5973_v56 }
 0x156   : > { %v697_v16 = vmul.f32 %v6835_v46, %v653_v58  ;;  %v960_v15 = vsel %vm6526_vm7, %v951_v1, %v959_v28  ;;  %2504 = vmatmul.bf16.gmra.mxu0 %v2383_v17  ;;  %v1539_v31 = vsel %vm1487_vm10, %v1534_v20, %v6886_v21  ;;  %v2681_v59 = vshll.u32 %v6865_v52, 16 }
 0x157   : > { %v1133_v48 = vshrl.u32 %v807_v10, 16  ;;  %v1136_v26 = vshll.u32 %v807_v10, 16  ;;  %v611_v13 = vpop.f32.mrf.mxu0  ;;  %v1282_v38 = vld [vmem:[#allocation2 + $0x3c] sm:$0xc]  ;;  %1225 = vst [vmem:[#allocation2 + $0x40] sm:$0xf] %v960_v15  ;;  %v790_v40 = vpack.c.bf16 %v754_v11, %v754_v11  ;;  %1735 = vmatmul.bf16.gmra.mxu1 %v1539_v31  ;;  %v6912_v53 = vsel %vm3025_vm1, %v3031_v27, %v3033_v2 }
 0x158   : > { %v736_v23 = vadd.f32 %v6829_v24, %v697_v16  ;;  %v680_v8 = vmul.f32 %v6835_v46, %v611_v13  ;;  %v1283_v47 = vsel %vm6612_vm15, 0, %v1282_v38  ;;  %v961_v16 = vrot.slane %v959_v28, 4  ;;  %v5972_v38 = vld [vmem:[#allocation9 + $0x130] sm:$0xff] }
 0x159   : > { %v1135_v43 = vrot.slane %v1133_v48, 6  ;;  %v1138_v14 = vrot.slane %v1136_v26, 7  ;;  %1284 = vst [vmem:[#allocation2 + $0x3c] sm:$0xc] %v1283_v47  ;;  %v963_v3 = vshrl.u32 %v790_v40, 16  ;;  %v966_v33 = vshll.u32 %v790_v40, 16  ;;  %2870 = vmatpush.bf16.msrb.mxu1 %v5972_v38 }
 0x15a   : > { %v772_v49 = vmax.f32 %v736_v23, 0.0  ;;  %v719_v55 = vadd.f32 %v6829_v24, %v680_v8  ;;  %v2683_v15 = vrot.slane %v2681_v59, 2  ;;  %v5970_v38 = vld [vmem:[#allocation9 + $0x120] sm:$0xff] }
 0x15b   : > { %v1139_v6 = vor.u32 %v1138_v14, %v1135_v43  ;;  %v965_v1 = vrot.slane %v963_v3, 6  ;;  %v968_v10 = vrot.slane %v966_v33, 7 }
 0x15c   : > { %v1312_v5 = vld [vmem:[#allocation2 + $0x84] sm:$0xc]  ;;  %v808_v29 = vpack.c.bf16 %v772_v49, %v772_v49  ;;  %v755_v11 = vmax.f32 %v719_v55, 0.0  ;;  %v6905_v8 = vor.u32 %v2683_v15, %v2680_v18  ;;  %v5971_v55 = vld [vmem:[#allocation9 + $0x128] sm:$0xff] }
 0x15d   : > { %v1313_v58 = vsel %vm6612_vm15, 0, %v1312_v5  ;;  %v1140_v17 = vsel %vm6526_vm7, %v1131_v25, %v1139_v6  ;;  %v656_v20 = vpop.f32.mrf.mxu2  ;;  %v969_v48 = vor.u32 %v968_v10, %v965_v1  ;;  %v1141_v28 = vrot.slane %v1139_v6, 4  ;;  %2871 = vmatpush.bf16.msrb.mxu1 %v5971_v55 }
 0x15e   : > { %1314 = vst [vmem:[#allocation2 + $0x84] sm:$0xc] %v1313_v58  ;;  %v1143_v26 = vshrl.u32 %v808_v29, 16  ;;  %v1146_v13 = vshll.u32 %v808_v29, 16  ;;  %v791_v42 = vpack.c.bf16 %v755_v11, %v755_v11  ;;  %v698_v40 = vmul.f32 %v6835_v46, %v656_v20 }
 0x15f   : > { %1243 = vst [vmem:[#allocation2 + $0x88] sm:$0xf] %v1140_v17  ;;  %v613_v23 = vpop.f32.mrf.mxu0  ;;  %v970_v31 = vsel %vm6526_vm7, %v961_v16, %v969_v48  ;;  %v6925_v56 = vsel %vm2632_vm5, %v6850_v41, %v6905_v8  ;;  %v1540_v29 = vshrl.u32 %v6863_v50, 16  ;;  %v971_v58 = vrot.slane %v969_v48, 4 }
 0x160   : > { %v1145_v47 = vrot.slane %v1143_v26, 6  ;;  %v1148_v25 = vrot.slane %v1146_v13, 7  ;;  %1226 = vst [vmem:[#allocation2 + $0x44] sm:$0xf] %v970_v31  ;;  %v973_v43 = vshrl.u32 %v791_v42, 16  ;;  %v976_v14 = vshll.u32 %v791_v42, 16 }
 0x161   : > { %v737_v3 = vadd.f32 %v6829_v24, %v698_v40  ;;  %v681_v33 = vmul.f32 %v6835_v46, %v613_v23  ;;  %v6918_v49 = vld [vmem:[#allocation2 + $0x38] sm:$0xff]  ;;  %v1542_v13 = vor.u32 %v1540_v29, %v6886_v21  ;;  %2872 = vmatpush.bf16.msrb.mxu1 %v5970_v38 }
 0x162   : > { %v6920_v30 = vld [vmem:[#allocation2 + $0x38] sm:$0xff]  ;;  %v1149_v27 = vor.u32 %v1148_v25, %v1145_v47  ;;  %v975_v6 = vrot.slane %v973_v43, 6  ;;  %v978_v18 = vrot.slane %v976_v14, 7  ;;  %1910 = vmatmul.bf16.gmra.mxu2 %v6918_v49  ;;  %v1544_v11 = vshll.u32 %v6918_v49, 16  ;;  %v5969_v14 = vld [vmem:[#allocation9 + $0x118] sm:$0xff] }
 0x163   : > { %v773_v59 = vmax.f32 %v737_v3, 0.0  ;;  %v720_v5 = vadd.f32 %v6829_v24, %v681_v33  ;;  %v2384_v10 = vrot.slane %v6920_v30, 1 }
 0x164   : > { %v1150_v1 = vsel %vm6526_vm7, %v1141_v28, %v1149_v27  ;;  %v979_v41 = vor.u32 %v978_v18, %v975_v6  ;;  %v6941_v42 = vrot.slane %v1544_v11, 1  ;;  %v1151_v21 = vrot.slane %v1149_v27, 4  ;;  %v5940_v6 = vld [vmem:[#allocation9 + $0xb8] sm:$0xff] }
 0x165   : > { %1244 = vst [vmem:[#allocation2 + $0x8c] sm:$0xf] %v1150_v1  ;;  %v809_v16 = vpack.c.bf16 %v773_v59, %v773_v59  ;;  %v756_v17 = vmax.f32 %v720_v5, 0.0  ;;  %v658_v20 = vpop.f32.mrf.mxu2  ;;  %v2385_v26 = vsel %vm1987_vm14, %v2382_v0, %v2384_v10  ;;  %2091 = vmatpush.bf16.msrb.mxu3 %v5940_v6  ;;  %2873 = vmatpush.bf16.msrb.mxu1 %v5969_v14 }
 0x166   : > { %v699_v15 = vmul.f32 %v6835_v46, %v658_v20  ;;  %v980_v48 = vsel %vm6526_vm7, %v971_v58, %v979_v41  ;;  %2509 = vmatmul.bf16.gmra.mxu0 %v2385_v26  ;;  %v1547_v47 = vsel %vm1487_vm10, %v1542_v13, %v6941_v42  ;;  %v981_v27 = vrot.slane %v979_v41, 4 }
 0x167   : > { %v1153_v40 = vshrl.u32 %v809_v16, 16  ;;  %v1156_v23 = vshll.u32 %v809_v16, 16  ;;  %v1285_v28 = vld [vmem:[#allocation2 + $0x44] sm:$0x8]  ;;  %1227 = vst [vmem:[#allocation2 + $0x48] sm:$0xf] %v980_v48  ;;  %v792_v46 = vpack.c.bf16 %v756_v17, %v756_v17  ;;  %1740 = vmatmul.bf16.gmra.mxu1 %v1547_v47 }
 0x168   : > { %v738_v31 = vadd.f32 %v6829_v24, %v699_v15  ;;  %v1286_v0 = vsel %vm6677_vm8, 0, %v1285_v28  ;;  %v5968_v15 = vld [vmem:[#allocation9 + $0x110] sm:$0xff]  ;;  %v2687_v26 = vshrl.u32 %v6920_v30, 16 }
 0x169   : > { %v1155_v25 = vrot.slane %v1153_v40, 6  ;;  %v1158_v43 = vrot.slane %v1156_v23, 7  ;;  %1287 = vst [vmem:[#allocation2 + $0x44] sm:$0x8] %v1286_v0  ;;  %v983_v3 = vshrl.u32 %v792_v46, 16  ;;  %v986_v33 = vshll.u32 %v792_v46, 16  ;;  %2874 = vmatpush.bf16.msrb.mxu1 %v5968_v15 }
 0x16a   : > { %v774_v55 = vmax.f32 %v738_v31, 0.0  ;;  %v2690_v31 = vshll.u32 %v6920_v30, 16  ;;  %v1548_v0 = vshrl.u32 %v6918_v49, 16 }
 0x16b   : > { %v1159_v18 = vor.u32 %v1158_v43, %v1155_v25  ;;  %v985_v24 = vrot.slane %v983_v3, 6  ;;  %v988_v5 = vrot.slane %v986_v33, 7  ;;  %v2689_v25 = vrot.slane %v2687_v26, 1  ;;  %v1247_v33 = vld [vmem:[#allocation2 + $0x98] sm:$0x3] }
 0x16c   : > { %v1315_v59 = vld [vmem:[#allocation2 + $0x8c] sm:$0x8]  ;;  %v810_v1 = vpack.c.bf16 %v774_v55, %v774_v55  ;;  %v1550_v55 = vor.u32 %v1548_v0, %v6941_v42  ;;  %v2692_v6 = vrot.slane %v2690_v31, 2  ;;  %v2726_v0 = vshll.u32 %v6996_v9, 16 }
 0x16d   : > { %v1316_v29 = vsel %vm6677_vm8, 0, %v1315_v59  ;;  %v1160_v11 = vsel %vm6526_vm7, %v1151_v21, %v1159_v18  ;;  %v6954_v58 = vpop.f32.mrf.mxu2  ;;  %v989_v16 = vor.u32 %v988_v5, %v985_v24  ;;  %v1161_v38 = vrot.slane %v1159_v18, 4  ;;  %v5967_v21 = vld [vmem:[#allocation9 + $0x108] sm:$0xff] }
 0x16e   : > { %1317 = vst [vmem:[#allocation2 + $0x8c] sm:$0x8] %v1316_v29  ;;  %v1163_v17 = vshrl.u32 %v810_v1, 16  ;;  %v1166_v20 = vshll.u32 %v810_v1, 16  ;;  %v1288_v13 = vld [vmem:[#allocation2 + $0x48] sm:$0x1]  ;;  %2875 = vmatpush.bf16.msrb.mxu1 %v5967_v21 }
 0x16f   : > { %1245 = vst [vmem:[#allocation2 + $0x90] sm:$0xf] %v1160_v11  ;;  %v1289_v19 = vsel %vm6714_vm12, 0, %v1288_v13  ;;  %v990_v41 = vsel %vm6526_vm7, %v981_v27, %v989_v16  ;;  %v991_v48 = vrot.slane %v989_v16, 4  ;;  %v5966_v29 = vld [vmem:[#allocation9 + $0x100] sm:$0xff]  ;;  %v2693_v27 = vor.u32 %v2692_v6, %v2689_v25 }
 0x170   : > { %v1165_v40 = vrot.slane %v1163_v17, 6  ;;  %1290 = vst [vmem:[#allocation2 + $0x48] sm:$0x1] %v1289_v19  ;;  %v1168_v23 = vrot.slane %v1166_v20, 7  ;;  %v6961_v28 = vld [vmem:[#allocation2 + $0x40] sm:$0xff]  ;;  %v5939_v19 = vld [vmem:[#allocation9 + $0xb0] sm:$0xff] }
 0x171   : > { %v6963_v46 = vld [vmem:[#allocation2 + $0x40] sm:$0xff]  ;;  %v1000_v47 = vsel %vm6526_vm7, %v991_v48, %v6530_v37  ;;  %1228 = vst [vmem:[#allocation2 + $0x4c] sm:$0xf] %v990_v41  ;;  %v1552_v3 = vshll.u32 %v6961_v28, 16  ;;  %v6990_v16 = vsel %vm2632_vm5, %v6905_v8, %v2693_v27  ;;  %2092 = vmatpush.bf16.msrb.mxu3 %v5939_v19  ;;  %v1556_v60 = vshrl.u32 %v6961_v28, 16 }
 0x172   : > { %1229 = vst [vmem:[#allocation2 + $0x50] sm:$0xf] %v1000_v47  ;;  %v1169_v43 = vor.u32 %v1168_v23, %v1165_v40  ;;  %1915 = vmatmul.bf16.gmra.mxu2 %v6961_v28  ;;  %v2386_v14 = vrot.slane %v6963_v46, 1  ;;  %v2699_v17 = vshll.u32 %v6963_v46, 16  ;;  %2876 = vmatpush.bf16.msrb.mxu1 %v5966_v29  ;;  %v2723_v47 = vshrl.u32 %v6996_v9, 16 }
 0x173   : > { %v1554_v5 = vrot.slane %v1552_v3, 1  ;;  %v3035_v3 = vrot.slane %v6865_v52, 2  ;;  %v2728_v29 = vrot.slane %v2726_v0, 2 }
 0x174   : > { %v1170_v37 = vsel %vm6526_vm7, %v1161_v38, %v1169_v43  ;;  %v1171_v18 = vrot.slane %v1169_v43, 4  ;;  %v2387_v24 = vsel %vm1987_vm14, %v2384_v10, %v2386_v14  ;;  %v2696_v10 = vshrl.u32 %v6963_v46, 16 }
 0x175   : > { %v6976_v59 = vpop.f32.mrf.mxu2  ;;  %1246 = vst [vmem:[#allocation2 + $0x94] sm:$0xf] %v1170_v37  ;;  %v1555_v11 = vsel %vm1487_vm10, %v1550_v55, %v1554_v5  ;;  %v2701_v26 = vrot.slane %v2699_v17, 2  ;;  %v7014_v55 = vld [vmem:[#allocation2 + $0x60] sm:$0xff]  ;;  %v7019_v37 = vsel %vm3025_vm1, %v3033_v2, %v3035_v3  ;;  %v2725_v52 = vrot.slane %v2723_v47, 1 }
 0x176   : > { %8609 = vst [vmem:[#allocation15_spill] sm:$0xff] %v6976_v59  ;;  %v1318_v1 = vld [vmem:[#allocation2 + $0x90] sm:$0x1]  ;;  %v1248_v34 = vsel %vm6482_vm3, %v1171_v18, %v1247_v33  ;;  %2514 = vmatmul.bf16.gmra.mxu0 %v2387_v24  ;;  %v2698_v15 = vrot.slane %v2696_v10, 1  ;;  %v2732_v44 = vshrl.u32 %v7014_v55, 16  ;;  %v1558_v10 = vor.u32 %v1556_v60, %v1554_v5 }
 0x177   : > { %v1319_v42 = vsel %vm6714_vm12, 0, %v1318_v1  ;;  %1249 = vst [vmem:[#allocation2 + $0x98] sm:$0x3] %v1248_v34  ;;  %1745 = vmatmul.bf16.gmra.mxu1 %v1555_v11  ;;  %v2735_v11 = vshll.u32 %v7014_v55, 16  ;;  %v2729_v19 = vor.u32 %v2728_v29, %v2725_v52  ;;  %v3037_v29 = vrot.slane %v6920_v30, 2 }
 0x178   : > { %1320 = vst [vmem:[#allocation2 + $0x90] sm:$0x1] %v1319_v42  ;;  %v6994_v20 = vld [vmem:[#allocation2 + $0x48] sm:$0xff]  ;;  %v2702_v48 = vor.u32 %v2701_v26, %v2698_v15  ;;  %vm4063_vm3 = vcmask 1044480   ;;  %vm3670_vm7 = vsmask.f32 5376 }
 0x179   : > { %v1291_v22 = vld [vmem:[#allocation2 + $0x50] sm:$0x3]  ;;  %v7000_v8 = vld [vmem:[#allocation2 + $0x48] sm:$0xff]  ;;  %v2705_v40 = vshrl.u32 %v6994_v20, 16  ;;  %v2708_v23 = vshll.u32 %v6994_v20, 16  ;;  %8610 = vst [vmem:[#allocation16_spill] sm:$0xff] %v7014_v55 }
 0x17a   : > { %v1292_v13 = vsel %vm6755_vm2, 0, %v1291_v22  ;;  %v7010_v21 = vsel %vm2632_vm5, %v2693_v27, %v2702_v48  ;;  %v2388_v24 = vrot.slane %v6994_v20, 1  ;;  %v1564_v17 = vshrl.u32 %v7000_v8, 16 }
 0x17b   : > { %v1711_v38 = vpop.f32.mrf.mxu1  ;;  %1293 = vst [vmem:[#allocation2 + $0x50] sm:$0x3] %v1292_v13  ;;  %v2707_v25 = vrot.slane %v2705_v40, 1  ;;  %v2710_v43 = vrot.slane %v2708_v23, 2 }
 0x17c   : > { %v7003_v41 = vadd.f32 %v6954_v58, %v1711_v38  ;;  %v1560_v58 = vshll.u32 %v7000_v8, 16  ;;  %v2389_v13 = vsel %vm1987_vm14, %v2386_v14, %v2388_v24  ;;  %v5938_v14 = vld [vmem:[#allocation9 + $0xa8] sm:$0xff] }
 0x17d   : > { %v1881_v31 = vpop.f32.mrf.mxu2  ;;  %v2711_v6 = vor.u32 %v2710_v43, %v2707_v25  ;;  %v2734_v25 = vrot.slane %v2732_v44, 1  ;;  %v2737_v43 = vrot.slane %v2735_v11, 2  ;;  %2093 = vmatpush.bf16.msrb.mxu3 %v5938_v14  ;;  %v5911_v14 = vld [vmem:[#allocation2 + $0x60] sm:$0xff] }
 0x17e   : > { %v1321_v33 = vld [vmem:[#allocation2 + $0x98] sm:$0x3]  ;;  %v1562_v42 = vrot.slane %v1560_v58, 1  ;;  %v8562_v58 = vrot.slane %v6798_v7, 1 }
 0x17f   : > { %v1322_v18 = vsel %vm6755_vm2, 0, %v1321_v33  ;;  %v7025_v1 = vsel %vm2632_vm5, %v2702_v48, %v2711_v6  ;;  %v1999_v48 = vrot.slane %v6863_v50, 1  ;;  %v7050_v52 = vor.u32 %v2737_v43, %v2734_v25 }
 0x180   : > { %1323 = vst [vmem:[#allocation2 + $0x98] sm:$0x3] %v1322_v18  ;;  %v1563_v5 = vsel %vm1487_vm10, %v1558_v10, %v1562_v42  ;;  %v1566_v40 = vor.u32 %v1564_v17, %v1562_v42  ;;  %v7069_v10 = vsel %vm3025_vm1, %v3035_v3, %v3037_v29  ;;  %v2001_v17 = vrot.slane %v6918_v49, 1 }
 0x181   : > { %v7055_v50 = vsel %vm1987_vm14, %v8562_v58, %v1999_v48  ;;  %v7066_v44 = vsel %vm2632_vm5, %v2729_v19, %v7050_v52  ;;  %v3039_v25 = vrot.slane %v6963_v46, 2  ;;  %v2003_v43 = vrot.slane %v6961_v28, 1 }
 0x182   : > { %1920 = vmatmul.bf16.gmra.mxu2 %v7000_v8  ;;  %v7031_v2 = vld [vmem:[#allocation2 + $0x50] sm:$0xff] }
 0x183   : > { %v7028_v27 = vpop.f32.mrf.mxu1  ;;  %8612 = vst [vmem:[#allocation18_spill] sm:$0xff] %v7031_v2  ;;  %v7033_v34 = vld [vmem:[#allocation2 + $0x50] sm:$0xff]  ;;  %v1568_v22 = vshll.u32 %v7031_v2, 16 }
 0x184   : > { %8611 = vst [vmem:[#allocation17_spill] sm:$0xff] %v7028_v27  ;;  %v2714_v15 = vshrl.u32 %v7033_v34, 16  ;;  %v2717_v38 = vshll.u32 %v7033_v34, 16 }
 0x185   : > { %v7040_v26 = vpop.f32.mrf.mxu2  ;;  %v1570_v23 = vrot.slane %v1568_v22, 1 }
 0x186   : > { %8613 = vst [vmem:[#allocation19_spill] sm:$0xff] %v7040_v26  ;;  %2519 = vmatmul.bf16.gmra.mxu0 %v2389_v13  ;;  %v2716_v47 = vrot.slane %v2714_v15, 1  ;;  %v2719_v0 = vrot.slane %v2717_v38, 2  ;;  %v5910_v15 = vld [vmem:[#allocation2 + $0x58] sm:$0xff]  ;;  %v2390_v38 = vrot.slane %v7033_v34, 1 }
 0x187   : > { %1750 = vmatmul.bf16.gmra.mxu1 %v1563_v5  ;;  %v1571_v33 = vsel %vm1487_vm10, %v1566_v40, %v1570_v23  ;;  %v1576_v5 = vshll.u32 %v5910_v15, 16  ;;  %v1580_v28 = vshrl.u32 %v5910_v15, 16 }
 0x188   : > { %1755 = vmatmul.bf16.vlgmr.msra.gmra.mxu3 %v1571_v33  ;;  %v2720_v18 = vor.u32 %v2719_v0, %v2716_v47  ;;  %v2391_v49 = vsel %vm1987_vm14, %v2388_v24, %v2390_v38  ;;  %v7097_v24 = vsel %vm1987_vm14, %v2001_v17, %v2003_v43 }
 0x18a   : > { %v7059_v60 = vsel %vm2632_vm5, %v2711_v6, %v2720_v18  ;;  %v7062_v42 = vsel %vm2632_vm5, %v2720_v18, %v2729_v19  ;;  %v7072_v22 = vpop.f32.mrf.mxu0  ;;  %v7077_v6 = vsel %vm1987_vm14, %v1999_v48, %v2001_v17  ;;  %v1572_v19 = vshrl.u32 %v7031_v2, 16 }
 0x18b   : > { %v1716_v11 = vpop.f32.mrf.mxu1  ;;  %8614 = vst [vmem:[#allocation20_spill] sm:$0xff] %v7072_v22  ;;  %v3041_v17 = vrot.slane %v6994_v20, 2 }
 0x18c   : > { %v7074_v30 = vadd.f32 %v1881_v31, %v1716_v11  ;;  %v1574_v40 = vor.u32 %v1572_v19, %v1570_v23  ;;  %v1578_v31 = vrot.slane %v1576_v5, 1  ;;  %v7094_v23 = vsel %vm3025_vm1, %v3037_v29, %v3039_v25  ;;  %v5937_v19 = vld [vmem:[#allocation9 + $0xa0] sm:$0xff] }
 0x18d   : > { %v1886_v13 = vpop.f32.mrf.mxu2  ;;  %v8563_v11 = vrot.slane %v7014_v55, 2  ;;  %v1584_v5 = vshll.u32 %v5911_v14, 16  ;;  %2094 = vmatpush.bf16.msrb.mxu3 %v5937_v19  ;;  %v7114_v58 = vsel %vm3025_vm1, %v3039_v25, %v3041_v17  ;;  %v3043_v25 = vrot.slane %v7033_v34, 2 }
 0x18e   : > { %8615 = vst [vmem:[#allocation21_spill] sm:$0xff] %v7074_v30  ;;  %v1579_v48 = vsel %vm1487_vm10, %v1574_v40, %v1578_v31 }
 0x192   : > { %1925 = vmatmul.bf16.gmra.mxu2 %v7031_v2  ;;  %v7085_v47 = vpop.f32.mrf.mxu0 }
 0x193   : > { %v7082_v3 = vpop.f32.mrf.mxu1  ;;  %8617 = vst [vmem:[#allocation23_spill] sm:$0xff] %v7085_v47 }
 0x194   : > { %8616 = vst [vmem:[#allocation22_spill] sm:$0xff] %v7082_v3 }
 0x195   : > { %v7089_v0 = vpop.f32.mrf.mxu2 }
 0x196   : > { %2524 = vmatmul.bf16.gmra.mxu0 %v2391_v49  ;;  %8618 = vst [vmem:[#allocation24_spill] sm:$0xff] %v7089_v0  ;;  %v2392_v49 = vrot.slane %v6996_v9, 1 }
 0x197   : > { %2877 = vmatmul.bf16.vlgmr.msrb.gmra.mxu1 %v6689_v35  ;;  %v3045_v35 = vrot.slane %v6996_v9, 2  ;;  %v7126_v9 = vld [vmem:[#allocation2 + $0x30] sm:$0xff] }
 0x198   : > { %1760 = vmatmul.bf16.gmra.mxu3 %v1579_v48  ;;  %v1582_v48 = vor.u32 %v1580_v28, %v1578_v31  ;;  %v5912_v31 = vld [vmem:[#allocation2 + $0x68] sm:$0xff]  ;;  %v4071_v34 = vrot.slane %v7126_v9, 3 }
 0x199   : > { %v7106_v46 = vsel %vm3025_vm1, %v3045_v35, %v8563_v11  ;;  %v2393_v11 = vsel %vm1987_vm14, %v2390_v38, %v2392_v49  ;;  %v8566_v38 = vrot.slane %v7031_v2, 1  ;;  %v7136_v28 = vsel %vm3025_vm1, %v3043_v25, %v3045_v35 }
 0x19a   : > { %8620 = vst [vmem:[#allocation26_spill] sm:$0xff] %v7106_v46  ;;  %v7108_v29 = vpop.f32.mrf.mxu0  ;;  %v1592_v51 = vshll.u32 %v5912_v31, 16  ;;  %v5934_v46 = vld [vmem:[#allocation9 + $0x88] sm:$0xff] }
 0x19b   : > { %v1721_v33 = vpop.f32.mrf.mxu1  ;;  %8621 = vst [vmem:[#allocation27_spill] sm:$0xff] %v7108_v29 }
 0x19c   : > { %v7099_v18 = vadd.f32 %v1886_v13, %v1721_v33  ;;  %v2005_v13 = vrot.slane %v7000_v8, 1  ;;  %v1586_v33 = vrot.slane %v1584_v5, 1  ;;  %v1594_v29 = vrot.slane %v1592_v51, 1  ;;  %v7167_v51 = vld [vmem:[#allocation2 + $0x38] sm:$0xff] }
 0x19d   : > { %v1891_v40 = vpop.f32.mrf.mxu2 }
 0x19e   : > { %8619 = vst [vmem:[#allocation25_spill] sm:$0xff] %v7099_v18  ;;  %v7118_v4 = vsel %vm1987_vm14, %v2003_v43, %v2005_v13  ;;  %v1587_v20 = vsel %vm1487_vm10, %v1582_v48, %v1586_v33  ;;  %v7141_v5 = vsel %vm1987_vm14, %v2005_v13, %v8566_v38  ;;  %v3418_v13 = vrot.slane %v7126_v9, 2 }
 0x19f   : > { %8624 = vst [vmem:[#allocation30_spill] sm:$0xff] %v7141_v5 }
 0x1a2   : > { %1930 = vmatmul.bf16.gmra.mxu2 %v5910_v15  ;;  %v7122_v8 = vpop.f32.mrf.mxu0  ;;  %v7124_v15 = vld [vmem:[#allocation2 + $0x28] sm:$0xff] }
 0x1a3   : > { %8622 = vst [vmem:[#allocation28_spill] sm:$0xff] %v7122_v8  ;;  %v7130_v19 = vpop.f32.mrf.mxu1  ;;  %v8567_v48 = vrot.slane %v7124_v15, 3  ;;  %v2394_v8 = vrot.slane %v7014_v55, 1 }
 0x1a4   : > { %8623 = vst [vmem:[#allocation29_spill] sm:$0xff] %v7130_v19 }
 0x1a5   : > { %v1893_v43 = vpop.f32.mrf.mxu2  ;;  %v7149_v35 = vsel %vm4063_vm3, %v8567_v48, %v4071_v34  ;;  %v2395_v0 = vsel %vm1987_vm14, %v2392_v49, %v2394_v8 }
 0x1a6   : > { %2529 = vmatmul.bf16.gmra.mxu0 %v2393_v11  ;;  %v5936_v11 = vld [vmem:[#allocation9 + $0x98] sm:$0xff]  ;;  %8625 = vst [vmem:[#allocation31_spill] sm:$0xff] %v7149_v35 }
 0x1a7   : > { %2882 = vmatmul.bf16.gmra.mxu1 %v6731_v45  ;;  %v7133_v45 = vsel %vm3025_vm1, %v3041_v17, %v3043_v25  ;;  %2095 = vmatpush.bf16.msrb.mxu3 %v5936_v11  ;;  %v8568_v17 = vrot.slane %v7124_v15, 2 }
 0x1a8   : > { %1765 = vmatmul.bf16.gmra.mxu3 %v1587_v20  ;;  %v1588_v20 = vshrl.u32 %v5911_v14, 16 }
 0x1a9   : > { %v7158_v11 = vsel %vm3025_vm1, %v8568_v17, %v3418_v13 }
 0x1aa   : > { %v1590_v38 = vor.u32 %v1588_v20, %v1586_v33  ;;  %8627 = vst [vmem:[#allocation33_spill] sm:$0xff] %v7158_v11  ;;  %v5913_v33 = vld [vmem:[#allocation2 + $0x70] sm:$0xff]  ;;  %v7169_v11 = vld [vmem:[#allocation2 + $0x68] sm:$0xff] }
 0x1b2   : > { %1935 = vmatmul.bf16.gmra.mxu2 %v5911_v14  ;;  %v1595_v14 = vsel %vm1487_vm10, %v1590_v38, %v1594_v29  ;;  %v3420_v38 = vrot.slane %v7167_v51, 2 }
 0x1b3   : > { %v7153_v25 = vpop.f32.mrf.mxu0 }
 0x1b4   : > { %8626 = vst [vmem:[#allocation32_spill] sm:$0xff] %v7153_v25  ;;  %v1726_v47 = vpop.f32.mrf.mxu1 }
 0x1b5   : > { %v1896_v22 = vpop.f32.mrf.mxu2  ;;  %v7161_v48 = vadd.f32 %v1891_v40, %v1726_v47  ;;  %v4073_v47 = vrot.slane %v7167_v51, 3  ;;  %v1596_v40 = vshrl.u32 %v5912_v31, 16 }
 0x1b6   : > { %2534 = vmatmul.bf16.gmra.mxu0 %v2395_v0  ;;  %v1600_v0 = vshll.u32 %v5913_v33, 16 }
 0x1b7   : > { %8628 = vst [vmem:[#allocation34_spill] sm:$0xff] %v7161_v48  ;;  %2887 = vmatmul.bf16.gmra.mxu1 %v6805_v54  ;;  %v2396_v54 = vrot.slane %v7169_v11, 1  ;;  %v7176_v49 = vsel %vm4063_vm3, %v4071_v34, %v4073_v47  ;;  %v1598_v48 = vor.u32 %v1596_v40, %v1594_v29  ;;  %v7191_v29 = vld [vmem:[#allocation2 + $0x40] sm:$0xff]  ;;  %v7193_v40 = vld [vmem:[#allocation2 + $0x78] sm:$0xff] }
 0x1b8   : > { %1770 = vmatmul.bf16.gmra.mxu3 %v1595_v14  ;;  %8631 = vst [vmem:[#allocation37_spill] sm:$0xff] %v7176_v49  ;;  %v1602_v19 = vrot.slane %v1600_v0, 1  ;;  %v3422_v49 = vrot.slane %v7191_v29, 2 }
 0x1b9   : > { %v2397_v55 = vsel %vm1987_vm14, %v2394_v8, %v2396_v54 }
 0x1bb   : > { %v7165_v25 = vpop.f32.mrf.mxu0 }
 0x1bc   : > { %8629 = vst [vmem:[#allocation35_spill] sm:$0xff] %v7165_v25  ;;  %v1728_v20 = vpop.f32.mrf.mxu1  ;;  %v5935_v25 = vld [vmem:[#allocation9 + $0x90] sm:$0xff] }
 0x1bd   : > { %v1898_v17 = vpop.f32.mrf.mxu2  ;;  %v7171_v35 = vadd.f32 %v1893_v43, %v1728_v20  ;;  %v7182_v43 = vsel %vm3025_vm1, %v3418_v13, %v3420_v38  ;;  %2096 = vmatpush.bf16.msrb.mxu3 %v5935_v25 }
 0x1be   : > { %8633 = vst [vmem:[#allocation39_spill] sm:$0xff] %v7182_v43  ;;  %v5981_v43 = vld [vmem:[#allocation9 + $0x178] sm:$0xff] }
 0x1bf   : > { %8630 = vst [vmem:[#allocation36_spill] sm:$0xff] %v7171_v35  ;;  %3129 = vmatpush.bf16.msra.mxu2 %v5981_v43 }
 0x1c1   : > { %2097 = vmatpush.bf16.msrb.mxu3 %v5934_v46 }
 0x1c2   : > { %1940 = vmatmul.bf16.gmra.mxu2 %v5912_v31  ;;  %v1603_v31 = vsel %vm1487_vm10, %v1598_v48, %v1602_v19  ;;  %v1608_v48 = vshll.u32 %v7193_v40, 16 }
 0x1c3   : > { %v7179_v14 = vpop.f32.mrf.mxu0 }
 0x1c4   : > { %8632 = vst [vmem:[#allocation38_spill] sm:$0xff] %v7179_v14  ;;  %v1731_v20 = vpop.f32.mrf.mxu1  ;;  %v7195_v14 = vld [vmem:[#allocation2 + $0x70] sm:$0xff] }
 0x1c5   : > { %v1901_v35 = vpop.f32.mrf.mxu2  ;;  %v7185_v18 = vadd.f32 %v1896_v22, %v1731_v20  ;;  %v7199_v22 = vld [vmem:[#allocation2 + $0x58] sm:$0xff]  ;;  %v2398_v25 = vrot.slane %v7195_v14, 1  ;;  %v7204_v20 = vld [vmem:[#allocation2 + $0x60] sm:$0xff] }
 0x1c6   : > { %2539 = vmatmul.bf16.gmra.mxu0 %v2397_v55  ;;  %8637 = vst [vmem:[#allocation43_spill] sm:$0xff] %v7199_v22  ;;  %v4075_v55 = vrot.slane %v7191_v29, 3  ;;  %v3430_v30 = vrot.slane %v7204_v20, 2 }
 0x1c7   : > { %8634 = vst [vmem:[#allocation40_spill] sm:$0xff] %v7185_v18  ;;  %2892 = vmatmul.bf16.gmra.mxu1 %v6870_v39  ;;  %v1604_v39 = vshrl.u32 %v5913_v33, 16  ;;  %v1610_v18 = vrot.slane %v1608_v48, 1  ;;  %v2399_v3 = vsel %vm1987_vm14, %v2396_v54, %v2398_v25  ;;  %v5979_v48 = vld [vmem:[#allocation9 + $0x168] sm:$0xff] }
 0x1c8   : > { %1775 = vmatmul.bf16.gmra.mxu3 %v1603_v31  ;;  %8638 = vst [vmem:[#allocation44_spill] sm:$0xff] %v7204_v20  ;;  %v7207_v31 = vsel %vm4063_vm3, %v4073_v47, %v4075_v55  ;;  %v4083_v47 = vrot.slane %v7204_v20, 3  ;;  %v5977_v20 = vld [vmem:[#allocation9 + $0x158] sm:$0xff] }
 0x1c9   : > { %8639 = vst [vmem:[#allocation45_spill] sm:$0xff] %v7207_v31 }
 0x1cb   : > { %v7189_v34 = vpop.f32.mrf.mxu0 }
 0x1cc   : > { %8635 = vst [vmem:[#allocation41_spill] sm:$0xff] %v7189_v34  ;;  %v1733_v13 = vpop.f32.mrf.mxu1 }
 0x1cd   : > { %v1903_v0 = vpop.f32.mrf.mxu2  ;;  %v7197_v8 = vadd.f32 %v1898_v17, %v1733_v13  ;;  %v7211_v17 = vld [vmem:[#allocation2 + $0x48] sm:$0xff]  ;;  %v4081_v13 = vrot.slane %v7199_v22, 3 }
 0x1cf   : > { %8636 = vst [vmem:[#allocation42_spill] sm:$0xff] %v7197_v8  ;;  %v1606_v8 = vor.u32 %v1604_v39, %v1602_v19  ;;  %v4077_v19 = vrot.slane %v7211_v17, 3  ;;  %v7226_v39 = vsel %vm4063_vm3, %v4081_v13, %v4083_v47 }
 0x1d0   : > { %8643 = vst [vmem:[#allocation49_spill] sm:$0xff] %v7226_v39  ;;  %v7242_v39 = vld [vmem:[#allocation2 + $0x78] sm:$0xff] }
 0x1d1   : > { %v1611_v54 = vsel %vm1487_vm10, %v1606_v8, %v1610_v18 }
 0x1d2   : > { %1945 = vmatmul.bf16.gmra.mxu2 %v5913_v33  ;;  %v7218_v33 = vsel %vm3025_vm1, %v3420_v38, %v3422_v49  ;;  %v5980_v38 = vld [vmem:[#allocation9 + $0x170] sm:$0xff] }
 0x1d3   : > { %v7209_v34 = vpop.f32.mrf.mxu0  ;;  %8641 = vst [vmem:[#allocation47_spill] sm:$0xff] %v7218_v33  ;;  %3130 = vmatpush.bf16.msra.mxu2 %v5980_v38  ;;  %v5915_v33 = vld [vmem:[#allocation2 + $0x80] sm:$0xff]  ;;  %v1612_v38 = vshrl.u32 %v7193_v40, 16 }
 0x1d4   : > { %8640 = vst [vmem:[#allocation46_spill] sm:$0xff] %v7209_v34  ;;  %v1736_v2 = vpop.f32.mrf.mxu1  ;;  %v3428_v34 = vrot.slane %v7199_v22, 2 }
 0x1d5   : > { %v1906_v26 = vpop.f32.mrf.mxu2  ;;  %v7221_v31 = vadd.f32 %v1901_v35, %v1736_v2  ;;  %v7234_v2 = vsel %vm4063_vm3, %v4075_v55, %v4077_v19  ;;  %v5978_v55 = vld [vmem:[#allocation9 + $0x160] sm:$0xff] }
 0x1d6   : > { %2544 = vmatmul.bf16.gmra.mxu0 %v2399_v3  ;;  %v7231_v43 = vsel %vm3025_vm1, %v3428_v34, %v3430_v30  ;;  %8645 = vst [vmem:[#allocation51_spill] sm:$0xff] %v7234_v2  ;;  %v3424_v3 = vrot.slane %v7211_v17, 2  ;;  %v7250_v2 = vld [vmem:[#allocation2 + $0x68] sm:$0xff] }
 0x1d7   : > { %8642 = vst [vmem:[#allocation48_spill] sm:$0xff] %v7221_v31  ;;  %2897 = vmatmul.bf16.gmra.mxu1 %v6925_v56  ;;  %v7244_v31 = vld [vmem:[#allocation2 + $0x50] sm:$0xff]  ;;  %3131 = vmatpush.bf16.msra.mxu2 %v5979_v48  ;;  %v4085_v27 = vrot.slane %v7250_v2, 3 }
 0x1d8   : > { %8644 = vst [vmem:[#allocation50_spill] sm:$0xff] %v7231_v43  ;;  %1780 = vmatmul.bf16.gmra.mxu3 %v1611_v54  ;;  %v7240_v56 = vsel %vm3025_vm1, %v3422_v49, %v3424_v3  ;;  %v1616_v43 = vshll.u32 %v5915_v33, 16  ;;  %v4079_v49 = vrot.slane %v7244_v31, 3 }
 0x1d9   : > { %8647 = vst [vmem:[#allocation53_spill] sm:$0xff] %v7240_v56 }
 0x1da   : > { %v7260_v48 = vsel %vm4063_vm3, %v4079_v49, %v4081_v13  ;;  %v7269_v13 = vsel %vm4063_vm3, %v4083_v47, %v4085_v27  ;;  %v5916_v47 = vld [vmem:[#allocation2 + $0x88] sm:$0xff] }
 0x1db   : > { %v7237_v35 = vpop.f32.mrf.mxu0  ;;  %3132 = vmatpush.bf16.msra.mxu2 %v5978_v55  ;;  %8651 = vst [vmem:[#allocation57_spill] sm:$0xff] %v7260_v48  ;;  %v6014_v48 = vld [vmem:[#allocation9 + $0x1f8] sm:$0xff] }
 0x1dc   : > { %8646 = vst [vmem:[#allocation52_spill] sm:$0xff] %v7237_v35  ;;  %v1738_v8 = vpop.f32.mrf.mxu1  ;;  %v2400_v35 = vrot.slane %v7242_v39, 1  ;;  %3907 = vmatpush.bf16.msra.mxu0 %v6014_v48 }
 0x1dd   : > { %v1908_v46 = vpop.f32.mrf.mxu2  ;;  %v7246_v54 = vadd.f32 %v1903_v0, %v1738_v8  ;;  %v7257_v0 = vsel %vm4063_vm3, %v4077_v19, %v4079_v49  ;;  %v1614_v8 = vor.u32 %v1612_v38, %v1610_v18  ;;  %v5933_v19 = vld [vmem:[#allocation9 + $0x80] sm:$0xff]  ;;  %8652 = vst [vmem:[#allocation58_spill] sm:$0xff] %v7269_v13  ;;  %v7284_v49 = vld [vmem:[#allocation2 + $0x80] sm:$0xff] }
 0x1de   : > { %8650 = vst [vmem:[#allocation56_spill] sm:$0xff] %v7257_v0  ;;  %v2401_v59 = vsel %vm1987_vm14, %v2398_v25, %v2400_v35  ;;  %2098 = vmatpush.bf16.msrb.mxu3 %v5933_v19  ;;  %v7289_v19 = vld [vmem:[#allocation2 + $0x70] sm:$0xff] }
 0x1df   : > { %8648 = vst [vmem:[#allocation54_spill] sm:$0xff] %v7246_v54  ;;  %v1618_v54 = vrot.slane %v1616_v43, 1  ;;  %3133 = vmatpush.bf16.msra.mxu2 %v5977_v20  ;;  %v5975_v20 = vld [vmem:[#allocation9 + $0x148] sm:$0xff] }
 0x1e2   : > { %1950 = vmatmul.bf16.gmra.mxu2 %v7193_v40  ;;  %v3426_v40 = vrot.slane %v7244_v31, 2 }
 0x1e3   : > { %v7254_v56 = vpop.f32.mrf.mxu0 }
 0x1e4   : > { %8649 = vst [vmem:[#allocation55_spill] sm:$0xff] %v7254_v56  ;;  %v1741_v22 = vpop.f32.mrf.mxu1  ;;  %v3432_v56 = vrot.slane %v7250_v2, 2  ;;  %v7272_v18 = vsel %vm3025_vm1, %v3424_v3, %v3426_v40  ;;  %v7275_v43 = vsel %vm3025_vm1, %v3426_v40, %v3428_v34  ;;  %v1620_v40 = vshrl.u32 %v5915_v33, 16 }
 0x1e5   : > { %v1911_v5 = vpop.f32.mrf.mxu2  ;;  %v7266_v55 = vadd.f32 %v1906_v26, %v1741_v22  ;;  %8653 = vst [vmem:[#allocation59_spill] sm:$0xff] %v7272_v18  ;;  %v1619_v26 = vsel %vm1487_vm10, %v1614_v8, %v1618_v54  ;;  %v2402_v8 = vrot.slane %v7284_v49, 1 }
 0x1e6   : > { %2549 = vmatmul.bf16.gmra.mxu0 %v2401_v59  ;;  %8654 = vst [vmem:[#allocation60_spill] sm:$0xff] %v7275_v43  ;;  %v7278_v25 = vsel %vm3025_vm1, %v3430_v30, %v3432_v56  ;;  %v5976_v59 = vld [vmem:[#allocation9 + $0x150] sm:$0xff]  ;;  %v5974_v30 = vld [vmem:[#allocation9 + $0x140] sm:$0xff] }
 0x1e7   : > { %8655 = vst [vmem:[#allocation61_spill] sm:$0xff] %v7278_v25  ;;  %2902 = vmatmul.bf16.gmra.mxu1 %v6990_v16  ;;  %3134 = vmatpush.bf16.msra.mxu2 %v5976_v59  ;;  %v1624_v16 = vshll.u32 %v5916_v47, 16  ;;  %v1622_v59 = vor.u32 %v1620_v40, %v1618_v54  ;;  %v2403_v18 = vsel %vm1987_vm14, %v2400_v35, %v2402_v8  ;;  %v6006_v40 = vld [vmem:[#allocation9 + $0x1b8] sm:$0xff] }
 0x1e8   : > { %1785 = vmatmul.bf16.gmra.mxu3 %v1619_v26 }
 0x1e9   : > { %3514 = vmatpush.bf16.msra.mxu3 %v6006_v40  ;;  %v6022_v40 = vld [vmem:[#allocation9 + $0x238] sm:$0xff] }
 0x1ea   : > { %4167 = vmatpush.bf16.msra.mxu1 %v6022_v40 }
 0x1eb   : > { %v7282_v22 = vpop.f32.mrf.mxu0  ;;  %3135 = vmatpush.bf16.msra.mxu2 %v5975_v20  ;;  %v4087_v20 = vrot.slane %v7289_v19, 3 }
 0x1ec   : > { %8656 = vst [vmem:[#allocation62_spill] sm:$0xff] %v7282_v22  ;;  %v1743_v3 = vpop.f32.mrf.mxu1  ;;  %v1626_v22 = vrot.slane %v1624_v16, 1 }
 0x1ed   : > { %v1913_v38 = vpop.f32.mrf.mxu2  ;;  %v7286_v34 = vadd.f32 %v1908_v46, %v1743_v3  ;;  %v1376_v46 = vld [vmem:[#allocation2 + $0x90] sm:$0x1]  ;;  %v3434_v3 = vrot.slane %v7289_v19, 2 }
 0x1ee   : > { %v1627_v54 = vsel %vm1487_vm10, %v1622_v59, %v1626_v22  ;;  %v1467_v35 = vunpack.c.l.b16 %v1376_v46  ;;  %v7316_v46 = vld [vmem:[#allocation2 + $0x78] sm:$0xff] }
 0x1ef   : > { %3136 = vmatpush.bf16.msra.mxu2 %v5974_v30  ;;  %v7302_v30 = vsel %vm3025_vm1, %v3432_v56, %v3434_v3  ;;  %v6012_v56 = vld [vmem:[#allocation9 + $0x1e8] sm:$0xff] }
 0x1f0   : > { %8659 = vst [vmem:[#allocation65_spill] sm:$0xff] %v7302_v30 }
 0x1f2   : > { %1955 = vmatmul.bf16.gmra.mxu2 %v5915_v33  ;;  %v7299_v33 = vsel %vm4063_vm3, %v4085_v27, %v4087_v20 }
 0x1f3   : > { %v7291_v26 = vpop.f32.mrf.mxu0  ;;  %8658 = vst [vmem:[#allocation64_spill] sm:$0xff] %v7299_v33 }
 0x1f4   : > { %8657 = vst [vmem:[#allocation63_spill] sm:$0xff] %v7291_v26  ;;  %v1746_v25 = vpop.f32.mrf.mxu1  ;;  %v7310_v26 = vld [vmem:[#allocation2 + $0x88] sm:$0xff] }
 0x1f5   : > { %v1916_v43 = vpop.f32.mrf.mxu2  ;;  %v7296_v13 = vadd.f32 %v1911_v5, %v1746_v25  ;;  %v6013_v5 = vld [vmem:[#allocation9 + $0x1f0] sm:$0xff]  ;;  %v2404_v48 = vrot.slane %v7310_v26, 1 }
 0x1f6   : > { %2554 = vmatmul.bf16.gmra.mxu0 %v2403_v18  ;;  %v7308_v18 = vpack.c.b16 %v1467_v35, %v1467_v35  ;;  %v6011_v35 = vld [vmem:[#allocation9 + $0x1e0] sm:$0xff] }
 0x1f7   : > { %2907 = vmatmul.bf16.gmra.mxu1 %v7010_v21  ;;  %3908 = vmatpush.bf16.msra.mxu0 %v6013_v5  ;;  %v1628_v21 = vshrl.u32 %v5916_v47, 16 }
 0x1f8   : > { %1790 = vmatmul.bf16.gmra.mxu3 %v1627_v54  ;;  %8661 = vst [vmem:[#allocation67_spill] sm:$0xff] %v7308_v18  ;;  %v1632_v59 = vshll.u32 %v7308_v18, 16  ;;  %v3436_v18 = vrot.slane %v7316_v46, 2 }
 0x1fa   : > { %v1634_v33 = vrot.slane %v1632_v59, 1  ;;  %v6009_v59 = vld [vmem:[#allocation9 + $0x1d0] sm:$0xff] }
 0x1fb   : > { %v7306_v16 = vpop.f32.mrf.mxu0  ;;  %3909 = vmatpush.bf16.msra.mxu0 %v6012_v56 }
 0x1fc   : > { %8660 = vst [vmem:[#allocation66_spill] sm:$0xff] %v7306_v16  ;;  %v1748_v25 = vpop.f32.mrf.mxu1  ;;  %v1630_v16 = vor.u32 %v1628_v21, %v1626_v22  ;;  %v7329_v22 = vsel %vm3025_vm1, %v3434_v3, %v3436_v18  ;;  %v6008_v3 = vld [vmem:[#allocation9 + $0x1c8] sm:$0xff] }
 0x1fd   : > { %v1918_v27 = vpop.f32.mrf.mxu2  ;;  %v7312_v30 = vadd.f32 %v1913_v38, %v1748_v25  ;;  %v2405_v38 = vsel %vm1987_vm14, %v2402_v8, %v2404_v48  ;;  %v4089_v25 = vrot.slane %v7316_v46, 3  ;;  %8664 = vst [vmem:[#allocation70_spill] sm:$0xff] %v7329_v22 }
 0x1fe   : > { %v1635_v8 = vsel %vm1487_vm10, %v1630_v16, %v1634_v33  ;;  %v7342_v16 = vld [vmem:[#allocation2 + $0x80] sm:$0xff] }
 0x1ff   : > { %3910 = vmatpush.bf16.msra.mxu0 %v6011_v35 }
 0x202   : > { %1960 = vmatmul.bf16.gmra.mxu2 %v5916_v47  ;;  %v6010_v47 = vld [vmem:[#allocation9 + $0x1d8] sm:$0xff] }
 0x203   : > { %v7318_v54 = vpop.f32.mrf.mxu0  ;;  %3911 = vmatpush.bf16.msra.mxu0 %v6010_v47 }
 0x204   : > { %8662 = vst [vmem:[#allocation68_spill] sm:$0xff] %v7318_v54  ;;  %v1751_v0 = vpop.f32.mrf.mxu1  ;;  %v7326_v54 = vsel %vm4063_vm3, %v4087_v20, %v4089_v25  ;;  %v7337_v20 = vld [vmem:[#allocation2 + $0x90] sm:$0xff] }
 0x205   : > { %v1921_v5 = vpop.f32.mrf.mxu2  ;;  %v7323_v56 = vadd.f32 %v1916_v43, %v1751_v0  ;;  %8663 = vst [vmem:[#allocation69_spill] sm:$0xff] %v7326_v54  ;;  %v6028_v0 = vld [vmem:[#allocation2] sm:$0xf0]  ;;  %v6029_v54 = vld [vmem:[#allocation2] sm:$0xe]  ;;  %v2406_v33 = vrot.slane %v7337_v20, 1 }
 0x206   : > { %2559 = vmatmul.bf16.gmra.mxu0 %v2405_v38 }
 0x207   : > { %2912 = vmatmul.bf16.gmra.mxu1 %v7025_v1  ;;  %3912 = vmatpush.bf16.msra.mxu0 %v6009_v59  ;;  %v6030_v1 = vor.u32 %v6029_v54, %v6028_v0  ;;  %v4091_v54 = vrot.slane %v7342_v16, 3  ;;  %v3438_v0 = vrot.slane %v7342_v16, 2 }
 0x208   : > { %1795 = vmatmul.bf16.gmra.mxu3 %v1635_v8 }
 0x20b   : > { %v7333_v21 = vpop.f32.mrf.mxu0  ;;  %v1756_v35 = vpop.f32.mrf.mxu3  ;;  %3913 = vmatpush.bf16.msra.mxu0 %v6008_v3  ;;  %v7358_v3 = vsel %vm3025_vm1, %v3436_v18, %v3438_v0  ;;  %v3264_v18 = vld [vmem:[#allocation2 + $0x10] sm:$0xc] }
 0x20c   : > { %8665 = vst [vmem:[#allocation71_spill] sm:$0xff] %v7333_v21  ;;  %v1753_v43 = vpop.f32.mrf.mxu1  ;;  %v7335_v40 = vadd.f32 %v1921_v5, %v1756_v35  ;;  %v6007_v5 = vld [vmem:[#allocation9 + $0x1c0] sm:$0xff]  ;;  %v1988_v35 = vrot.slane %v6030_v1, 1 }
 0x20d   : > { %v1923_v38 = vpop.f32.mrf.mxu2  ;;  %v7339_v22 = vadd.f32 %v1918_v27, %v1753_v43  ;;  %v2407_v27 = vsel %vm1987_vm14, %v2404_v48, %v2406_v33  ;;  %v2262_v43 = vld [vmem:[#allocation2 + $0x98] sm:$0x1]  ;;  %8671 = vst [vmem:[#allocation77_spill] sm:$0xff] %v7358_v3  ;;  %v7370_v3 = vld [vmem:[#allocation2 + $0x14] sm:$0xf] }
 0x20e   : > { %8666 = vst [vmem:[#allocation72_spill] sm:$0xff] %v7335_v40  ;;  %v2353_v48 = vunpack.c.l.b16 %v2262_v43  ;;  %v3355_v43 = vunpack.c.l.b16 %v3264_v18 }
 0x20f   : > { %3914 = vmatpush.bf16.msra.mxu0 %v6007_v5 }
 0x212   : > { %3137 = vmatmul.bf16.vlgmr.msra.gmra.mxu2 %v6651_v62  ;;  %v7355_v62 = vsel %vm4063_vm3, %v4089_v25, %v4091_v54 }
 0x213   : > { %v7345_v47 = vpop.f32.mrf.mxu0  ;;  %v1758_v8 = vpop.f32.mrf.mxu3  ;;  %8670 = vst [vmem:[#allocation76_spill] sm:$0xff] %v7355_v62  ;;  %v6005_v62 = vld [vmem:[#allocation9 + $0x1b0] sm:$0xff] }
 0x214   : > { %8667 = vst [vmem:[#allocation73_spill] sm:$0xff] %v7345_v47  ;;  %v7347_v21 = vadd.f32 %v1923_v38, %v1758_v8  ;;  %v7349_v40 = vpop.f32.mrf.mxu1  ;;  %v8672_v38 = vrot.slane %v6546_v12, 1  ;;  %3515 = vmatpush.bf16.msra.mxu3 %v6005_v62  ;;  %v7372_v12 = vld [vmem:[#allocation2 + $0x88] sm:$0xff] }
 0x215   : > { %8669 = vst [vmem:[#allocation75_spill] sm:$0xff] %v7349_v40  ;;  %v1926_v59 = vpop.f32.mrf.mxu2  ;;  %v2372_v40 = vpack.c.b16 %v2353_v48, %v2353_v48 }
 0x216   : > { %8668 = vst [vmem:[#allocation74_spill] sm:$0xff] %v7347_v21  ;;  %2564 = vmatmul.bf16.gmra.mxu0 %v2407_v27  ;;  %v1990_v1 = vsel %vm1987_vm14, %v1988_v35, %v8672_v38 }
 0x217   : > { %2917 = vmatmul.bf16.gmra.mxu1 %v7059_v60  ;;  %v2408_v60 = vrot.slane %v2372_v40, 1  ;;  %v4093_v40 = vrot.slane %v7372_v12, 3 }
 0x218   : > { %2099 = vmatmul.bf16.vlgmr.msrb.gmra.mxu3 %v1990_v1 }
 0x219   : > { %v2409_v62 = vsel %vm1987_vm14, %v2406_v33, %v2408_v60  ;;  %v7392_v18 = vsel %vm4063_vm3, %v4091_v54, %v4093_v40  ;;  %v6021_v33 = vld [vmem:[#allocation9 + $0x230] sm:$0xff] }
 0x21a   : > { %8680 = vst [vmem:[#allocation85_spill] sm:$0xff] %v7392_v18  ;;  %4168 = vmatpush.bf16.msra.mxu1 %v6021_v33 }
 0x21b   : > { %v7364_v5 = vpop.f32.mrf.mxu0  ;;  %v1761_v8 = vpop.f32.mrf.mxu3 }
 0x21c   : > { %8673 = vst [vmem:[#allocation78_spill] sm:$0xff] %v7364_v5  ;;  %v7366_v47 = vadd.f32 %v1926_v59, %v1761_v8  ;;  %v7368_v27 = vpop.f32.mrf.mxu1  ;;  %v8576_v59 = vunpack.c.l.b16 %v7370_v3  ;;  %v7383_v5 = vld [vmem:[#allocation2 + $0x18] sm:$0xff] }
 0x21d   : > { %8675 = vst [vmem:[#allocation80_spill] sm:$0xff] %v7368_v27  ;;  %v1928_v25 = vpop.f32.mrf.mxu2  ;;  %v3440_v27 = vrot.slane %v7372_v12, 2  ;;  %v3680_v60 = vshrl.u32 %v7383_v5, 16 }
 0x21e   : > { %8674 = vst [vmem:[#allocation79_spill] sm:$0xff] %v7366_v47  ;;  %v7409_v47 = vld [vmem:[#allocation2 + $0x90] sm:$0xff] }
 0x222   : > { %3142 = vmatmul.bf16.gmra.mxu2 %v6708_v61  ;;  %v7389_v61 = vpack.c.b16 %v8576_v59, %v3355_v43 }
 0x223   : > { %v7375_v35 = vpop.f32.mrf.mxu0  ;;  %v1763_v38 = vpop.f32.mrf.mxu3 }
 0x224   : > { %8676 = vst [vmem:[#allocation81_spill] sm:$0xff] %v7375_v35  ;;  %v7378_v1 = vadd.f32 %v1928_v25, %v1763_v38  ;;  %v7380_v8 = vpop.f32.mrf.mxu1  ;;  %v7395_v25 = vsel %vm3025_vm1, %v3438_v0, %v3440_v27  ;;  %v3683_v38 = vshll.u32 %v7383_v5, 16  ;;  %v3675_v43 = vshll.u32 %v7389_v61, 16 }
 0x225   : > { %8678 = vst [vmem:[#allocation83_spill] sm:$0xff] %v7380_v8  ;;  %v1931_v48 = vpop.f32.mrf.mxu2 }
 0x226   : > { %8677 = vst [vmem:[#allocation82_spill] sm:$0xff] %v7378_v1  ;;  %2569 = vmatmul.bf16.gmra.mxu0 %v2409_v62  ;;  %v3672_v62 = vshrl.u32 %v7389_v61, 16  ;;  %v3685_v8 = vrot.slane %v3683_v38, 3  ;;  %v3677_v18 = vrot.slane %v3675_v43, 3  ;;  %v2744_v43 = vshll.u32 %v7169_v11, 16 }
 0x227   : > { %8679 = vst [vmem:[#allocation84_spill] sm:$0xff] %v7389_v61  ;;  %2922 = vmatmul.bf16.gmra.mxu1 %v7062_v42 }
 0x228   : > { %8681 = vst [vmem:[#allocation86_spill] sm:$0xff] %v7395_v25  ;;  %2104 = vmatmul.bf16.gmra.mxu3 %v6658_v63  ;;  %v3682_v25 = vrot.slane %v3680_v60, 2  ;;  %v3674_v63 = vrot.slane %v3672_v62, 2  ;;  %v4095_v60 = vrot.slane %v7409_v47, 3  ;;  %v2741_v62 = vshrl.u32 %v7169_v11, 16 }
 0x22a   : > { %v3686_v1 = vor.u32 %v3685_v8, %v3682_v25  ;;  %v3678_v33 = vor.u32 %v3677_v18, %v3674_v63  ;;  %v3442_v8 = vrot.slane %v7409_v47, 2 }
 0x22b   : > { %v7403_v59 = vpop.f32.mrf.mxu0  ;;  %v1766_v54 = vpop.f32.mrf.mxu3 }
 0x22c   : > { %8682 = vst [vmem:[#allocation87_spill] sm:$0xff] %v7403_v59  ;;  %v7405_v35 = vadd.f32 %v1931_v48, %v1766_v54  ;;  %v7407_v0 = vpop.f32.mrf.mxu1  ;;  %v3687_v54 = vsel %vm3670_vm7, %v3678_v33, %v3686_v1 }
 0x22d   : > { %8683 = vst [vmem:[#allocation88_spill] sm:$0xff] %v7407_v0  ;;  %v1933_v42 = vpop.f32.mrf.mxu2  ;;  %v7417_v0 = vld [vmem:[#allocation2 + $0x20] sm:$0xff] }
 0x22e   : > { %v3689_v18 = vshrl.u32 %v7417_v0, 16  ;;  %v3692_v38 = vshll.u32 %v7417_v0, 16 }
 0x232   : > { %3147 = vmatmul.bf16.gmra.mxu2 %v6792_v36  ;;  %v7424_v36 = vsel %vm4063_vm3, %v4093_v40, %v4095_v60 }
 0x233   : > { %v1768_v61 = vpop.f32.mrf.mxu3  ;;  %v7421_v25 = vpop.f32.mrf.mxu0  ;;  %8687 = vst [vmem:[#allocation92_spill] sm:$0xff] %v7424_v36  ;;  %v7441_v36 = vld [vmem:[#allocation2 + $0x98] sm:$0xff] }
 0x234   : > { %v7412_v21 = vadd.f32 %v1933_v42, %v1768_v61  ;;  %v7414_v59 = vpop.f32.mrf.mxu1  ;;  %8686 = vst [vmem:[#allocation91_spill] sm:$0xff] %v7421_v25  ;;  %v7427_v61 = vsel %vm3025_vm1, %v3440_v27, %v3442_v8  ;;  %v3691_v27 = vrot.slane %v3689_v18, 2  ;;  %v6004_v25 = vld [vmem:[#allocation9 + $0x1a8] sm:$0xff] }
 0x235   : > { %8685 = vst [vmem:[#allocation90_spill] sm:$0xff] %v7414_v59  ;;  %v1936_v48 = vpop.f32.mrf.mxu2  ;;  %3516 = vmatpush.bf16.msra.mxu3 %v6004_v25  ;;  %v8579_v25 = vrot.slane %v7441_v36, 3 }
 0x236   : > { %8684 = vst [vmem:[#allocation89_spill] sm:$0xff] %v7412_v21  ;;  %3915 = vmatmul.bf16.vlgmr.msra.gmra.mxu0 %v3687_v54  ;;  %v3694_v54 = vrot.slane %v3692_v38, 3 }
 0x237   : > { %8688 = vst [vmem:[#allocation93_spill] sm:$0xff] %v7427_v61  ;;  %2927 = vmatmul.bf16.gmra.mxu1 %v7066_v44  ;;  %v2743_v44 = vrot.slane %v2741_v62, 1  ;;  %v2746_v61 = vrot.slane %v2744_v43, 2  ;;  %v8578_v62 = vrot.slane %v7441_v36, 2 }
 0x238   : > { %2109 = vmatmul.bf16.gmra.mxu3 %v6857_v32  ;;  %v3695_v59 = vor.u32 %v3694_v54, %v3691_v27  ;;  %8692 = vst [vmem:[#allocation97_spill] sm:$0xff] %v7441_v36  ;;  %v2753_v54 = vshll.u32 %v7195_v14, 16 }
 0x239   : > { %v2747_v11 = vor.u32 %v2746_v61, %v2743_v44  ;;  %v6020_v44 = vld [vmem:[#allocation9 + $0x228] sm:$0xff] }
 0x23a   : > { %v3696_v38 = vsel %vm3670_vm7, %v3686_v1, %v3695_v59  ;;  %v8695_v1 = vrot.slane %v6644_v57, 1  ;;  %4169 = vmatpush.bf16.msra.mxu1 %v6020_v44 }
 0x23b   : > { %v1771_v42 = vpop.f32.mrf.mxu3  ;;  %v7439_v32 = vpop.f32.mrf.mxu0  ;;  %v2748_v43 = vsel %vm2632_vm5, %v7050_v52, %v2747_v11  ;;  %v3701_v52 = vshll.u32 %v7124_v15, 16 }
 0x23c   : > { %v7435_v63 = vadd.f32 %v1936_v48, %v1771_v42  ;;  %v7437_v40 = vpop.f32.mrf.mxu1  ;;  %8691 = vst [vmem:[#allocation96_spill] sm:$0xff] %v7439_v32  ;;  %v6128_v48 = vld [vmem:[#allocation2 + $0x20] sm:$0xff] }
 0x23d   : > { %8690 = vst [vmem:[#allocation95_spill] sm:$0xff] %v7437_v40  ;;  %v1938_v33 = vpop.f32.mrf.mxu2  ;;  %v1995_v42 = vrot.slane %v6128_v48, 1 }
 0x23e   : > { %8689 = vst [vmem:[#allocation94_spill] sm:$0xff] %v7435_v63 }
 0x23f   : > { %v1996_v61 = vsel %vm1987_vm14, %v8695_v1, %v1995_v42  ;;  %v3703_v1 = vrot.slane %v3701_v52, 3  ;;  %v8700_v52 = vrot.slane %v6798_v7, 1  ;;  %v3649_v7 = vld [vmem:[#allocation2 + $0xa0] sm:$0x7] }
 0x242   : > { %3152 = vmatmul.bf16.gmra.mxu2 %v6912_v53  ;;  %v7456_v53 = vsel %vm4063_vm3, %v4095_v60, %v8579_v25  ;;  %v2750_v60 = vshrl.u32 %v7195_v14, 16 }
 0x243   : > { %v1773_v21 = vpop.f32.mrf.mxu3  ;;  %v7468_v27 = vpop.f32.mrf.mxu0 }
 0x244   : > { %v7444_v63 = vadd.f32 %v1938_v33, %v1773_v21  ;;  %v7446_v40 = vpop.f32.mrf.mxu1  ;;  %v7461_v21 = vsel %vm3025_vm1, %v3442_v8, %v8578_v62  ;;  %v3698_v33 = vshrl.u32 %v7124_v15, 16  ;;  %8696 = vst [vmem:[#allocation100_spill] sm:$0xff] %v7468_v27  ;;  %v2755_v62 = vrot.slane %v2753_v54, 2 }
 0x245   : > { %8693 = vst [vmem:[#allocation98_spill] sm:$0xff] %v7446_v40  ;;  %v1941_v18 = vpop.f32.mrf.mxu2  ;;  %v2762_v54 = vshll.u32 %v7242_v39, 16 }
 0x246   : > { %3920 = vmatmul.bf16.gmra.mxu0 %v3696_v38  ;;  %8694 = vst [vmem:[#allocation99_spill] sm:$0xff] %v7461_v21 }
 0x247   : > { %2932 = vmatmul.bf16.gmra.mxu1 %v2748_v43  ;;  %v3700_v43 = vrot.slane %v3698_v33, 2 }
 0x248   : > { %2114 = vmatmul.bf16.gmra.mxu3 %v1996_v61  ;;  %v2752_v61 = vrot.slane %v2750_v60, 1  ;;  %v1998_v60 = vsel %vm1987_vm14, %v1995_v42, %v8700_v52 }
 0x249   : > { %v3704_v25 = vor.u32 %v3703_v1, %v3700_v43 }
 0x24a   : > { %v2756_v27 = vor.u32 %v2755_v62, %v2752_v61  ;;  %v3710_v62 = vshll.u32 %v7126_v9, 16 }
 0x24b   : > { %v1776_v48 = vpop.f32.mrf.mxu3  ;;  %v7477_v32 = vpop.f32.mrf.mxu0 }
 0x24c   : > { %v7472_v8 = vadd.f32 %v1941_v18, %v1776_v48  ;;  %v7474_v38 = vpop.f32.mrf.mxu1  ;;  %8698 = vst [vmem:[#allocation102_spill] sm:$0xff] %v7477_v32  ;;  %v3705_v48 = vsel %vm3670_vm7, %v3695_v59, %v3704_v25  ;;  %v2757_v33 = vsel %vm2632_vm5, %v2747_v11, %v2756_v27  ;;  %v3712_v1 = vrot.slane %v3710_v62, 3 }
 0x24d   : > { %8697 = vst [vmem:[#allocation101_spill] sm:$0xff] %v7474_v38  ;;  %v1943_v57 = vpop.f32.mrf.mxu2 }
 0x252   : > { %3157 = vmatmul.bf16.gmra.mxu2 %v7019_v37  ;;  %v3707_v37 = vshrl.u32 %v7126_v9, 16 }
 0x253   : > { %v1778_v21 = vpop.f32.mrf.mxu3  ;;  %v7496_v61 = vpop.f32.mrf.mxu0 }
 0x254   : > { %v7479_v14 = vadd.f32 %v1943_v57, %v1778_v21  ;;  %v7481_v40 = vpop.f32.mrf.mxu1  ;;  %v2759_v21 = vshrl.u32 %v7242_v39, 16  ;;  %v3709_v43 = vrot.slane %v3707_v37, 2  ;;  %8702 = vst [vmem:[#allocation105_spill] sm:$0xff] %v7496_v61  ;;  %v6003_v61 = vld [vmem:[#allocation9 + $0x1a0] sm:$0xff] }
 0x255   : > { %8699 = vst [vmem:[#allocation103_spill] sm:$0xff] %v7481_v40  ;;  %v1946_v18 = vpop.f32.mrf.mxu2  ;;  %3517 = vmatpush.bf16.msra.mxu3 %v6003_v61 }
 0x256   : > { %3925 = vmatmul.bf16.gmra.mxu0 %v3705_v48  ;;  %v2761_v42 = vrot.slane %v2759_v21, 1  ;;  %v2764_v48 = vrot.slane %v2762_v54, 2  ;;  %v3713_v52 = vor.u32 %v3712_v1, %v3709_v43  ;;  %v8704_v21 = vrot.slane %v7441_v36, 3 }
 0x257   : > { %2937 = vmatmul.bf16.gmra.mxu1 %v2757_v33  ;;  %v3668_v33 = vunpack.c.l.b16 %v3649_v7  ;;  %v3719_v1 = vshll.u32 %v7167_v51, 16  ;;  %v2771_v7 = vshll.u32 %v7284_v49, 16 }
 0x258   : > { %2119 = vmatmul.bf16.gmra.mxu3 %v1998_v60  ;;  %v2765_v60 = vor.u32 %v2764_v48, %v2761_v42  ;;  %v3714_v62 = vsel %vm3670_vm7, %v3704_v25, %v3713_v52  ;;  %v2768_v25 = vshrl.u32 %v7284_v49, 16 }
 0x259   : > { %v7498_v9 = vpack.c.b16 %v3668_v33, %v3668_v33 }
 0x25b   : > { %v1781_v44 = vpop.f32.mrf.mxu3  ;;  %v7513_v43 = vpop.f32.mrf.mxu0 }
 0x25c   : > { %v7492_v57 = vadd.f32 %v1946_v18, %v1781_v44  ;;  %v7494_v59 = vpop.f32.mrf.mxu1  ;;  %v4099_v18 = vrot.slane %v7498_v9, 3  ;;  %8705 = vst [vmem:[#allocation107_spill] sm:$0xff] %v7513_v43 }
 0x25d   : > { %8701 = vst [vmem:[#allocation104_spill] sm:$0xff] %v7494_v59  ;;  %v1948_v11 = vpop.f32.mrf.mxu2 }
 0x25e   : > { %v7510_v54 = vsel %vm4063_vm3, %v8704_v21, %v4099_v18  ;;  %v3721_v18 = vrot.slane %v3719_v1, 3  ;;  %v2773_v21 = vrot.slane %v2771_v7, 2  ;;  %v3725_v1 = vshrl.u32 %v7191_v29, 16 }
 0x262   : > { %3162 = vmatmul.bf16.gmra.mxu2 %v7069_v10  ;;  %v2766_v10 = vsel %vm2632_vm5, %v2756_v27, %v2765_v60 }
 0x263   : > { %v1783_v44 = vpop.f32.mrf.mxu3 }
 0x264   : > { %v7502_v32 = vadd.f32 %v1948_v11, %v1783_v44  ;;  %v7504_v59 = vpop.f32.mrf.mxu1  ;;  %v3716_v11 = vshrl.u32 %v7167_v51, 16  ;;  %v6019_v44 = vld [vmem:[#allocation9 + $0x220] sm:$0xff]  ;;  %v7525_v51 = vpop.f32.mrf.mxu0 }
 0x265   : > { %8703 = vst [vmem:[#allocation106_spill] sm:$0xff] %v7504_v59  ;;  %v1951_v37 = vpop.f32.mrf.mxu2  ;;  %4170 = vmatpush.bf16.msra.mxu1 %v6019_v44 }
 0x266   : > { %3930 = vmatmul.bf16.gmra.mxu0 %v3714_v62  ;;  %v3718_v61 = vrot.slane %v3716_v11, 2  ;;  %v2770_v62 = vrot.slane %v2768_v25, 1  ;;  %8707 = vst [vmem:[#allocation109_spill] sm:$0xff] %v7525_v51  ;;  %v2777_v25 = vshrl.u32 %v7310_v26, 16 }
 0x267   : > { %2942 = vmatmul.bf16.gmra.mxu1 %v2766_v10 }
 0x268   : > { %2124 = vmatmul.bf16.gmra.mxu3 %v7055_v50  ;;  %v3722_v50 = vor.u32 %v3721_v18, %v3718_v61  ;;  %v2774_v10 = vor.u32 %v2773_v21, %v2770_v62  ;;  %v3727_v18 = vrot.slane %v3725_v1, 2  ;;  %v2779_v44 = vrot.slane %v2777_v25, 1 }
 0x269   : > { %v3734_v25 = vshrl.u32 %v7211_v17, 16 }
 0x26a   : > { %v2775_v11 = vsel %vm2632_vm5, %v2765_v60, %v2774_v10 }
 0x26b   : > { %v1786_v42 = vpop.f32.mrf.mxu3 }
 0x26c   : > { %v7520_v48 = vadd.f32 %v1951_v37, %v1786_v42  ;;  %v7522_v33 = vpop.f32.mrf.mxu1  ;;  %v3723_v42 = vsel %vm3670_vm7, %v3713_v52, %v3722_v50 }
 0x26d   : > { %8706 = vst [vmem:[#allocation108_spill] sm:$0xff] %v7522_v33  ;;  %v1953_v27 = vpop.f32.mrf.mxu2 }
 0x272   : > { %3167 = vmatmul.bf16.gmra.mxu2 %v7094_v23  ;;  %v3728_v23 = vshll.u32 %v7191_v29, 16 }
 0x273   : > { %v1788_v43 = vpop.f32.mrf.mxu3 }
 0x274   : > { %v7527_v59 = vadd.f32 %v1953_v27, %v1788_v43  ;;  %v7529_v37 = vpop.f32.mrf.mxu1  ;;  %v2780_v43 = vshll.u32 %v7310_v26, 16  ;;  %v7538_v27 = vpop.f32.mrf.mxu0  ;;  %v3730_v60 = vrot.slane %v3728_v23, 3  ;;  %v6018_v23 = vld [vmem:[#allocation9 + $0x218] sm:$0xff] }
 0x275   : > { %8708 = vst [vmem:[#allocation110_spill] sm:$0xff] %v7529_v37  ;;  %v1956_v33 = vpop.f32.mrf.mxu2  ;;  %4171 = vmatpush.bf16.msra.mxu1 %v6018_v23  ;;  %v6016_v23 = vld [vmem:[#allocation9 + $0x208] sm:$0xff] }
 0x276   : > { %3935 = vmatmul.bf16.gmra.mxu0 %v3723_v42  ;;  %8709 = vst [vmem:[#allocation111_spill] sm:$0xff] %v7538_v27  ;;  %v2782_v62 = vrot.slane %v2780_v43, 2  ;;  %v3731_v21 = vor.u32 %v3730_v60, %v3727_v18  ;;  %v6002_v43 = vld [vmem:[#allocation9 + $0x198] sm:$0xff]  ;;  %v2786_v18 = vshrl.u32 %v7337_v20, 16 }
 0x277   : > { %2947 = vmatmul.bf16.gmra.mxu1 %v2775_v11  ;;  %3518 = vmatpush.bf16.msra.mxu3 %v6002_v43 }
 0x278   : > { %2129 = vmatmul.bf16.gmra.mxu3 %v7077_v6  ;;  %v2783_v29 = vor.u32 %v2782_v62, %v2779_v44  ;;  %v3732_v27 = vsel %vm3670_vm7, %v3722_v50, %v3731_v21  ;;  %v2789_v50 = vshll.u32 %v7337_v20, 16  ;;  %v3736_v44 = vrot.slane %v3734_v25, 2 }
 0x27a   : > { %v2784_v1 = vsel %vm2632_vm5, %v2774_v10, %v2783_v29 }
 0x27b   : > { %v1791_v7 = vpop.f32.mrf.mxu3 }
 0x27c   : > { %v7540_v61 = vadd.f32 %v1956_v33, %v1791_v7  ;;  %v7542_v52 = vpop.f32.mrf.mxu1  ;;  %v7550_v33 = vpop.f32.mrf.mxu0 }
 0x27d   : > { %8710 = vst [vmem:[#allocation112_spill] sm:$0xff] %v7542_v52  ;;  %v1958_v6 = vpop.f32.mrf.mxu2 }
 0x27e   : > { %8712 = vst [vmem:[#allocation114_spill] sm:$0xff] %v7550_v33 }
 0x282   : > { %3172 = vmatmul.bf16.gmra.mxu2 %v7114_v58  ;;  %v3737_v58 = vshll.u32 %v7211_v17, 16 }
 0x283   : > { %v1793_v42 = vpop.f32.mrf.mxu3 }
 0x284   : > { %v7545_v11 = vadd.f32 %v1958_v6, %v1793_v42  ;;  %v7547_v51 = vpop.f32.mrf.mxu1  ;;  %v3739_v62 = vrot.slane %v3737_v58, 3  ;;  %v2791_v6 = vrot.slane %v2789_v50, 2  ;;  %v6017_v42 = vld [vmem:[#allocation9 + $0x210] sm:$0xff]  ;;  %v7562_v17 = vpop.f32.mrf.mxu0  ;;  %v6015_v50 = vld [vmem:[#allocation9 + $0x200] sm:$0xff] }
 0x285   : > { %8711 = vst [vmem:[#allocation113_spill] sm:$0xff] %v7547_v51  ;;  %v1961_v7 = vpop.f32.mrf.mxu2  ;;  %4172 = vmatpush.bf16.msra.mxu1 %v6017_v42 }
 0x286   : > { %3940 = vmatmul.bf16.gmra.mxu0 %v3732_v27  ;;  %8714 = vst [vmem:[#allocation116_spill] sm:$0xff] %v7562_v17  ;;  %v3740_v33 = vor.u32 %v3739_v62, %v3736_v44  ;;  %v3746_v44 = vshll.u32 %v7244_v31, 16 }
 0x287   : > { %2952 = vmatmul.bf16.gmra.mxu1 %v2784_v1  ;;  %v2611_v1 = vld [vmem:[#allocation2 + $0x98] sm:$0x3] }
 0x288   : > { %2134 = vmatmul.bf16.gmra.mxu3 %v7097_v24  ;;  %v2788_v24 = vrot.slane %v2786_v18, 1  ;;  %v2630_v43 = vunpack.c.l.b16 %v2611_v1  ;;  %v3741_v25 = vsel %vm3670_vm7, %v3731_v21, %v3740_v33  ;;  %v3748_v1 = vrot.slane %v3746_v44, 3  ;;  %v8722_v44 = vld [vmem:[#allocation30_spill] sm:$0xff] }
 0x289   : > { %4173 = vmatpush.bf16.msra.mxu1 %v6016_v23 }
 0x28a   : > { %v2792_v51 = vor.u32 %v2791_v6, %v2788_v24  ;;  %v7571_v18 = vpack.c.b16 %v2630_v43, %v2630_v43 }
 0x28b   : > { %v1796_v27 = vpop.f32.mrf.mxu3 }
 0x28c   : > { %v7558_v60 = vadd.f32 %v1961_v7, %v1796_v27  ;;  %v7560_v10 = vpop.f32.mrf.mxu1  ;;  %v2793_v58 = vsel %vm2632_vm5, %v2783_v29, %v2792_v51  ;;  %v2795_v62 = vshrl.u32 %v7571_v18, 16  ;;  %v2798_v21 = vshll.u32 %v7571_v18, 16 }
 0x28d   : > { %8713 = vst [vmem:[#allocation115_spill] sm:$0xff] %v7560_v10  ;;  %v1963_v52 = vpop.f32.mrf.mxu2  ;;  %4174 = vmatpush.bf16.msra.mxu1 %v6015_v50 }
 0x28e   : > { %v2800_v23 = vrot.slane %v2798_v21, 2 }
 0x292   : > { %3177 = vmatmul.bf16.gmra.mxu2 %v7133_v45  ;;  %v3743_v45 = vshrl.u32 %v7244_v31, 16  ;;  %v8718_v31 = vld [vmem:[#allocation17_spill] sm:$0xff] }
 0x293   : > { %v1798_v7 = vpop.f32.mrf.mxu3 }
 0x294   : > { %v7565_v27 = vadd.f32 %v1963_v52, %v1798_v7  ;;  %v7567_v10 = vpop.f32.mrf.mxu1  ;;  %v7576_v52 = vpop.f32.mrf.mxu0  ;;  %v3745_v42 = vrot.slane %v3743_v45, 2  ;;  %v8719_v7 = vld [vmem:[#allocation15_spill] sm:$0xff] }
 0x295   : > { %8715 = vst [vmem:[#allocation117_spill] sm:$0xff] %v7567_v10  ;;  %v8740_v10 = vld [vmem:[#allocation29_spill] sm:$0xff] }
 0x296   : > { %3945 = vmatmul.bf16.gmra.mxu0 %v3741_v25  ;;  %8716 = vst [vmem:[#allocation118_spill] sm:$0xff] %v7576_v52  ;;  %v3749_v43 = vor.u32 %v3748_v1, %v3745_v42  ;;  %v1879_v25 = vadd.f32 %v8719_v7, %v8718_v31  ;;  %v4042_v1 = vld [vmem:[#allocation2 + $0x10] sm:$0x8] }
 0x297   : > { %2957 = vmatmul.bf16.gmra.mxu1 %v2793_v58 }
 0x298   : > { %2139 = vmatmul.bf16.gmra.mxu3 %v7118_v4  ;;  %v2797_v4 = vrot.slane %v2795_v62, 1 }
 0x29a   : > { %v2801_v58 = vor.u32 %v2800_v23, %v2797_v4  ;;  %v8724_v4 = vld [vmem:[#allocation21_spill] sm:$0xff] }
 0x29b   : > { %v2100_v24 = vpop.f32.mrf.mxu3 }
 0x29c   : > { %v7581_v29 = vadd.f32 %v2100_v24, %v7003_v41  ;;  %v7583_v6 = vpop.f32.mrf.mxu1  ;;  %v7588_v52 = vpop.f32.mrf.mxu0  ;;  %v3750_v41 = vsel %vm3670_vm7, %v3740_v33, %v3749_v43  ;;  %v2802_v45 = vsel %vm2632_vm5, %v2792_v51, %v2801_v58  ;;  %v8727_v51 = vunpack.c.l.b16 %v7370_v3  ;;  %v6129_v3 = vld [vmem:[#allocation2 + $0x58] sm:$0xff] }
 0x29d   : > { %8717 = vst [vmem:[#allocation119_spill] sm:$0xff] %v7583_v6 }
 0x29e   : > { %8720 = vst [vmem:[#allocation17_spill] sm:$0xff] %v7588_v52 }
 0x2a2   : > { %3182 = vmatmul.bf16.gmra.mxu2 %v7136_v28  ;;  %v8723_v28 = vld [vmem:[#allocation43_spill] sm:$0xff] }
 0x2a3   : > { %v2102_v50 = vpop.f32.mrf.mxu3  ;;  %v3752_v62 = vshrl.u32 %v8723_v28, 16  ;;  %v3755_v21 = vshll.u32 %v8723_v28, 16  ;;  %v8730_v28 = vld [vmem:[#allocation19_spill] sm:$0xff] }
 0x2a4   : > { %v7590_v17 = vadd.f32 %v2102_v50, %v1879_v25  ;;  %v7593_v24 = vpop.f32.mrf.mxu1  ;;  %v7602_v31 = vpop.f32.mrf.mxu0  ;;  %v4061_v25 = vunpack.c.l.b16 %v4042_v1  ;;  %v6001_v50 = vld [vmem:[#allocation9 + $0x190] sm:$0xff] }
 0x2a5   : > { %8721 = vst [vmem:[#allocation15_spill] sm:$0xff] %v7593_v24  ;;  %v3754_v33 = vrot.slane %v3752_v62, 2  ;;  %v3757_v7 = vrot.slane %v3755_v21, 3  ;;  %3519 = vmatpush.bf16.msra.mxu3 %v6001_v50 }
 0x2a6   : > { %3950 = vmatmul.bf16.gmra.mxu0 %v3750_v41  ;;  %8725 = vst [vmem:[#allocation30_spill] sm:$0xff] %v7602_v31  ;;  %v4062_v58 = vpack.c.b16 %v8727_v51, %v4061_v25  ;;  %v2009_v25 = vrot.slane %v6129_v3, 1  ;;  %v8731_v51 = vld [vmem:[#allocation18_spill] sm:$0xff]  ;;  %v6130_v3 = vld [vmem:[#allocation2 + $0x68] sm:$0xff] }
 0x2a7   : > { %2962 = vmatmul.bf16.gmra.mxu1 %v2802_v45  ;;  %v8728_v45 = vld [vmem:[#allocation26_spill] sm:$0xff]  ;;  %v3758_v24 = vor.u32 %v3757_v7, %v3754_v33 }
 0x2a8   : > { %2144 = vmatmul.bf16.gmra.mxu3 %v8722_v44  ;;  %v8729_v44 = vld [vmem:[#allocation22_spill] sm:$0xff]  ;;  %v4064_v31 = vrot.slane %v4062_v58, 3  ;;  %v8736_v58 = vld [vmem:[#allocation25_spill] sm:$0xff] }
 0x2a9   : > { %v1884_v52 = vadd.f32 %v8730_v28, %v8729_v44  ;;  %v3759_v1 = vsel %vm3670_vm7, %v3749_v43, %v3758_v24  ;;  %v8734_v44 = vld [vmem:[#allocation44_spill] sm:$0xff] }
 0x2aa   : > { %v3761_v28 = vshrl.u32 %v8734_v44, 16 }
 0x2ab   : > { %v2105_v42 = vpop.f32.mrf.mxu3 }
 0x2ac   : > { %v7600_v23 = vadd.f32 %v2105_v42, %v8724_v4  ;;  %v7604_v41 = vpop.f32.mrf.mxu1  ;;  %v4065_v42 = vrot.slane %v7383_v5, 3  ;;  %v7612_v4 = vpop.f32.mrf.mxu2 }
 0x2ad   : > { %8726 = vst [vmem:[#allocation43_spill] sm:$0xff] %v7604_v41  ;;  %v7621_v7 = vpop.f32.mrf.mxu0 }
 0x2ae   : > { %v4066_v50 = vsel %vm4063_vm3, %v4064_v31, %v4065_v42  ;;  %8733 = vst [vmem:[#allocation21_spill] sm:$0xff] %v7621_v7  ;;  %v3049_v31 = vrot.slane %v6130_v3, 2 }
 0x2b2   : > { %3187 = vmatmul.bf16.gmra.mxu2 %v8728_v45  ;;  %v8732_v45 = vrot.slane %v8731_v51, 1 }
 0x2b3   : > { %v2107_v62 = vpop.f32.mrf.mxu3 }
 0x2b4   : > { %v7614_v21 = vadd.f32 %v2107_v62, %v1884_v52  ;;  %v2010_v33 = vsel %vm1987_vm14, %v8732_v45, %v2009_v25  ;;  %v3764_v52 = vshll.u32 %v8734_v44, 16  ;;  %v7625_v62 = vpop.f32.mrf.mxu1  ;;  %v7630_v51 = vpop.f32.mrf.mxu2  ;;  %v8738_v45 = vld [vmem:[#allocation16_spill] sm:$0xff] }
 0x2b5   : > { %8735 = vst [vmem:[#allocation26_spill] sm:$0xff] %v7625_v62  ;;  %v8739_v6 = vrot.slane %v8738_v45, 2  ;;  %v8741_v44 = vld [vmem:[#allocation24_spill] sm:$0xff]  ;;  %v7637_v62 = vpop.f32.mrf.mxu0 }
 0x2b6   : > { %3955 = vmatmul.bf16.gmra.mxu0 %v3759_v1  ;;  %v3766_v41 = vrot.slane %v3764_v52, 3  ;;  %v1889_v37 = vadd.f32 %v8741_v44, %v8740_v10  ;;  %8742 = vst [vmem:[#allocation19_spill] sm:$0xff] %v7637_v62 }
 0x2b7   : > { %4175 = vmatmul.bf16.vlgmr.msra.gmra.mxu1 %v4066_v50  ;;  %v3763_v50 = vrot.slane %v3761_v28, 2  ;;  %v6131_v28 = vld [vmem:[#allocation2 + $0x60] sm:$0xff] }
 0x2b8   : > { %2149 = vmatmul.bf16.gmra.mxu3 %v2010_v33  ;;  %v3050_v33 = vsel %vm3025_vm1, %v8739_v6, %v3049_v31  ;;  %v2011_v52 = vrot.slane %v6131_v28, 1 }
 0x2b9   : > { %v3767_v7 = vor.u32 %v3766_v41, %v3763_v50  ;;  %v3770_v50 = vshrl.u32 %v7250_v2, 16 }
 0x2ba   : > { %v2012_v10 = vsel %vm1987_vm14, %v2009_v25, %v2011_v52 }
 0x2bb   : > { %v2110_v43 = vpop.f32.mrf.mxu3  ;;  %v3768_v45 = vsel %vm3670_vm7, %v3758_v24, %v3767_v7  ;;  %v6132_v24 = vld [vmem:[#allocation2 + $0x70] sm:$0xff] }
 0x2bc   : > { %v7628_v1 = vadd.f32 %v2110_v43, %v8736_v58  ;;  %v4067_v43 = vrot.slane %v7417_v0, 3  ;;  %v7640_v58 = vpop.f32.mrf.mxu1  ;;  %v7646_v41 = vpop.f32.mrf.mxu2  ;;  %v3051_v28 = vrot.slane %v6132_v24, 2 }
 0x2bd   : > { %8743 = vst [vmem:[#allocation18_spill] sm:$0xff] %v7640_v58  ;;  %v7651_v62 = vpop.f32.mrf.mxu0 }
 0x2be   : > { %8737 = vst [vmem:[#allocation22_spill] sm:$0xff] %v7628_v1  ;;  %v4068_v6 = vsel %vm4063_vm3, %v4065_v42, %v4067_v43  ;;  %v3052_v25 = vsel %vm3025_vm1, %v3049_v31, %v3051_v28  ;;  %v8749_v1 = vld [vmem:[#allocation36_spill] sm:$0xff] }
 0x2bf   : > { %8745 = vst [vmem:[#allocation25_spill] sm:$0xff] %v7651_v62 }
 0x2c2   : > { %3192 = vmatmul.bf16.gmra.mxu2 %v3050_v33  ;;  %v3773_v33 = vshll.u32 %v7250_v2, 16 }
 0x2c3   : > { %v2112_v3 = vpop.f32.mrf.mxu3 }
 0x2c4   : > { %v7642_v40 = vadd.f32 %v2112_v3, %v1889_v37  ;;  %v8746_v37 = vld [vmem:[#allocation34_spill] sm:$0xff]  ;;  %v3775_v42 = vrot.slane %v3773_v33, 3  ;;  %v7656_v58 = vpop.f32.mrf.mxu1  ;;  %v7659_v38 = vpop.f32.mrf.mxu2  ;;  %v8751_v33 = vrot.slane %v7124_v15, 3 }
 0x2c5   : > { %8748 = vst [vmem:[#allocation29_spill] sm:$0xff] %v7656_v58 }
 0x2c6   : > { %8744 = vst [vmem:[#allocation44_spill] sm:$0xff] %v7642_v40  ;;  %3960 = vmatmul.bf16.gmra.mxu0 %v3768_v45  ;;  %v3772_v45 = vrot.slane %v3770_v50, 2  ;;  %v6133_v40 = vld [vmem:[#allocation2 + $0x68] sm:$0xff]  ;;  %v7665_v50 = vpop.f32.mrf.mxu0  ;;  %v4070_v31 = vsel %vm4063_vm3, %v4067_v43, %v8751_v33 }
 0x2c7   : > { %4180 = vmatmul.bf16.gmra.mxu1 %v4068_v6  ;;  %v6000_v6 = vld [vmem:[#allocation9 + $0x188] sm:$0xff]  ;;  %v2013_v62 = vrot.slane %v6133_v40, 1  ;;  %v3779_v40 = vshrl.u32 %v7289_v19, 16 }
 0x2c8   : > { %2154 = vmatmul.bf16.gmra.mxu3 %v2012_v10  ;;  %v3776_v10 = vor.u32 %v3775_v42, %v3772_v45 }
 0x2c9   : > { %3520 = vmatpush.bf16.msra.mxu3 %v6000_v6  ;;  %v2014_v45 = vsel %vm1987_vm14, %v2011_v52, %v2013_v62  ;;  %v8753_v6 = vld [vmem:[#allocation40_spill] sm:$0xff] }
 0x2cb   : > { %v2115_v44 = vpop.f32.mrf.mxu3 }
 0x2cc   : > { %v7654_v3 = vadd.f32 %v2115_v44, %v8746_v37  ;;  %v3777_v37 = vsel %vm3670_vm7, %v3767_v7, %v3776_v10  ;;  %v7670_v24 = vpop.f32.mrf.mxu1  ;;  %v7675_v42 = vpop.f32.mrf.mxu2 }
 0x2cd   : > { %8752 = vst [vmem:[#allocation34_spill] sm:$0xff] %v7670_v24 }
 0x2ce   : > { %8747 = vst [vmem:[#allocation16_spill] sm:$0xff] %v7654_v3  ;;  %v7681_v33 = vpop.f32.mrf.mxu0 }
 0x2d2   : > { %3197 = vmatmul.bf16.gmra.mxu2 %v3052_v25 }
 0x2d3   : > { %v2117_v2 = vpop.f32.mrf.mxu3 }
 0x2d4   : > { %v7662_v44 = vadd.f32 %v2117_v2, %v8749_v1  ;;  %v3782_v1 = vshll.u32 %v7289_v19, 16  ;;  %v3053_v2 = vrot.slane %v7242_v39, 2  ;;  %v6134_v19 = vld [vmem:[#allocation2 + $0x70] sm:$0xff]  ;;  %v8759_v39 = vld [vmem:[#allocation31_spill] sm:$0xff] }
 0x2d5   : > { %v2015_v58 = vrot.slane %v6134_v19, 1 }
 0x2d6   : > { %8750 = vst [vmem:[#allocation24_spill] sm:$0xff] %v7662_v44  ;;  %3965 = vmatmul.bf16.gmra.mxu0 %v3777_v37  ;;  %v3781_v37 = vrot.slane %v3779_v40, 2  ;;  %v3784_v43 = vrot.slane %v3782_v1, 3  ;;  %v8756_v44 = vld [vmem:[#allocation42_spill] sm:$0xff]  ;;  %v3791_v1 = vshll.u32 %v7316_v46, 16 }
 0x2d7   : > { %4185 = vmatmul.bf16.gmra.mxu1 %v4070_v31  ;;  %v3054_v31 = vsel %vm3025_vm1, %v3051_v28, %v3053_v2  ;;  %v2016_v40 = vsel %vm1987_vm14, %v2013_v62, %v2015_v58  ;;  %v3788_v28 = vshrl.u32 %v7316_v46, 16  ;;  %v6135_v46 = vld [vmem:[#allocation2 + $0x78] sm:$0xff] }
 0x2d8   : > { %2159 = vmatmul.bf16.gmra.mxu3 %v2014_v45  ;;  %v3785_v52 = vor.u32 %v3784_v43, %v3781_v37  ;;  %v7684_v45 = vpop.f32.mrf.mxu1  ;;  %v7696_v37 = vpop.f32.mrf.mxu0 }
 0x2d9   : > { %8755 = vst [vmem:[#allocation40_spill] sm:$0xff] %v7684_v45  ;;  %v3790_v19 = vrot.slane %v3788_v28, 2  ;;  %v8765_v28 = vld [vmem:[#allocation37_spill] sm:$0xff] }
 0x2db   : > { %v2120_v7 = vpop.f32.mrf.mxu3 }
 0x2dc   : > { %v7678_v25 = vadd.f32 %v2120_v7, %v8753_v6  ;;  %v3786_v7 = vsel %vm3670_vm7, %v3776_v10, %v3785_v52  ;;  %v7690_v6 = vpop.f32.mrf.mxu2  ;;  %v3055_v10 = vrot.slane %v7284_v49, 2  ;;  %v5999_v49 = vld [vmem:[#allocation9 + $0x180] sm:$0xff] }
 0x2dd   : > { %8758 = vst [vmem:[#allocation120_spill] sm:$0xff] %v7690_v6  ;;  %3521 = vmatpush.bf16.msra.mxu3 %v5999_v49  ;;  %v6136_v49 = vld [vmem:[#allocation2 + $0x80] sm:$0xff] }
 0x2de   : > { %8754 = vst [vmem:[#allocation36_spill] sm:$0xff] %v7678_v25  ;;  %v3056_v62 = vsel %vm3025_vm1, %v3053_v2, %v3055_v10 }
 0x2e0   : > { %v7698_v43 = vpop.f32.mrf.mxu1  ;;  %v7707_v25 = vpop.f32.mrf.mxu0 }
 0x2e1   : > { %8760 = vst [vmem:[#allocation31_spill] sm:$0xff] %v7698_v43  ;;  %v8762_v43 = vld [vmem:[#allocation54_spill] sm:$0xff] }
 0x2e2   : > { %3202 = vmatmul.bf16.gmra.mxu2 %v3054_v31 }
 0x2e3   : > { %v2122_v24 = vpop.f32.mrf.mxu3 }
 0x2e4   : > { %v7687_v3 = vadd.f32 %v2122_v24, %v8756_v44  ;;  %v8761_v24 = vld [vmem:[#allocation48_spill] sm:$0xff] }
 0x2e6   : > { %8757 = vst [vmem:[#allocation42_spill] sm:$0xff] %v7687_v3  ;;  %3970 = vmatmul.bf16.gmra.mxu0 %v3786_v7  ;;  %v3793_v7 = vrot.slane %v3791_v1, 3  ;;  %v2017_v3 = vrot.slane %v6135_v46, 1  ;;  %v3797_v1 = vshrl.u32 %v7342_v16, 16 }
 0x2e7   : > { %4190 = vmatmul.bf16.gmra.mxu1 %v8759_v39  ;;  %v7704_v39 = vpop.f32.mrf.mxu2 }
 0x2e8   : > { %2164 = vmatmul.bf16.gmra.mxu3 %v2016_v40  ;;  %v3794_v40 = vor.u32 %v3793_v7, %v3790_v19  ;;  %v2018_v2 = vsel %vm1987_vm14, %v2015_v58, %v2017_v3  ;;  %v3800_v19 = vshll.u32 %v7342_v16, 16 }
 0x2ea   : > { %v3802_v46 = vrot.slane %v3800_v19, 3 }
 0x2eb   : > { %v2125_v44 = vpop.f32.mrf.mxu3 }
 0x2ec   : > { %v7701_v31 = vadd.f32 %v2125_v44, %v8761_v24  ;;  %v3795_v44 = vsel %vm3670_vm7, %v3785_v52, %v3794_v40  ;;  %v7713_v24 = vpop.f32.mrf.mxu1  ;;  %v3057_v52 = vrot.slane %v7310_v26, 2 }
 0x2ed   : > { %8764 = vst [vmem:[#allocation54_spill] sm:$0xff] %v7713_v24 }
 0x2ee   : > { %v3058_v58 = vsel %vm3025_vm1, %v3055_v10, %v3057_v52  ;;  %v3806_v10 = vshrl.u32 %v7372_v12, 16 }
 0x2ef   : > { %v7719_v7 = vpop.f32.mrf.mxu2 }
 0x2f2   : > { %3207 = vmatmul.bf16.gmra.mxu2 %v3056_v62  ;;  %v3799_v62 = vrot.slane %v3797_v1, 2  ;;  %v8768_v1 = vld [vmem:[#allocation45_spill] sm:$0xff] }
 0x2f3   : > { %v2127_v45 = vpop.f32.mrf.mxu3 }
 0x2f4   : > { %v7710_v6 = vadd.f32 %v2127_v45, %v8762_v43 }
 0x2f6   : > { %8763 = vst [vmem:[#allocation48_spill] sm:$0xff] %v7710_v6  ;;  %3975 = vmatmul.bf16.gmra.mxu0 %v3795_v44  ;;  %v7725_v44 = vpop.f32.mrf.mxu0  ;;  %v2019_v6 = vrot.slane %v6136_v49, 1 }
 0x2f7   : > { %4195 = vmatmul.bf16.gmra.mxu1 %v8765_v28  ;;  %v7727_v28 = vpop.f32.mrf.mxu1  ;;  %v7730_v16 = vpop.f32.mrf.mxu2 }
 0x2f8   : > { %2169 = vmatmul.bf16.gmra.mxu3 %v2018_v2  ;;  %8766 = vst [vmem:[#allocation37_spill] sm:$0xff] %v7727_v28  ;;  %v3803_v2 = vor.u32 %v3802_v46, %v3799_v62  ;;  %v2020_v19 = vsel %vm1987_vm14, %v2017_v3, %v2019_v6  ;;  %v3809_v62 = vshll.u32 %v7372_v12, 16 }
 0x2fa   : > { %v3804_v26 = vsel %vm3670_vm7, %v3794_v40, %v3803_v2  ;;  %v3059_v40 = vrot.slane %v7337_v20, 2  ;;  %v3811_v49 = vrot.slane %v3809_v62, 3  ;;  %v8773_v62 = vld [vmem:[#allocation51_spill] sm:$0xff] }
 0x2fb   : > { %v2130_v45 = vpop.f32.mrf.mxu3 }
 0x2fc   : > { %v7722_v43 = vadd.f32 %v2130_v45, %v7266_v55  ;;  %v3060_v3 = vsel %vm3025_vm1, %v3057_v52, %v3059_v40 }
 0x2fe   : > { %v7738_v45 = vpop.f32.mrf.mxu0 }
 0x2ff   : > { %v7742_v46 = vpop.f32.mrf.mxu1 }
 0x300   : > { %8769 = vst [vmem:[#allocation45_spill] sm:$0xff] %v7742_v46  ;;  %v6137_v46 = vld [vmem:[#allocation2 + $0x88] sm:$0xff] }
 0x302   : > { %3212 = vmatmul.bf16.gmra.mxu2 %v3058_v58 }
 0x303   : > { %v2132_v24 = vpop.f32.mrf.mxu3 }
 0x304   : > { %v7733_v55 = vadd.f32 %v2132_v24, %v7286_v34  ;;  %v3808_v24 = vrot.slane %v3806_v10, 2 }
 0x306   : > { %8767 = vst [vmem:[#allocation121_spill] sm:$0xff] %v7733_v55  ;;  %3980 = vmatmul.bf16.gmra.mxu0 %v3804_v26  ;;  %v7748_v26 = vpop.f32.mrf.mxu2  ;;  %v2021_v55 = vrot.slane %v6137_v46, 1 }
 0x307   : > { %4200 = vmatmul.bf16.gmra.mxu1 %v8768_v1  ;;  %v3812_v1 = vor.u32 %v3811_v49, %v3808_v24  ;;  %v7753_v28 = vpop.f32.mrf.mxu1  ;;  %v3818_v24 = vshll.u32 %v7409_v47, 16 }
 0x308   : > { %2174 = vmatmul.bf16.gmra.mxu3 %v2020_v19  ;;  %v7751_v19 = vpop.f32.mrf.mxu0  ;;  %8771 = vst [vmem:[#allocation123_spill] sm:$0xff] %v7753_v28  ;;  %v2022_v52 = vsel %vm1987_vm14, %v2019_v6, %v2021_v55 }
 0x309   : > { %v3813_v20 = vsel %vm3670_vm7, %v3803_v2, %v3812_v1  ;;  %v3061_v2 = vrot.slane %v7571_v18, 2 }
 0x30b   : > { %v2135_v58 = vpop.f32.mrf.mxu3 }
 0x30c   : > { %v7745_v34 = vadd.f32 %v2135_v58, %v7296_v13  ;;  %v3815_v58 = vshrl.u32 %v7409_v47, 16  ;;  %v8775_v47 = vld [vmem:[#allocation67_spill] sm:$0xff] }
 0x30e   : > { %8770 = vst [vmem:[#allocation122_spill] sm:$0xff] %v7745_v34  ;;  %v7759_v10 = vpop.f32.mrf.mxu2  ;;  %v3817_v46 = vrot.slane %v3815_v58, 2 }
 0x312   : > { %3217 = vmatmul.bf16.gmra.mxu2 %v3060_v3  ;;  %v7765_v3 = vpop.f32.mrf.mxu0 }
 0x313   : > { %v2137_v12 = vpop.f32.mrf.mxu3 }
 0x314   : > { %v7756_v13 = vadd.f32 %v2137_v12, %v7312_v30  ;;  %v3820_v12 = vrot.slane %v3818_v24, 3  ;;  %v8777_v24 = vld [vmem:[#allocation56_spill] sm:$0xff] }
 0x316   : > { %8772 = vst [vmem:[#allocation124_spill] sm:$0xff] %v7756_v13  ;;  %3985 = vmatmul.bf16.gmra.mxu0 %v3813_v20  ;;  %v7771_v20 = vpop.f32.mrf.mxu1  ;;  %v3821_v6 = vor.u32 %v3820_v12, %v3817_v46  ;;  %v2023_v13 = vrot.slane %v8775_v47, 1  ;;  %v8778_v12 = vld [vmem:[#allocation72_spill] sm:$0xff] }
 0x317   : > { %4205 = vmatmul.bf16.gmra.mxu1 %v8773_v62  ;;  %8774 = vst [vmem:[#allocation51_spill] sm:$0xff] %v7771_v20  ;;  %v3062_v62 = vsel %vm3025_vm1, %v3059_v40, %v3061_v2  ;;  %v3827_v2 = vshll.u32 %v7441_v36, 16  ;;  %v8783_v20 = vld [vmem:[#allocation84_spill] sm:$0xff] }
 0x318   : > { %2179 = vmatmul.bf16.gmra.mxu3 %v2022_v52  ;;  %v7774_v52 = vpop.f32.mrf.mxu2  ;;  %v2024_v40 = vsel %vm1987_vm14, %v2021_v55, %v2023_v13  ;;  %v8781_v55 = vld [vmem:[#allocation74_spill] sm:$0xff] }
 0x31a   : > { %v7781_v18 = vpop.f32.mrf.mxu0 }
 0x31b   : > { %v2140_v49 = vpop.f32.mrf.mxu3 }
 0x31c   : > { %v7768_v30 = vadd.f32 %v2140_v49, %v7323_v56  ;;  %v3822_v56 = vsel %vm3670_vm7, %v3812_v1, %v3821_v6  ;;  %v3824_v49 = vshrl.u32 %v7441_v36, 16  ;;  %v3829_v1 = vrot.slane %v3827_v2, 3 }
 0x31d   : > { %v3411_v36 = vrot.slane %v8783_v20, 2  ;;  %v3833_v2 = vshrl.u32 %v7498_v9, 16 }
 0x31e   : > { %v7783_v58 = vpop.f32.mrf.mxu1 }
 0x31f   : > { %8776 = vst [vmem:[#allocation67_spill] sm:$0xff] %v7783_v58 }
 0x322   : > { %3222 = vmatmul.bf16.gmra.mxu2 %v3062_v62  ;;  %v7792_v62 = vpop.f32.mrf.mxu0 }
 0x323   : > { %v2142_v28 = vpop.f32.mrf.mxu3 }
 0x324   : > { %v7778_v34 = vadd.f32 %v2142_v28, %v7339_v22  ;;  %v3826_v28 = vrot.slane %v3824_v49, 2 }
 0x326   : > { %3990 = vmatmul.bf16.gmra.mxu0 %v3822_v56  ;;  %v3830_v47 = vor.u32 %v3829_v1, %v3826_v28  ;;  %v7794_v56 = vpop.f32.mrf.mxu1  ;;  %v8786_v1 = vld [vmem:[#allocation79_spill] sm:$0xff] }
 0x327   : > { %4210 = vmatmul.bf16.gmra.mxu1 %v8777_v24  ;;  %8780 = vst [vmem:[#allocation72_spill] sm:$0xff] %v7794_v56  ;;  %v3412_v24 = vrot.slane %v7383_v5, 2 }
 0x328   : > { %2184 = vmatmul.bf16.gmra.mxu3 %v2024_v40  ;;  %v3831_v40 = vsel %vm3670_vm7, %v3821_v6, %v3830_v47  ;;  %v3835_v6 = vrot.slane %v3833_v2, 2 }
 0x329   : > { %v3413_v49 = vsel %vm3025_vm1, %v3411_v36, %v3412_v24  ;;  %v8787_v36 = vld [vmem:[#allocation82_spill] sm:$0xff] }
 0x32a   : > { %v7806_v28 = vpop.f32.mrf.mxu0 }
 0x32b   : > { %v2145_v46 = vpop.f32.mrf.mxu3 }
 0x32c   : > { %v7790_v22 = vadd.f32 %v2145_v46, %v8778_v12  ;;  %v8784_v46 = vld [vmem:[#allocation57_spill] sm:$0xff]  ;;  %v3836_v12 = vshll.u32 %v7498_v9, 16 }
 0x32e   : > { %8779 = vst [vmem:[#allocation56_spill] sm:$0xff] %v7790_v22  ;;  %v7808_v5 = vpop.f32.mrf.mxu1 }
 0x32f   : > { %8785 = vst [vmem:[#allocation84_spill] sm:$0xff] %v7808_v5  ;;  %v8789_v5 = vld [vmem:[#allocation49_spill] sm:$0xff] }
 0x332   : > { %v7818_v9 = vpop.f32.mrf.mxu0 }
 0x333   : > { %v2147_v58 = vpop.f32.mrf.mxu3 }
 0x334   : > { %v7798_v13 = vadd.f32 %v2147_v58, %v8781_v55 }
 0x336   : > { %8782 = vst [vmem:[#allocation74_spill] sm:$0xff] %v7798_v13  ;;  %3995 = vmatmul.bf16.gmra.mxu0 %v3831_v40  ;;  %v3838_v40 = vrot.slane %v3836_v12, 3  ;;  %v7820_v22 = vpop.f32.mrf.mxu1 }
 0x337   : > { %4215 = vmatmul.bf16.gmra.mxu1 %v8784_v46  ;;  %v3414_v46 = vrot.slane %v7417_v0, 2  ;;  %8788 = vst [vmem:[#allocation57_spill] sm:$0xff] %v7820_v22 }
 0x338   : > { %3522 = vmatmul.bf16.vlgmr.msra.gmra.mxu3 %v3413_v49  ;;  %v3839_v20 = vor.u32 %v3838_v40, %v3835_v6  ;;  %v8793_v40 = vrot.slane %v7124_v15, 2 }
 0x33a   : > { %v3840_v13 = vsel %vm3670_vm7, %v3830_v47, %v3839_v20  ;;  %v8792_v47 = vld [vmem:[#allocation58_spill] sm:$0xff] }
 0x33b   : > { %v2150_v58 = vpop.f32.mrf.mxu3  ;;  %v8794_v20 = vld [vmem:[#allocation94_spill] sm:$0xff] }
 0x33c   : > { %v7811_v55 = vadd.f32 %v2150_v58, %v8786_v1  ;;  %v3415_v58 = vsel %vm3025_vm1, %v3412_v24, %v3414_v46  ;;  %v8791_v1 = vld [vmem:[#allocation89_spill] sm:$0xff] }
 0x33e   : > { %v7827_v0 = vpop.f32.mrf.mxu1 }
 0x33f   : > { %8790 = vst [vmem:[#allocation79_spill] sm:$0xff] %v7827_v0  ;;  %v8802_v0 = vld [vmem:[#allocation76_spill] sm:$0xff] }
 0x343   : > { %v2152_v56 = vpop.f32.mrf.mxu3 }
 0x344   : > { %v7815_v49 = vadd.f32 %v2152_v56, %v8787_v36 }
 0x346   : > { %4000 = vmatmul.bf16.gmra.mxu0 %v3840_v13  ;;  %v3417_v13 = vsel %vm3025_vm1, %v3414_v46, %v8793_v40 }
 0x347   : > { %4220 = vmatmul.bf16.gmra.mxu1 %v8789_v5  ;;  %v4176_v5 = vpop.f32.mrf.mxu1 }
 0x348   : > { %3527 = vmatmul.bf16.gmra.mxu3 %v3415_v58 }
 0x34b   : > { %v2155_v2 = vpop.f32.mrf.mxu3 }
 0x34c   : > { %v7825_v12 = vadd.f32 %v2155_v2, %v7405_v35 }
 0x34f   : > { %v7839_v35 = vpop.f32.mrf.mxu1 }
 0x353   : > { %v2157_v56 = vpop.f32.mrf.mxu3 }
 0x354   : > { %v7830_v6 = vadd.f32 %v2157_v56, %v8791_v1  ;;  %v8795_v56 = vld [vmem:[#allocation64_spill] sm:$0xff]  ;;  %v8796_v1 = vld [vmem:[#allocation33_spill] sm:$0xff] }
 0x357   : > { %4225 = vmatmul.bf16.gmra.mxu1 %v8792_v47  ;;  %v7849_v46 = vpop.f32.mrf.mxu1 }
 0x358   : > { %3532 = vmatmul.bf16.gmra.mxu3 %v3417_v13 }
 0x35b   : > { %v2160_v24 = vpop.f32.mrf.mxu3 }
 0x35c   : > { %v7837_v36 = vadd.f32 %v2160_v24, %v8794_v20  ;;  %v8798_v20 = vld [vmem:[#allocation69_spill] sm:$0xff] }
 0x35f   : > { %v7854_v24 = vpop.f32.mrf.mxu1 }
 0x363   : > { %v2162_v58 = vpop.f32.mrf.mxu3 }
 0x364   : > { %v7842_v2 = vadd.f32 %v2162_v58, %v7444_v63  ;;  %v8799_v63 = vld [vmem:[#allocation39_spill] sm:$0xff] }
 0x367   : > { %4230 = vmatmul.bf16.gmra.mxu1 %v8795_v56 }
 0x368   : > { %3537 = vmatmul.bf16.gmra.mxu3 %v8796_v1  ;;  %v7861_v1 = vpop.f32.mrf.mxu1 }
 0x36b   : > { %v2165_v47 = vpop.f32.mrf.mxu3 }
 0x36c   : > { %v7847_v15 = vadd.f32 %v2165_v47, %v7472_v8 }
 0x373   : > { %v2167_v40 = vpop.f32.mrf.mxu3 }
 0x374   : > { %v7852_v13 = vadd.f32 %v2167_v40, %v7479_v14  ;;  %v8803_v14 = vld [vmem:[#allocation47_spill] sm:$0xff]  ;;  %v7868_v40 = vpop.f32.mrf.mxu1 }
 0x376   : > { %8797 = vst [vmem:[#allocation82_spill] sm:$0xff] %v7852_v13 }
 0x377   : > { %4235 = vmatmul.bf16.gmra.mxu1 %v8798_v20 }
 0x378   : > { %3542 = vmatmul.bf16.gmra.mxu3 %v8799_v63 }
 0x37b   : > { %v2170_v58 = vpop.f32.mrf.mxu3 }
 0x37c   : > { %v7859_v56 = vadd.f32 %v2170_v58, %v7492_v57  ;;  %v7876_v58 = vpop.f32.mrf.mxu1 }
 0x37e   : > { %8800 = vst [vmem:[#allocation49_spill] sm:$0xff] %v7859_v56  ;;  %v8806_v56 = vld [vmem:[#allocation85_spill] sm:$0xff] }
 0x383   : > { %v2172_v8 = vpop.f32.mrf.mxu3 }
 0x384   : > { %v7864_v47 = vadd.f32 %v2172_v8, %v7502_v32  ;;  %v8807_v32 = vld [vmem:[#allocation53_spill] sm:$0xff] }
 0x386   : > { %8801 = vst [vmem:[#allocation89_spill] sm:$0xff] %v7864_v47 }
 0x387   : > { %4240 = vmatmul.bf16.gmra.mxu1 %v8802_v0 }
 0x388   : > { %3547 = vmatmul.bf16.gmra.mxu3 %v8803_v14  ;;  %v7883_v14 = vpop.f32.mrf.mxu1 }
 0x38b   : > { %v2175_v22 = vpop.f32.mrf.mxu3 }
 0x38c   : > { %v7871_v20 = vadd.f32 %v2175_v22, %v7520_v48  ;;  %v8810_v22 = vld [vmem:[#allocation92_spill] sm:$0xff] }
 0x38e   : > { %8804 = vst [vmem:[#allocation58_spill] sm:$0xff] %v7871_v20 }
 0x393   : > { %v2177_v63 = vpop.f32.mrf.mxu3 }
 0x394   : > { %v7874_v57 = vadd.f32 %v2177_v63, %v7527_v59  ;;  %v8811_v59 = vld [vmem:[#allocation59_spill] sm:$0xff]  ;;  %v7890_v63 = vpop.f32.mrf.mxu1 }
 0x396   : > { %8805 = vst [vmem:[#allocation94_spill] sm:$0xff] %v7874_v57 }
 0x397   : > { %4245 = vmatmul.bf16.gmra.mxu1 %v8806_v56 }
 0x398   : > { %3552 = vmatmul.bf16.gmra.mxu3 %v8807_v32  ;;  %v8813_v32 = vld [vmem:[#allocation20_spill] sm:$0xff] }
 0x39b   : > { %v2180_v8 = vpop.f32.mrf.mxu3 }
 0x39c   : > { %v7881_v0 = vadd.f32 %v2180_v8, %v7540_v61  ;;  %v2575_v61 = vadd.f32 %v8813_v32, %v7581_v29  ;;  %v7897_v8 = vpop.f32.mrf.mxu1  ;;  %v8818_v32 = vld [vmem:[#allocation80_spill] sm:$0xff] }
 0x39e   : > { %8808 = vst [vmem:[#allocation64_spill] sm:$0xff] %v7881_v0 }
 0x3a3   : > { %v2182_v47 = vpop.f32.mrf.mxu3 }
 0x3a4   : > { %v7886_v48 = vadd.f32 %v2182_v47, %v7545_v11  ;;  %v8815_v11 = vld [vmem:[#allocation75_spill] sm:$0xff] }
 0x3a5   : > { %v2968_v47 = vadd.f32 %v8815_v11, %v2575_v61 }
 0x3a6   : > { %8809 = vst [vmem:[#allocation33_spill] sm:$0xff] %v7886_v48 }
 0x3a7   : > { %4250 = vmatmul.bf16.gmra.mxu1 %v8810_v22  ;;  %v8816_v22 = vld [vmem:[#allocation60_spill] sm:$0xff] }
 0x3a8   : > { %3557 = vmatmul.bf16.gmra.mxu3 %v8811_v59  ;;  %v3228_v59 = vadd.f32 %v7612_v4, %v2968_v47  ;;  %v7918_v4 = vld [vmem:[%s8557_s5] ss:$0 sm:$0xff]  ;;  %v8820_v47 = vld [vmem:[#allocation83_spill] sm:$0xff] }
 0x3ab   : > { %v2185_v57 = vpop.f32.mrf.mxu3 }
 0x3ac   : > { %v7893_v56 = vadd.f32 %v2185_v57, %v7558_v60  ;;  %v8817_v60 = vld [vmem:[#allocation23_spill] sm:$0xff] }
 0x3ad   : > { %v2576_v57 = vadd.f32 %v8817_v60, %v7590_v17 }
 0x3ae   : > { %8812 = vst [vmem:[#allocation69_spill] sm:$0xff] %v7893_v56  ;;  %v7908_v56 = vpop.f32.mrf.mxu1 }
 0x3af   : > { %v2969_v13 = vadd.f32 %v8818_v32, %v2576_v57 }
 0x3b1   : > { %v3229_v61 = vadd.f32 %v7630_v51, %v2969_v13  ;;  %v7929_v51 = vld [vmem:[%s8558_s6] ss:$0 sm:$0xff] }
 0x3b3   : > { %v2187_v0 = vpop.f32.mrf.mxu3 }
 0x3b4   : > { %v7900_v20 = vadd.f32 %v2187_v0, %v7565_v27  ;;  %v8819_v0 = vld [vmem:[#allocation27_spill] sm:$0xff] }
 0x3b6   : > { %8814 = vst [vmem:[#allocation39_spill] sm:$0xff] %v7900_v20 }
 0x3b7   : > { %4255 = vmatmul.bf16.gmra.mxu1 %v7456_v53  ;;  %v2577_v53 = vadd.f32 %v8819_v0, %v7600_v23 }
 0x3b8   : > { %3562 = vmatmul.bf16.gmra.mxu3 %v8816_v22 }
 0x3b9   : > { %v2970_v22 = vadd.f32 %v8820_v47, %v2577_v53  ;;  %v8824_v53 = vld [vmem:[#allocation22_spill] sm:$0xff] }
 0x3bb   : > { %v3523_v48 = vpop.f32.mrf.mxu3 }
 0x3bc   : > { %v3613_v29 = vadd.f32 %v3523_v48, %v3228_v59  ;;  %v7921_v48 = vpop.f32.mrf.mxu1  ;;  %v3230_v59 = vadd.f32 %v7646_v41, %v2970_v22 }
 0x3be   : > { %v4006_v27 = vadd.f32 %v7665_v50, %v3613_v29  ;;  %v8821_v50 = vld [vmem:[#allocation50_spill] sm:$0xff] }
 0x3c0   : > { %v4266_v11 = vadd.f32 %v4176_v5, %v4006_v27  ;;  %v8822_v5 = vld [vmem:[#allocation28_spill] sm:$0xff] }
 0x3c1   : > { %v2578_v13 = vadd.f32 %v8822_v5, %v7614_v21  ;;  %v8823_v27 = vld [vmem:[#allocation88_spill] sm:$0xff] }
 0x3c2   : > { %v4305_v23 = vmul.f32 %v7918_v4, %v4266_v11 }
 0x3c3   : > { %v3525_v20 = vpop.f32.mrf.mxu3  ;;  %v2971_v0 = vadd.f32 %v8823_v27, %v2578_v13  ;;  %v8829_v27 = vld [vmem:[#allocation61_spill] sm:$0xff] }
 0x3c4   : > { %v3614_v17 = vadd.f32 %v3525_v20, %v3229_v61  ;;  %v8825_v61 = vld [vmem:[#allocation32_spill] sm:$0xff] }
 0x3c5   : > { %v2579_v11 = vadd.f32 %v8825_v61, %v8824_v53 }
 0x3c6   : > { %v4007_v20 = vadd.f32 %v7681_v33, %v3614_v17  ;;  %v3231_v17 = vadd.f32 %v7659_v38, %v2971_v0 }
 0x3c7   : > { %4260 = vmatmul.bf16.gmra.mxu1 %v7510_v54  ;;  %v4344_v54 = vadd.f32 %v7929_v51, %v4305_v23  ;;  %v8826_v23 = vld [vmem:[#allocation90_spill] sm:$0xff] }
 0x3c8   : > { %3567 = vmatmul.bf16.gmra.mxu3 %v8821_v50  ;;  %v4267_v29 = vadd.f32 %v7839_v35, %v4007_v20 }
 0x3c9   : > { %v4380_v21 = vmax.f32 %v4344_v54, 0.0 }
 0x3ca   : > { %v4306_v33 = vmul.f32 %v7918_v4, %v4267_v29 }
 0x3cb   : > { %v3528_v60 = vpop.f32.mrf.mxu3  ;;  %v4452_v5 = vrot.slane %v4380_v21, 2  ;;  %v4453_v13 = vrot.slane %v4380_v21, 4  ;;  %v4669_v53 = vsel %vm335_vm0, %v4380_v21, -inf }
 0x3cc   : > { %v3615_v57 = vadd.f32 %v3528_v60, %v3230_v59  ;;  %v4345_v20 = vadd.f32 %v7929_v51, %v4306_v33  ;;  %v8827_v60 = vld [vmem:[#allocation44_spill] sm:$0xff] }
 0x3cd   : > { %v4672_v61 = vsel %vm335_vm0, %v4452_v5, -inf  ;;  %v8830_v5 = vld [vmem:[#allocation95_spill] sm:$0xff] }
 0x3ce   : > { %v4008_v32 = vadd.f32 %v7696_v37, %v3615_v57  ;;  %v2972_v37 = vadd.f32 %v8826_v23, %v2579_v11  ;;  %v8828_v57 = vld [vmem:[#allocation35_spill] sm:$0xff]  ;;  %v4675_v11 = vsel %vm335_vm0, %v4453_v13, -inf }
 0x3cf   : > { %v2580_v54 = vadd.f32 %v8828_v57, %v8827_v60 }
 0x3d0   : > { %v4268_v47 = vadd.f32 %v7849_v46, %v4008_v32  ;;  %v3232_v0 = vadd.f32 %v7675_v42, %v2972_v37  ;;  %v4454_v37 = vrot.slane %v4380_v21, 6 }
 0x3d1   : > { %v2973_v57 = vadd.f32 %v8830_v5, %v2580_v54 }
 0x3d2   : > { %v4307_v41 = vmul.f32 %v7918_v4, %v4268_v47  ;;  %v4381_v47 = vmax.f32 %v4345_v20, 0.0 }
 0x3d3   : > { %v3530_v22 = vpop.f32.mrf.mxu3 }
 0x3d4   : > { %v4346_v50 = vadd.f32 %v7929_v51, %v4307_v41  ;;  %v3616_v35 = vadd.f32 %v3530_v22, %v3231_v17  ;;  %v4455_v13 = vrot.slane %v4381_v47, 2 }
 0x3d6   : > { %v7948_v59 = vmax.f32 %v4346_v50, 0.0  ;;  %v4009_v46 = vadd.f32 %v7707_v25, %v3616_v35 }
 0x3d8   : > { %v4458_v29 = vrot.slane %v7948_v59, 2  ;;  %v4459_v38 = vrot.slane %v7948_v59, 4  ;;  %v4460_v32 = vrot.slane %v7948_v59, 6  ;;  %3572 = vmatmul.bf16.gmra.mxu3 %v8829_v27  ;;  %v4269_v25 = vadd.f32 %v7854_v24, %v4009_v46  ;;  %v8831_v46 = vld [vmem:[#allocation16_spill] sm:$0xff] }
 0x3da   : > { %v4670_v33 = vsel %vm335_vm0, %v4458_v29, -inf  ;;  %v4673_v41 = vsel %vm335_vm0, %v4459_v38, -inf  ;;  %v4676_v17 = vsel %vm335_vm0, %v4460_v32, -inf  ;;  %v4308_v42 = vmul.f32 %v7918_v4, %v4269_v25  ;;  %v8832_v29 = vld [vmem:[#allocation38_spill] sm:$0xff] }
 0x3db   : > { %v4671_v22 = vmax.f32 %v4669_v53, %v4670_v33  ;;  %v4674_v50 = vmax.f32 %v4672_v61, %v4673_v41  ;;  %v4677_v35 = vmax.f32 %v4675_v11, %v4676_v17  ;;  %v3533_v23 = vpop.f32.mrf.mxu3  ;;  %v2581_v38 = vadd.f32 %v8832_v29, %v8831_v46 }
 0x3dc   : > { %v3617_v60 = vadd.f32 %v3533_v23, %v3232_v0  ;;  %v4347_v24 = vadd.f32 %v7929_v51, %v4308_v42  ;;  %v4456_v32 = vrot.slane %v4381_v47, 4  ;;  %v4678_v53 = vsel %vm335_vm0, %v4454_v37, -inf  ;;  %v8833_v0 = vld [vmem:[#allocation120_spill] sm:$0xff] }
 0x3dd   : > { %4957 = vst [vmem:[#allocation1] ss:$4 sm:$0xff] %v4671_v22  ;;  %v4457_v61 = vrot.slane %v4381_v47, 6  ;;  %v3233_v54 = vadd.f32 %v8833_v0, %v2973_v57  ;;  %v4684_v17 = vsel %vm335_vm0, %v4455_v13, -inf  ;;  %v8837_v0 = vld [vmem:[#allocation41_spill] sm:$0xff] }
 0x3de   : > { %4959 = vst [vmem:[#allocation1 + $0x1] ss:$4 sm:$0xff] %v4674_v50  ;;  %v4010_v20 = vadd.f32 %v7725_v44, %v3617_v60  ;;  %v4383_v27 = vmax.f32 %v4347_v24, 0.0  ;;  %v4681_v44 = vsel %vm335_vm0, %v4381_v47, -inf }
 0x3df   : > { %4961 = vst [vmem:[#allocation1 + $0x2] ss:$4 sm:$0xff] %v4677_v35  ;;  %v4687_v35 = vsel %vm335_vm0, %v4456_v32, -inf  ;;  %v4690_v32 = vsel %vm335_vm0, %v4457_v61, -inf }
 0x3e0   : > { %v4270_v21 = vadd.f32 %v7861_v1, %v4010_v20  ;;  %v4461_v11 = vrot.slane %v4383_v27, 2  ;;  %v4462_v25 = vrot.slane %v4383_v27, 4  ;;  %v4463_v33 = vrot.slane %v4383_v27, 6  ;;  %v8834_v20 = vld [vmem:[#allocation98_spill] sm:$0xff] }
 0x3e1   : > { %v4679_v41 = vsel %vm335_vm0, %v4383_v27, -inf  ;;  %v2974_v46 = vadd.f32 %v8834_v20, %v2581_v38 }
 0x3e2   : > { %v4680_v22 = vmax.f32 %v4678_v53, %v4679_v41  ;;  %v4309_v50 = vmul.f32 %v7918_v4, %v4270_v21  ;;  %v4682_v42 = vsel %vm335_vm0, %v4461_v11, -inf  ;;  %v4685_v1 = vsel %vm335_vm0, %v4462_v25, -inf  ;;  %v8835_v53 = vld [vmem:[#allocation65_spill] sm:$0xff]  ;;  %v8836_v21 = vld [vmem:[#allocation24_spill] sm:$0xff] }
 0x3e3   : > { %v4688_v23 = vsel %vm335_vm0, %v4463_v33, -inf  ;;  %v3535_v37 = vpop.f32.mrf.mxu3  ;;  %v4683_v60 = vmax.f32 %v4681_v44, %v4682_v42  ;;  %v4686_v5 = vmax.f32 %v4684_v17, %v4685_v1  ;;  %v2582_v11 = vadd.f32 %v8837_v0, %v8836_v21  ;;  %v7998_v44 = vpop.f32.mrf.mxu2 }
 0x3e4   : > { %v4689_v57 = vmax.f32 %v4687_v35, %v4688_v23  ;;  %4963 = vst [vmem:[#allocation1 + $0x3] ss:$4 sm:$0xff] %v4680_v22  ;;  %v4348_v47 = vadd.f32 %v7929_v51, %v4309_v50  ;;  %v3618_v13 = vadd.f32 %v3535_v37, %v3233_v54  ;;  %v4693_v54 = vsel %vm335_vm0, %v7948_v59, -inf  ;;  %v8838_v59 = vld [vmem:[#allocation101_spill] sm:$0xff]  ;;  %v8003_v23 = vpop.f32.mrf.mxu0  ;;  %v8840_v37 = vld [vmem:[#allocation46_spill] sm:$0xff] }
 0x3e5   : > { %4965 = vst [vmem:[#allocation1 + $0x20] ss:$4 sm:$0xff] %v4683_v60  ;;  %v3234_v41 = vadd.f32 %v7704_v39, %v2974_v46  ;;  %v2975_v1 = vadd.f32 %v8838_v59, %v2582_v11  ;;  %v8839_v39 = vld [vmem:[#allocation36_spill] sm:$0xff]  ;;  %v8842_v11 = vld [vmem:[#allocation42_spill] sm:$0xff] }
 0x3e6   : > { %v7983_v24 = vmax.f32 %v4348_v47, 0.0  ;;  %4967 = vst [vmem:[#allocation1 + $0x21] ss:$4 sm:$0xff] %v4686_v5  ;;  %v4011_v33 = vadd.f32 %v7738_v45, %v3618_v13  ;;  %v2583_v60 = vadd.f32 %v8840_v37, %v8839_v39  ;;  %v8008_v5 = vpop.f32.mrf.mxu1  ;;  %v8845_v39 = vld [vmem:[#allocation104_spill] sm:$0xff] }
 0x3e7   : > { %4969 = vst [vmem:[#allocation1 + $0x22] ss:$4 sm:$0xff] %v4689_v57 }
 0x3e8   : > { %v4464_v29 = vrot.slane %v7983_v24, 2  ;;  %v4691_v27 = vsel %vm335_vm0, %v7983_v24, -inf  ;;  %3577 = vmatmul.bf16.gmra.mxu3 %v8835_v53  ;;  %v4271_v35 = vadd.f32 %v7868_v40, %v4011_v33  ;;  %v3235_v40 = vadd.f32 %v7719_v7, %v2975_v1 }
 0x3e9   : > { %v4692_v25 = vmax.f32 %v4690_v32, %v4691_v27  ;;  %v4465_v27 = vrot.slane %v7983_v24, 4  ;;  %v4466_v1 = vrot.slane %v7983_v24, 6 }
 0x3ea   : > { %v4694_v38 = vsel %vm335_vm0, %v4464_v29, -inf  ;;  %v4310_v47 = vmul.f32 %v7918_v4, %v4271_v35 }
 0x3eb   : > { %v4972_v61 = vld.sshfl [vmem:[#allocation1] sm:$0xff pattern:$0x73625140]  ;;  %v4695_v17 = vmax.f32 %v4693_v54, %v4694_v38  ;;  %4971 = vst [vmem:[#allocation1 + $0x23] ss:$4 sm:$0xff] %v4692_v25  ;;  %v3538_v22 = vpop.f32.mrf.mxu3  ;;  %v8014_v29 = vpop.f32.mrf.mxu2  ;;  %v8843_v25 = vld [vmem:[#allocation52_spill] sm:$0xff] }
 0x3ec   : > { %5084 = vst [vmem:[#allocation3] sm:$0xff] %v4972_v61  ;;  %v3619_v50 = vadd.f32 %v3538_v22, %v3234_v41  ;;  %v4349_v53 = vadd.f32 %v7929_v51, %v4310_v47  ;;  %v2584_v7 = vadd.f32 %v8843_v25, %v8842_v11  ;;  %v8844_v38 = vld [vmem:[#allocation70_spill] sm:$0xff]  ;;  %v8026_v33 = vpop.f32.mrf.mxu0  ;;  %v4696_v61 = vsel %vm335_vm0, %v4465_v27, -inf  ;;  %v8846_v47 = vld [vmem:[#allocation55_spill] sm:$0xff] }
 0x3ed   : > { %4974 = vst [vmem:[#allocation1] ss:$4 sm:$0xff] %v4695_v17 }
 0x3ee   : > { %v4012_v42 = vadd.f32 %v7751_v19, %v3619_v50  ;;  %v4385_v17 = vmax.f32 %v4349_v53, 0.0  ;;  %v8033_v59 = vpop.f32.mrf.mxu1  ;;  %v2977_v37 = vadd.f32 %v8845_v39, %v2584_v7  ;;  %v8847_v39 = vld [vmem:[#allocation48_spill] sm:$0xff] }
 0x3f0   : > { %v4272_v45 = vadd.f32 %v7876_v58, %v4012_v42  ;;  %v8841_v58 = vld [vmem:[#allocation103_spill] sm:$0xff] }
 0x3f1   : > { %v2976_v32 = vadd.f32 %v8841_v58, %v2583_v60  ;;  %v4467_v60 = vrot.slane %v4385_v17, 2  ;;  %v3237_v58 = vadd.f32 %v7748_v26, %v2977_v37  ;;  %v8848_v37 = vld [vmem:[#allocation62_spill] sm:$0xff] }
 0x3f2   : > { %v4973_v57 = vld.sshfl [vmem:[#allocation1 + $0x20] sm:$0xff pattern:$0x73625140]  ;;  %v4311_v13 = vmul.f32 %v7918_v4, %v4272_v45 }
 0x3f3   : > { %5085 = vst [vmem:[#allocation3 + $0x8] sm:$0xff] %v4973_v57  ;;  %v3540_v19 = vpop.f32.mrf.mxu3  ;;  %v3236_v50 = vadd.f32 %v7730_v16, %v2976_v32  ;;  %v2585_v16 = vadd.f32 %v8846_v47, %v7701_v31  ;;  %v4705_v31 = vsel %vm335_vm0, %v4467_v60, -inf }
 0x3f4   : > { %v4350_v20 = vadd.f32 %v7929_v51, %v4311_v13  ;;  %v3620_v46 = vadd.f32 %v3540_v19, %v3235_v40  ;;  %v8041_v13 = vpop.f32.mrf.mxu2  ;;  %v4468_v40 = vrot.slane %v4385_v17, 4  ;;  %v8050_v7 = vpop.f32.mrf.mxu0 }
 0x3f6   : > { %v8019_v21 = vmax.f32 %v4350_v20, 0.0  ;;  %v4013_v0 = vadd.f32 %v7765_v3, %v3620_v46  ;;  %v4699_v20 = vsel %vm335_vm0, %v4466_v1, -inf  ;;  %v4469_v46 = vrot.slane %v4385_v17, 6 }
 0x3f8   : > { %v4472_v54 = vrot.slane %v8019_v21, 6  ;;  %3582 = vmatmul.bf16.gmra.mxu3 %v8844_v38  ;;  %v4273_v41 = vadd.f32 %v7883_v14, %v4013_v0  ;;  %v4711_v60 = vsel %vm335_vm0, %v4469_v46, -inf }
 0x3fa   : > { %v4697_v22 = vsel %vm335_vm0, %v4472_v54, -inf  ;;  %v4312_v3 = vmul.f32 %v7918_v4, %v4273_v41  ;;  %v4708_v54 = vsel %vm335_vm0, %v4468_v40, -inf }
 0x3fb   : > { %v4698_v35 = vmax.f32 %v4696_v61, %v4697_v22  ;;  %v3543_v42 = vpop.f32.mrf.mxu3 }
 0x3fc   : > { %v3621_v45 = vadd.f32 %v3543_v42, %v3236_v50  ;;  %v4351_v14 = vadd.f32 %v7929_v51, %v4312_v3  ;;  %v4471_v3 = vrot.slane %v8019_v21, 4  ;;  %v8059_v42 = vpop.f32.mrf.mxu1 }
 0x3fd   : > { %4976 = vst [vmem:[#allocation1 + $0x20] ss:$4 sm:$0xff] %v4698_v35  ;;  %v4470_v35 = vrot.slane %v8019_v21, 2 }
 0x3fe   : > { %v4014_v57 = vadd.f32 %v7781_v18, %v3621_v45  ;;  %v4387_v19 = vmax.f32 %v4351_v14, 0.0  ;;  %v4702_v18 = vsel %vm335_vm0, %v4385_v17, -inf  ;;  %v2586_v14 = vadd.f32 %v8848_v37, %v8847_v39 }
 0x400   : > { %v4274_v24 = vadd.f32 %v7890_v63, %v4014_v57  ;;  %v4473_v32 = vrot.slane %v4387_v19, 2  ;;  %v4474_v27 = vrot.slane %v4387_v19, 4  ;;  %v4475_v53 = vrot.slane %v4387_v19, 6  ;;  %v8849_v57 = vld [vmem:[#allocation106_spill] sm:$0xff] }
 0x401   : > { %v4700_v0 = vsel %vm335_vm0, %v4387_v19, -inf  ;;  %v2978_v47 = vadd.f32 %v8849_v57, %v2585_v16 }
 0x402   : > { %v4701_v11 = vmax.f32 %v4699_v20, %v4700_v0  ;;  %v4313_v25 = vmul.f32 %v7918_v4, %v4274_v24  ;;  %v4703_v63 = vsel %vm335_vm0, %v4473_v32, -inf  ;;  %v4706_v26 = vsel %vm335_vm0, %v4474_v27, -inf  ;;  %v8850_v32 = vld [vmem:[#allocation77_spill] sm:$0xff]  ;;  %v8067_v27 = vpop.f32.mrf.mxu2 }
 0x403   : > { %v4709_v38 = vsel %vm335_vm0, %v4475_v53, -inf  ;;  %v3545_v41 = vpop.f32.mrf.mxu3  ;;  %v4704_v61 = vmax.f32 %v4702_v18, %v4703_v63  ;;  %v4707_v22 = vmax.f32 %v4705_v31, %v4706_v26  ;;  %v4717_v53 = vsel %vm335_vm0, %v4470_v35, -inf }
 0x404   : > { %v4710_v50 = vmax.f32 %v4708_v54, %v4709_v38  ;;  %4977 = vst [vmem:[#allocation1 + $0x21] ss:$4 sm:$0xff] %v4701_v11  ;;  %v4352_v17 = vadd.f32 %v7929_v51, %v4313_v25  ;;  %v3622_v45 = vadd.f32 %v3545_v41, %v3237_v58  ;;  %v4714_v58 = vsel %vm335_vm0, %v8019_v21, -inf  ;;  %v8078_v38 = vpop.f32.mrf.mxu0  ;;  %v8082_v35 = vpop.f32.mrf.mxu1 }
 0x405   : > { %4978 = vst [vmem:[#allocation1 + $0x22] ss:$4 sm:$0xff] %v4704_v61  ;;  %v4720_v0 = vsel %vm335_vm0, %v4471_v3, -inf  ;;  %v3238_v26 = vadd.f32 %v7759_v10, %v2978_v47  ;;  %v8852_v3 = vld [vmem:[#allocation63_spill] sm:$0xff] }
 0x406   : > { %v4388_v1 = vmax.f32 %v4352_v17, 0.0  ;;  %4979 = vst [vmem:[#allocation1 + $0x23] ss:$4 sm:$0xff] %v4707_v22  ;;  %v4015_v11 = vadd.f32 %v7792_v62, %v3622_v45  ;;  %v2587_v10 = vadd.f32 %v8852_v3, %v7722_v43  ;;  %v8854_v43 = vld [vmem:[#allocation121_spill] sm:$0xff] }
 0x407   : > { %4981 = vst [vmem:[#allocation1] ss:$4 sm:$0xff] %v4710_v50  ;;  %v8851_v50 = vld [vmem:[#allocation108_spill] sm:$0xff] }
 0x408   : > { %v4476_v40 = vrot.slane %v4388_v1, 2  ;;  %v4477_v19 = vrot.slane %v4388_v1, 4  ;;  %v4478_v20 = vrot.slane %v4388_v1, 6  ;;  %v4712_v24 = vsel %vm335_vm0, %v4388_v1, -inf  ;;  %3587 = vmatmul.bf16.gmra.mxu3 %v8850_v32 }
 0x409   : > { %v4713_v46 = vmax.f32 %v4711_v60, %v4712_v24  ;;  %v4275_v22 = vadd.f32 %v7897_v8, %v4015_v11  ;;  %v2979_v17 = vadd.f32 %v8851_v50, %v2586_v14 }
 0x40a   : > { %v4715_v16 = vsel %vm335_vm0, %v4476_v40, -inf  ;;  %v4718_v18 = vsel %vm335_vm0, %v4477_v19, -inf  ;;  %v4721_v31 = vsel %vm335_vm0, %v4478_v20, -inf  ;;  %v8089_v39 = vpop.f32.mrf.mxu2  ;;  %v8855_v20 = vld [vmem:[#allocation66_spill] sm:$0xff] }
 0x40b   : > { %v4716_v25 = vmax.f32 %v4714_v58, %v4715_v16  ;;  %v4719_v54 = vmax.f32 %v4717_v53, %v4718_v18  ;;  %v4722_v63 = vmax.f32 %v4720_v0, %v4721_v31  ;;  %4982 = vst [vmem:[#allocation1 + $0x1] ss:$4 sm:$0xff] %v4713_v46  ;;  %v3548_v21 = vpop.f32.mrf.mxu3  ;;  %v4314_v1 = vmul.f32 %v7918_v4, %v4275_v22  ;;  %v8857_v16 = vld [vmem:[#allocation122_spill] sm:$0xff]  ;;  %v8858_v18 = vld [vmem:[#allocation68_spill] sm:$0xff] }
 0x40c   : > { %v3623_v41 = vadd.f32 %v3548_v21, %v3238_v26  ;;  %v3239_v45 = vadd.f32 %v7774_v52, %v2979_v17  ;;  %v8095_v19 = vpop.f32.mrf.mxu0  ;;  %v2588_v24 = vadd.f32 %v8855_v20, %v8854_v43  ;;  %v8856_v52 = vld [vmem:[#allocation86_spill] sm:$0xff]  ;;  %v8102_v53 = vpop.f32.mrf.mxu1  ;;  %v2589_v31 = vadd.f32 %v8858_v18, %v8857_v16  ;;  %v8860_v17 = vld [vmem:[#allocation113_spill] sm:$0xff] }
 0x40d   : > { %4983 = vst [vmem:[#allocation1 + $0x2] ss:$4 sm:$0xff] %v4716_v25  ;;  %v4980_v61 = vld.sshfl [vmem:[#allocation1 + $0x20] sm:$0xff pattern:$0x73625140]  ;;  %v4353_v57 = vadd.f32 %v7929_v51, %v4314_v1  ;;  %v8859_v25 = vld [vmem:[#allocation112_spill] sm:$0xff] }
 0x40e   : > { %4984 = vst [vmem:[#allocation1 + $0x3] ss:$4 sm:$0xff] %v4719_v54  ;;  %v4016_v62 = vadd.f32 %v7806_v28, %v3623_v41  ;;  %v8853_v28 = vld [vmem:[#allocation110_spill] sm:$0xff]  ;;  %v2981_v54 = vadd.f32 %v8859_v25, %v2588_v24 }
 0x40f   : > { %5087 = vst [vmem:[#allocation3 + $0x18] sm:$0xff] %v4980_v61  ;;  %v2980_v40 = vadd.f32 %v8853_v28, %v2587_v10 }
 0x410   : > { %4985 = vst [vmem:[#allocation1 + $0x20] ss:$4 sm:$0xff] %v4722_v63  ;;  %v4276_v14 = vadd.f32 %v7908_v56, %v4016_v62  ;;  %v4389_v56 = vmax.f32 %v4353_v57, 0.0  ;;  %v3241_v50 = vadd.f32 %v8014_v29, %v2981_v54  ;;  %v2982_v62 = vadd.f32 %v8860_v17, %v2589_v31 }
 0x411   : > { %v3240_v0 = vadd.f32 %v7998_v44, %v2980_v40 }
 0x412   : > { %v4315_v32 = vmul.f32 %v7918_v4, %v4276_v14  ;;  %v8109_v63 = vpop.f32.mrf.mxu2  ;;  %v4479_v21 = vrot.slane %v4389_v56, 2  ;;  %v4480_v61 = vrot.slane %v4389_v56, 4  ;;  %v3242_v25 = vadd.f32 %v8041_v13, %v2982_v62 }
 0x413   : > { %v3550_v37 = vpop.f32.mrf.mxu3 }
 0x414   : > { %v3624_v60 = vadd.f32 %v3550_v37, %v3239_v45  ;;  %v4354_v26 = vadd.f32 %v7929_v51, %v4315_v32  ;;  %v8119_v3 = vpop.f32.mrf.mxu0  ;;  %v4729_v29 = vsel %vm335_vm0, %v4480_v61, -inf  ;;  %v8131_v40 = vpop.f32.mrf.mxu1 }
 0x415   : > { %v4986_v8 = vld.sshfl [vmem:[#allocation1] sm:$0xff pattern:$0x73625140] }
 0x416   : > { %5088 = vst [vmem:[#allocation3 + $0x20] sm:$0xff] %v4986_v8  ;;  %v4017_v47 = vadd.f32 %v7818_v9, %v3624_v60  ;;  %v4390_v10 = vmax.f32 %v4354_v26, 0.0  ;;  %v4481_v60 = vrot.slane %v4389_v56, 6  ;;  %v4726_v8 = vsel %vm335_vm0, %v4479_v21, -inf }
 0x418   : > { %3592 = vmatmul.bf16.gmra.mxu3 %v8856_v52  ;;  %v4277_v58 = vadd.f32 %v7921_v48, %v4017_v47  ;;  %v4482_v32 = vrot.slane %v4390_v10, 2  ;;  %v4732_v31 = vsel %vm335_vm0, %v4481_v60, -inf  ;;  %v4735_v61 = vsel %vm335_vm0, %v4390_v10, -inf }
 0x41a   : > { %v4316_v9 = vmul.f32 %v7918_v4, %v4277_v58  ;;  %v8136_v18 = vpop.f32.mrf.mxu2 }
 0x41b   : > { %v3553_v46 = vpop.f32.mrf.mxu3 }
 0x41c   : > { %v3625_v11 = vadd.f32 %v3553_v46, %v3240_v0  ;;  %v4355_v48 = vadd.f32 %v7929_v51, %v4316_v9  ;;  %v8861_v9 = vld [vmem:[#allocation124_spill] sm:$0xff]  ;;  %v8862_v46 = vld [vmem:[#allocation71_spill] sm:$0xff] }
 0x41d   : > { %v2590_v16 = vadd.f32 %v8862_v46, %v8861_v9 }
 0x41e   : > { %v4018_v41 = vadd.f32 %v8003_v23, %v3625_v11  ;;  %v8114_v44 = vmax.f32 %v4355_v48, 0.0  ;;  %v4723_v23 = vsel %vm335_vm0, %v4389_v56, -inf  ;;  %v4483_v56 = vrot.slane %v4390_v10, 4 }
 0x420   : > { %v4278_v22 = vadd.f32 %v8008_v5, %v4018_v41  ;;  %v4485_v1 = vrot.slane %v8114_v44, 2  ;;  %v4486_v45 = vrot.slane %v8114_v44, 4  ;;  %v4487_v37 = vrot.slane %v8114_v44, 6  ;;  %v8863_v41 = vld [vmem:[#allocation93_spill] sm:$0xff] }
 0x422   : > { %v4317_v5 = vmul.f32 %v7918_v4, %v4278_v22  ;;  %v4724_v14 = vsel %vm335_vm0, %v4485_v1, -inf  ;;  %v4727_v57 = vsel %vm335_vm0, %v4486_v45, -inf  ;;  %v4730_v47 = vsel %vm335_vm0, %v4487_v37, -inf  ;;  %v8150_v45 = vpop.f32.mrf.mxu0 }
 0x423   : > { %v3555_v28 = vpop.f32.mrf.mxu3  ;;  %v4725_v43 = vmax.f32 %v4723_v23, %v4724_v14  ;;  %v4728_v20 = vmax.f32 %v4726_v8, %v4727_v57  ;;  %v4731_v24 = vmax.f32 %v4729_v29, %v4730_v47  ;;  %v4738_v22 = vsel %vm335_vm0, %v4482_v32, -inf  ;;  %v8154_v57 = vpop.f32.mrf.mxu1  ;;  %v8864_v47 = vld [vmem:[#allocation115_spill] sm:$0xff] }
 0x424   : > { %v4356_v52 = vadd.f32 %v7929_v51, %v4317_v5  ;;  %v3626_v58 = vadd.f32 %v3555_v28, %v3241_v50  ;;  %v4741_v1 = vsel %vm335_vm0, %v4483_v56, -inf  ;;  %v4484_v29 = vrot.slane %v4390_v10, 6 }
 0x425   : > { %4988 = vst [vmem:[#allocation1] ss:$4 sm:$0xff] %v4725_v43  ;;  %v2983_v28 = vadd.f32 %v8864_v47, %v2590_v16  ;;  %v4747_v16 = vsel %vm335_vm0, %v8114_v44, -inf  ;;  %v8867_v44 = vld [vmem:[#allocation99_spill] sm:$0xff] }
 0x426   : > { %v4392_v0 = vmax.f32 %v4356_v52, 0.0  ;;  %4989 = vst [vmem:[#allocation1 + $0x1] ss:$4 sm:$0xff] %v4728_v20  ;;  %v4019_v11 = vadd.f32 %v8026_v33, %v3626_v58  ;;  %v8159_v20 = vpop.f32.mrf.mxu2  ;;  %v4744_v52 = vsel %vm335_vm0, %v4484_v29, -inf  ;;  %v8865_v58 = vld [vmem:[#allocation73_spill] sm:$0xff]  ;;  %v8870_v29 = vld [vmem:[#allocation56_spill] sm:$0xff] }
 0x427   : > { %4990 = vst [vmem:[#allocation1 + $0x2] ss:$4 sm:$0xff] %v4731_v24  ;;  %v2591_v56 = vadd.f32 %v8865_v58, %v7768_v30  ;;  %v3243_v46 = vadd.f32 %v8067_v27, %v2983_v28  ;;  %v3300_v27 = vld [vmem:[#allocation2 + $0xa0] sm:$0x3] }
 0x428   : > { %v4488_v54 = vrot.slane %v4392_v0, 2  ;;  %v4489_v26 = vrot.slane %v4392_v0, 4  ;;  %v4490_v48 = vrot.slane %v4392_v0, 6  ;;  %v4733_v21 = vsel %vm335_vm0, %v4392_v0, -inf  ;;  %3597 = vmatmul.bf16.gmra.mxu3 %v8863_v41 }
 0x429   : > { %v4734_v50 = vmax.f32 %v4732_v31, %v4733_v21  ;;  %v4279_v17 = vadd.f32 %v8033_v59, %v4019_v11 }
 0x42a   : > { %v4736_v33 = vsel %vm335_vm0, %v4488_v54, -inf  ;;  %v4739_v13 = vsel %vm335_vm0, %v4489_v26, -inf  ;;  %v4742_v62 = vsel %vm335_vm0, %v4490_v48, -inf  ;;  %v8172_v26 = vpop.f32.mrf.mxu0  ;;  %v8866_v48 = vld [vmem:[#allocation117_spill] sm:$0xff] }
 0x42b   : > { %v4737_v37 = vmax.f32 %v4735_v61, %v4736_v33  ;;  %v4740_v60 = vmax.f32 %v4738_v22, %v4739_v13  ;;  %v4743_v23 = vmax.f32 %v4741_v1, %v4742_v62  ;;  %4991 = vst [vmem:[#allocation1 + $0x3] ss:$4 sm:$0xff] %v4734_v50  ;;  %v4318_v8 = vmul.f32 %v7918_v4, %v4279_v17  ;;  %v3558_v5 = vpop.f32.mrf.mxu3  ;;  %v8177_v41 = vpop.f32.mrf.mxu1  ;;  %v8868_v50 = vld [vmem:[#allocation78_spill] sm:$0xff] }
 0x42c   : > { %v3627_v14 = vadd.f32 %v3558_v5, %v3242_v25  ;;  %v2984_v21 = vadd.f32 %v8866_v48, %v2591_v56  ;;  %v2592_v17 = vadd.f32 %v8868_v50, %v7778_v34 }
 0x42d   : > { %4992 = vst [vmem:[#allocation1 + $0x20] ss:$4 sm:$0xff] %v4737_v37  ;;  %v4357_v59 = vadd.f32 %v7929_v51, %v4318_v8  ;;  %v8869_v8 = vld [vmem:[#allocation119_spill] sm:$0xff] }
 0x42e   : > { %4993 = vst [vmem:[#allocation1 + $0x21] ss:$4 sm:$0xff] %v4740_v60  ;;  %v4020_v32 = vadd.f32 %v8050_v7, %v3627_v14  ;;  %v3244_v1 = vadd.f32 %v8089_v39, %v2984_v21  ;;  %v8185_v33 = vpop.f32.mrf.mxu2  ;;  %v2985_v5 = vadd.f32 %v8869_v8, %v2592_v17  ;;  %v8871_v39 = vld [vmem:[#allocation81_spill] sm:$0xff] }
 0x42f   : > { %4994 = vst [vmem:[#allocation1 + $0x22] ss:$4 sm:$0xff] %v4743_v23  ;;  %v8157_v43 = vmax.f32 %v4357_v59, 0.0  ;;  %v2593_v59 = vadd.f32 %v8871_v39, %v8870_v29 }
 0x430   : > { %v4280_v7 = vadd.f32 %v8059_v42, %v4020_v32  ;;  %v3391_v42 = vunpack.c.l.b16 %v3300_v27  ;;  %v3245_v58 = vadd.f32 %v8109_v63, %v2985_v5  ;;  %v8873_v27 = vld [vmem:[#allocation97_spill] sm:$0xff] }
 0x431   : > { %v4491_v24 = vrot.slane %v8157_v43, 2  ;;  %v4745_v10 = vsel %vm335_vm0, %v8157_v43, -inf  ;;  %v4492_v47 = vrot.slane %v8157_v43, 4 }
 0x432   : > { %v4996_v0 = vld.sshfl [vmem:[#allocation1] sm:$0xff pattern:$0x73625140]  ;;  %v4746_v9 = vmax.f32 %v4744_v52, %v4745_v10  ;;  %v4319_v61 = vmul.f32 %v7918_v4, %v4280_v7  ;;  %v3410_v34 = vpack.c.b16 %v3391_v42, %v3391_v42  ;;  %v8194_v14 = vpop.f32.mrf.mxu0 }
 0x433   : > { %5090 = vst [vmem:[#allocation3 + $0x30] sm:$0xff] %v4996_v0  ;;  %v4748_v31 = vsel %vm335_vm0, %v4491_v24, -inf  ;;  %v3560_v11 = vpop.f32.mrf.mxu3  ;;  %v8201_v32 = vpop.f32.mrf.mxu1  ;;  %v4493_v0 = vrot.slane %v8157_v43, 6 }
 0x434   : > { %v4749_v25 = vmax.f32 %v4747_v16, %v4748_v31  ;;  %4995 = vst [vmem:[#allocation1 + $0x23] ss:$4 sm:$0xff] %v4746_v9  ;;  %v3628_v54 = vadd.f32 %v3560_v11, %v3243_v46  ;;  %v4358_v60 = vadd.f32 %v7929_v51, %v4319_v61  ;;  %v3446_v56 = vrot.slane %v3410_v34, 2  ;;  %v8872_v31 = vld [vmem:[#allocation15_spill] sm:$0xff] }
 0x435   : > { %v4750_v9 = vsel %vm335_vm0, %v4492_v47, -inf  ;;  %v2986_v11 = vadd.f32 %v8872_v31, %v2593_v59  ;;  %v4753_v43 = vsel %vm335_vm0, %v4493_v0, -inf  ;;  %v8875_v59 = vld [vmem:[#allocation74_spill] sm:$0xff]  ;;  %v8876_v47 = vld [vmem:[#allocation87_spill] sm:$0xff] }
 0x436   : > { %4998 = vst [vmem:[#allocation1] ss:$4 sm:$0xff] %v4749_v25  ;;  %v4021_v30 = vadd.f32 %v8078_v38, %v3628_v54  ;;  %v4394_v52 = vmax.f32 %v4358_v60, 0.0  ;;  %v8210_v7 = vpop.f32.mrf.mxu2 }
 0x438   : > { %3602 = vmatmul.bf16.gmra.mxu3 %v8867_v44  ;;  %v4281_v22 = vadd.f32 %v8082_v35, %v4021_v30  ;;  %v4494_v30 = vrot.slane %v4394_v52, 2  ;;  %v4495_v48 = vrot.slane %v4394_v52, 4  ;;  %v8874_v44 = vrot.slane %v8873_v27, 2 }
 0x43a   : > { %v4320_v13 = vmul.f32 %v7918_v4, %v4281_v22  ;;  %v3447_v61 = vsel %vm3025_vm1, %v8874_v44, %v3446_v56  ;;  %v3246_v22 = vadd.f32 %v8136_v18, %v2986_v11  ;;  %v4762_v60 = vsel %vm335_vm0, %v4495_v48, -inf  ;;  %v8877_v11 = vld [vmem:[#allocation43_spill] sm:$0xff] }
 0x43b   : > { %v4997_v38 = vld.sshfl [vmem:[#allocation1 + $0x20] sm:$0xff pattern:$0x73625140]  ;;  %v3563_v62 = vpop.f32.mrf.mxu3  ;;  %v8878_v48 = vld [vmem:[#allocation91_spill] sm:$0xff] }
 0x43c   : > { %5091 = vst [vmem:[#allocation3 + $0x38] sm:$0xff] %v4997_v38  ;;  %v3629_v37 = vadd.f32 %v3563_v62, %v3244_v1  ;;  %v4359_v23 = vadd.f32 %v7929_v51, %v4320_v13  ;;  %v8219_v38 = vpop.f32.mrf.mxu0  ;;  %v4756_v13 = vsel %vm335_vm0, %v4394_v52, -inf }
 0x43e   : > { %v4022_v35 = vadd.f32 %v8095_v19, %v3629_v37  ;;  %v8197_v28 = vmax.f32 %v4359_v23, 0.0  ;;  %v8235_v0 = vpop.f32.mrf.mxu2 }
 0x440   : > { %v4282_v24 = vadd.f32 %v8102_v53, %v4022_v35  ;;  %v4499_v10 = vrot.slane %v8197_v28, 6  ;;  %v4497_v56 = vrot.slane %v8197_v28, 2 }
 0x442   : > { %v4321_v19 = vmul.f32 %v7918_v4, %v4282_v24  ;;  %v4751_v46 = vsel %vm335_vm0, %v4499_v10, -inf  ;;  %v2594_v24 = vadd.f32 %v8876_v47, %v8875_v59  ;;  %v8231_v10 = vpop.f32.mrf.mxu1 }
 0x443   : > { %v3565_v16 = vpop.f32.mrf.mxu3  ;;  %v4752_v53 = vmax.f32 %v4750_v9, %v4751_v46  ;;  %v4498_v9 = vrot.slane %v8197_v28, 4 }
 0x444   : > { %v4360_v25 = vadd.f32 %v7929_v51, %v4321_v19  ;;  %v3630_v54 = vadd.f32 %v3565_v16, %v3245_v58  ;;  %v8247_v44 = vpop.f32.mrf.mxu0 }
 0x445   : > { %5000 = vst [vmem:[#allocation1 + $0x20] ss:$4 sm:$0xff] %v4752_v53  ;;  %v2987_v53 = vadd.f32 %v8877_v11, %v2594_v24 }
 0x446   : > { %v4396_v63 = vmax.f32 %v4360_v25, 0.0  ;;  %v4023_v21 = vadd.f32 %v8119_v3, %v3630_v54  ;;  %v4759_v3 = vsel %vm335_vm0, %v4494_v30, -inf }
 0x448   : > { %v4500_v50 = vrot.slane %v4396_v63, 2  ;;  %v4501_v17 = vrot.slane %v4396_v63, 4  ;;  %v4502_v1 = vrot.slane %v4396_v63, 6  ;;  %v4754_v42 = vsel %vm335_vm0, %v4396_v63, -inf  ;;  %3607 = vmatmul.bf16.gmra.mxu3 %v3447_v61 }
 0x449   : > { %v4755_v62 = vmax.f32 %v4753_v43, %v4754_v42  ;;  %v4283_v37 = vadd.f32 %v8131_v40, %v4023_v21  ;;  %v4496_v40 = vrot.slane %v4394_v52, 6  ;;  %v2595_v63 = vadd.f32 %v8878_v48, %v7811_v55 }
 0x44a   : > { %v4757_v23 = vsel %vm335_vm0, %v4500_v50, -inf  ;;  %v4760_v18 = vsel %vm335_vm0, %v4501_v17, -inf  ;;  %v4763_v35 = vsel %vm335_vm0, %v4502_v1, -inf  ;;  %v4768_v21 = vsel %vm335_vm0, %v8197_v28, -inf }
 0x44b   : > { %v4758_v8 = vmax.f32 %v4756_v13, %v4757_v23  ;;  %v4761_v5 = vmax.f32 %v4759_v3, %v4760_v18  ;;  %v4764_v34 = vmax.f32 %v4762_v60, %v4763_v35  ;;  %5001 = vst [vmem:[#allocation1 + $0x21] ss:$4 sm:$0xff] %v4755_v62  ;;  %v4322_v29 = vmul.f32 %v7918_v4, %v4283_v37  ;;  %v3568_v39 = vpop.f32.mrf.mxu3  ;;  %v8255_v62 = vpop.f32.mrf.mxu1  ;;  %v8879_v60 = vld [vmem:[#allocation26_spill] sm:$0xff] }
 0x44c   : > { %v3631_v19 = vadd.f32 %v3568_v39, %v3246_v22  ;;  %v4765_v16 = vsel %vm335_vm0, %v4496_v40, -inf  ;;  %v4771_v43 = vsel %vm335_vm0, %v4497_v56, -inf  ;;  %v3247_v28 = vadd.f32 %v8159_v20, %v2987_v53  ;;  %v8259_v18 = vpop.f32.mrf.mxu2  ;;  %v5124_v39 = vld [vmem:[#allocation3 + $0x1] ss:$2 sm:$0xff]  ;;  %v8266_v24 = vpop.f32.mrf.mxu0  ;;  %v8881_v56 = vld [vmem:[#allocation18_spill] sm:$0xff] }
 0x44d   : > { %5002 = vst [vmem:[#allocation1 + $0x22] ss:$4 sm:$0xff] %v4758_v8  ;;  %v4361_v58 = vadd.f32 %v7929_v51, %v4322_v29  ;;  %v2988_v23 = vadd.f32 %v8879_v60, %v2595_v63  ;;  %v8880_v8 = vld [vmem:[#allocation96_spill] sm:$0xff] }
 0x44e   : > { %5003 = vst [vmem:[#allocation1 + $0x23] ss:$4 sm:$0xff] %v4761_v5  ;;  %v4024_v31 = vadd.f32 %v8150_v45, %v3631_v19  ;;  %v4774_v45 = vsel %vm335_vm0, %v4498_v9, -inf  ;;  %v2596_v20 = vadd.f32 %v8880_v8, %v7815_v49 }
 0x44f   : > { %5005 = vst [vmem:[#allocation1] ss:$4 sm:$0xff] %v4764_v34  ;;  %v4397_v46 = vmax.f32 %v4361_v58, 0.0  ;;  %v5108_v34 = vld [vmem:[#allocation3] ss:$2 sm:$0xff] }
 0x450   : > { %v4284_v3 = vadd.f32 %v8154_v57, %v4024_v31  ;;  %v3248_v57 = vadd.f32 %v8185_v33, %v2988_v23  ;;  %v5139_v47 = vmax.f32 %v5108_v34, %v5124_v39  ;;  %v2989_v9 = vadd.f32 %v8881_v56, %v2596_v20 }
 0x451   : > { %v4503_v52 = vrot.slane %v4397_v46, 2  ;;  %v4504_v25 = vrot.slane %v4397_v46, 4  ;;  %v4505_v54 = vrot.slane %v4397_v46, 6  ;;  %v4766_v30 = vsel %vm335_vm0, %v4397_v46, -inf }
 0x452   : > { %v4767_v27 = vmax.f32 %v4765_v16, %v4766_v30  ;;  %v4323_v35 = vmul.f32 %v7918_v4, %v4284_v3  ;;  %5147 = vst [vmem:[%s8272_s19] sm:$0xff] %v5139_v47  ;;  %v3249_v11 = vadd.f32 %v8210_v7, %v2989_v9  ;;  %v8883_v30 = vld [vmem:[#allocation29_spill] sm:$0xff] }
 0x453   : > { %v4769_v61 = vsel %vm335_vm0, %v4503_v52, -inf  ;;  %v4772_v22 = vsel %vm335_vm0, %v4504_v25, -inf  ;;  %v4775_v50 = vsel %vm335_vm0, %v4505_v54, -inf  ;;  %v3570_v17 = vpop.f32.mrf.mxu3  ;;  %v8277_v46 = vpop.f32.mrf.mxu1  ;;  %v8886_v47 = vld [vmem:[#allocation105_spill] sm:$0xff] }
 0x454   : > { %v4770_v1 = vmax.f32 %v4768_v21, %v4769_v61  ;;  %v4773_v55 = vmax.f32 %v4771_v43, %v4772_v22  ;;  %v4776_v42 = vmax.f32 %v4774_v45, %v4775_v50  ;;  %5006 = vst [vmem:[#allocation1 + $0x1] ss:$4 sm:$0xff] %v4767_v27  ;;  %v3632_v37 = vadd.f32 %v3570_v17, %v3247_v28  ;;  %v8283_v53 = vpop.f32.mrf.mxu2  ;;  %v8884_v27 = vld [vmem:[#allocation102_spill] sm:$0xff]  ;;  %v8293_v7 = vpop.f32.mrf.mxu0 }
 0x455   : > { %v5004_v13 = vld.sshfl [vmem:[#allocation1 + $0x20] sm:$0xff pattern:$0x73625140]  ;;  %v4362_v40 = vadd.f32 %v7929_v51, %v4323_v35  ;;  %v2598_v45 = vadd.f32 %v8884_v27, %v7830_v6 }
 0x456   : > { %5093 = vst [vmem:[#allocation3 + $0x48] sm:$0xff] %v5004_v13  ;;  %v4025_v5 = vadd.f32 %v8172_v26, %v3632_v37  ;;  %v8882_v26 = vld [vmem:[#allocation100_spill] sm:$0xff] }
 0x457   : > { %5007 = vst [vmem:[#allocation1 + $0x2] ss:$4 sm:$0xff] %v4770_v1  ;;  %v2597_v33 = vadd.f32 %v8882_v26, %v7825_v12  ;;  %v4398_v31 = vmax.f32 %v4362_v40, 0.0  ;;  %v2599_v40 = vadd.f32 %v8886_v47, %v7837_v36 }
 0x458   : > { %5008 = vst [vmem:[#allocation1 + $0x3] ss:$4 sm:$0xff] %v4773_v55  ;;  %v4285_v19 = vadd.f32 %v8177_v41, %v4025_v5 }
 0x459   : > { %5009 = vst [vmem:[#allocation1 + $0x20] ss:$4 sm:$0xff] %v4776_v42  ;;  %v2990_v12 = vadd.f32 %v8883_v30, %v2597_v33  ;;  %v4506_v48 = vrot.slane %v4398_v31, 2  ;;  %v4507_v63 = vrot.slane %v4398_v31, 4  ;;  %v4777_v1 = vsel %vm335_vm0, %v4398_v31, -inf }
 0x45a   : > { %v4324_v41 = vmul.f32 %v7918_v4, %v4285_v19  ;;  %v4508_v20 = vrot.slane %v4398_v31, 6 }
 0x45b   : > { %v3573_v29 = vpop.f32.mrf.mxu3  ;;  %v3250_v17 = vadd.f32 %v8235_v0, %v2990_v12  ;;  %v4780_v55 = vsel %vm335_vm0, %v4506_v48, -inf  ;;  %v4783_v42 = vsel %vm335_vm0, %v4507_v63, -inf  ;;  %v8303_v28 = vpop.f32.mrf.mxu1 }
 0x45c   : > { %v3633_v59 = vadd.f32 %v3573_v29, %v3248_v57  ;;  %v4363_v21 = vadd.f32 %v7929_v51, %v4324_v41  ;;  %v8885_v57 = vld [vmem:[#allocation34_spill] sm:$0xff]  ;;  %v4786_v56 = vsel %vm335_vm0, %v4508_v20, -inf  ;;  %v8319_v26 = vpop.f32.mrf.mxu0 }
 0x45d   : > { %v2991_v34 = vadd.f32 %v8885_v57, %v2598_v45 }
 0x45e   : > { %v4026_v58 = vadd.f32 %v8194_v14, %v3633_v59  ;;  %v4399_v6 = vmax.f32 %v4363_v21, 0.0  ;;  %v8337_v21 = vld [vmem:[%s8558_s6] ss:$0 sm:$0xff] }
 0x45f   : > { %v5010_v49 = vld.sshfl [vmem:[#allocation1] sm:$0xff pattern:$0x73625140] }
 0x460   : > { %5094 = vst [vmem:[#allocation3 + $0x50] sm:$0xff] %v5010_v49  ;;  %v4286_v16 = vadd.f32 %v8201_v32, %v4026_v58  ;;  %v4509_v39 = vrot.slane %v4399_v6, 2  ;;  %v4510_v19 = vrot.slane %v4399_v6, 4  ;;  %v4511_v58 = vrot.slane %v4399_v6, 6 }
 0x461   : > { %v3251_v49 = vadd.f32 %v8259_v18, %v2991_v34  ;;  %v4789_v31 = vsel %vm335_vm0, %v4399_v6, -inf }
 0x462   : > { %v4325_v14 = vmul.f32 %v7918_v4, %v4286_v16  ;;  %v4792_v36 = vsel %vm335_vm0, %v4509_v39, -inf  ;;  %v4795_v18 = vsel %vm335_vm0, %v4510_v19, -inf }
 0x463   : > { %v3575_v52 = vpop.f32.mrf.mxu3  ;;  %v4238_v30 = vpop.f32.mrf.mxu1 }
 0x464   : > { %v4364_v25 = vadd.f32 %v7929_v51, %v4325_v14  ;;  %v3634_v54 = vadd.f32 %v3575_v52, %v3249_v11  ;;  %v8327_v14 = vld [vmem:[%s8557_s5] ss:$0 sm:$0xff] }
 0x466   : > { %v8288_v32 = vmax.f32 %v4364_v25, 0.0  ;;  %v4027_v43 = vadd.f32 %v8219_v38, %v3634_v54 }
 0x468   : > { %v4512_v61 = vrot.slane %v8288_v32, 2  ;;  %v4513_v22 = vrot.slane %v8288_v32, 4  ;;  %v4514_v50 = vrot.slane %v8288_v32, 6  ;;  %v4287_v38 = vadd.f32 %v8231_v10, %v4027_v43  ;;  %v8310_v10 = vpop.f32.mrf.mxu2 }
 0x46a   : > { %v4778_v13 = vsel %vm335_vm0, %v4512_v61, -inf  ;;  %v4781_v3 = vsel %vm335_vm0, %v4513_v22, -inf  ;;  %v4784_v37 = vsel %vm335_vm0, %v4514_v50, -inf  ;;  %v4326_v35 = vmul.f32 %v7918_v4, %v4287_v38  ;;  %v8887_v61 = vld [vmem:[#allocation40_spill] sm:$0xff] }
 0x46b   : > { %v4779_v60 = vmax.f32 %v4777_v1, %v4778_v13  ;;  %v4782_v23 = vmax.f32 %v4780_v55, %v4781_v3  ;;  %v4785_v0 = vmax.f32 %v4783_v42, %v4784_v37  ;;  %v3578_v8 = vpop.f32.mrf.mxu3  ;;  %v2992_v22 = vadd.f32 %v8887_v61, %v2599_v40  ;;  %v8888_v42 = vld [vmem:[#allocation107_spill] sm:$0xff]  ;;  %v4241_v34 = vpop.f32.mrf.mxu1  ;;  %v8894_v61 = vld [vmem:[#allocation37_spill] sm:$0xff] }
 0x46c   : > { %v3635_v5 = vadd.f32 %v3578_v8, %v3250_v17  ;;  %v4365_v29 = vadd.f32 %v7929_v51, %v4326_v35  ;;  %v4798_v1 = vsel %vm335_vm0, %v4511_v58, -inf  ;;  %v2600_v38 = vadd.f32 %v8888_v42, %v7842_v2  ;;  %v5126_v2 = vld [vmem:[#allocation3 + $0x19] ss:$2 sm:$0xff] }
 0x46d   : > { %5012 = vst [vmem:[#allocation1] ss:$4 sm:$0xff] %v4779_v60  ;;  %v4801_v13 = vsel %vm335_vm0, %v8288_v32, -inf  ;;  %v3252_v60 = vadd.f32 %v8283_v53, %v2992_v22  ;;  %v8896_v42 = vld [vmem:[#allocation114_spill] sm:$0xff] }
 0x46e   : > { %5013 = vst [vmem:[#allocation1 + $0x1] ss:$4 sm:$0xff] %v4782_v23  ;;  %v4028_v59 = vadd.f32 %v8247_v44, %v3635_v5  ;;  %v4401_v4 = vmax.f32 %v4365_v29, 0.0  ;;  %v3981_v23 = vpop.f32.mrf.mxu0  ;;  %v5110_v5 = vld [vmem:[#allocation3 + $0x18] ss:$2 sm:$0xff] }
 0x46f   : > { %5014 = vst [vmem:[#allocation1 + $0x2] ss:$4 sm:$0xff] %v4785_v0  ;;  %v5140_v57 = vmax.f32 %v5110_v5, %v5126_v2 }
 0x470   : > { %v4288_v9 = vadd.f32 %v8255_v62, %v4028_v59  ;;  %v4515_v51 = vrot.slane %v4401_v4, 2  ;;  %v4516_v33 = vrot.slane %v4401_v4, 4  ;;  %v4517_v16 = vrot.slane %v4401_v4, 6  ;;  %v3203_v50 = vpop.f32.mrf.mxu2  ;;  %v8890_v59 = vld [vmem:[#allocation109_spill] sm:$0xff] }
 0x471   : > { %v4787_v44 = vsel %vm335_vm0, %v4401_v4, -inf  ;;  %5148 = vst [vmem:[%s8272_s19 + $0x8] sm:$0xff] %v5140_v57  ;;  %v2601_v47 = vadd.f32 %v8890_v59, %v7847_v15 }
 0x472   : > { %v4788_v41 = vmax.f32 %v4786_v56, %v4787_v44  ;;  %v4327_v62 = vmul.f32 %v8327_v14, %v4288_v9  ;;  %v4790_v11 = vsel %vm335_vm0, %v4515_v51, -inf  ;;  %v4793_v52 = vsel %vm335_vm0, %v4516_v33, -inf  ;;  %v8891_v51 = vld [vmem:[#allocation54_spill] sm:$0xff] }
 0x473   : > { %v4796_v25 = vsel %vm335_vm0, %v4517_v16, -inf  ;;  %v3580_v54 = vpop.f32.mrf.mxu3  ;;  %v4791_v12 = vmax.f32 %v4789_v31, %v4790_v11  ;;  %v4794_v48 = vmax.f32 %v4792_v36, %v4793_v52  ;;  %v8892_v31 = vld [vmem:[#allocation82_spill] sm:$0xff]  ;;  %v8893_v36 = vld [vmem:[#allocation111_spill] sm:$0xff] }
 0x474   : > { %v4797_v63 = vmax.f32 %v4795_v18, %v4796_v25  ;;  %5015 = vst [vmem:[#allocation1 + $0x3] ss:$4 sm:$0xff] %v4788_v41  ;;  %v4366_v43 = vadd.f32 %v8337_v21, %v4327_v62  ;;  %v3636_v45 = vadd.f32 %v3580_v54, %v3251_v49  ;;  %v8375_v41 = vpop.f32.mrf.mxu1 }
 0x475   : > { %5016 = vst [vmem:[#allocation1 + $0x20] ss:$4 sm:$0xff] %v4791_v12 }
 0x476   : > { %v8340_v27 = vmax.f32 %v4366_v43, 0.0  ;;  %5017 = vst [vmem:[#allocation1 + $0x21] ss:$4 sm:$0xff] %v4794_v48  ;;  %v4029_v37 = vadd.f32 %v8266_v24, %v3636_v45  ;;  %v8889_v24 = vld [vmem:[#allocation31_spill] sm:$0xff]  ;;  %v8365_v49 = vpop.f32.mrf.mxu0 }
 0x477   : > { %5018 = vst [vmem:[#allocation1 + $0x22] ss:$4 sm:$0xff] %v4797_v63  ;;  %v2993_v39 = vadd.f32 %v8889_v24, %v2600_v38 }
 0x478   : > { %v4518_v17 = vrot.slane %v8340_v27, 2  ;;  %v4799_v55 = vsel %vm335_vm0, %v8340_v27, -inf  ;;  %v4289_v32 = vadd.f32 %v8277_v46, %v4029_v37  ;;  %v3205_v40 = vpop.f32.mrf.mxu2  ;;  %v4519_v33 = vrot.slane %v8340_v27, 4 }
 0x479   : > { %v4800_v6 = vmax.f32 %v4798_v1, %v4799_v55  ;;  %v3253_v56 = vadd.f32 %v8310_v10, %v2993_v39  ;;  %v2602_v10 = vadd.f32 %v8893_v36, %v8892_v31  ;;  %v4520_v43 = vrot.slane %v8340_v27, 6  ;;  %v8895_v55 = vld [vmem:[#allocation49_spill] sm:$0xff] }
 0x47a   : > { %v4802_v3 = vsel %vm335_vm0, %v4518_v17, -inf  ;;  %v4328_v4 = vmul.f32 %v8327_v14, %v4289_v32  ;;  %v4804_v11 = vsel %vm335_vm0, %v4519_v33, -inf  ;;  %v2603_v38 = vadd.f32 %v8896_v42, %v8895_v55 }
 0x47b   : > { %v5020_v0 = vld.sshfl [vmem:[#allocation1] sm:$0xff pattern:$0x73625140]  ;;  %v4803_v35 = vmax.f32 %v4801_v13, %v4802_v3  ;;  %5019 = vst [vmem:[#allocation1 + $0x23] ss:$4 sm:$0xff] %v4800_v6  ;;  %v3583_v8 = vpop.f32.mrf.mxu3  ;;  %v2995_v22 = vadd.f32 %v8894_v61, %v2602_v10  ;;  %v4807_v37 = vsel %vm335_vm0, %v4520_v43, -inf }
 0x47c   : > { %5096 = vst [vmem:[#allocation3 + $0x60] sm:$0xff] %v5020_v0  ;;  %v3637_v20 = vadd.f32 %v3583_v8, %v3252_v60  ;;  %v4367_v15 = vadd.f32 %v8337_v21, %v4328_v4  ;;  %v8392_v5 = vpop.f32.mrf.mxu1 }
 0x47d   : > { %5022 = vst [vmem:[#allocation1] ss:$4 sm:$0xff] %v4803_v35  ;;  %v3255_v27 = vadd.f32 %v3205_v40, %v2995_v22 }
 0x47e   : > { %v4030_v29 = vadd.f32 %v8293_v7, %v3637_v20  ;;  %v4403_v52 = vmax.f32 %v4367_v15, 0.0  ;;  %v8899_v15 = vld [vmem:[#allocation45_spill] sm:$0xff] }
 0x480   : > { %v4290_v53 = vadd.f32 %v8303_v28, %v4030_v29  ;;  %v2994_v28 = vadd.f32 %v8891_v51, %v2601_v47  ;;  %v8380_v12 = vpop.f32.mrf.mxu2  ;;  %v4521_v17 = vrot.slane %v4403_v52, 2  ;;  %v4522_v6 = vrot.slane %v4403_v52, 4  ;;  %v8898_v51 = vld [vmem:[#allocation116_spill] sm:$0xff] }
 0x481   : > { %v4523_v3 = vrot.slane %v4403_v52, 6 }
 0x482   : > { %v5021_v19 = vld.sshfl [vmem:[#allocation1 + $0x20] sm:$0xff pattern:$0x73625140]  ;;  %v4329_v58 = vmul.f32 %v8327_v14, %v4290_v53  ;;  %v3254_v54 = vadd.f32 %v3203_v50, %v2994_v28  ;;  %v8388_v50 = vpop.f32.mrf.mxu0  ;;  %v4813_v2 = vsel %vm335_vm0, %v4521_v17, -inf  ;;  %v4816_v29 = vsel %vm335_vm0, %v4522_v6, -inf }
 0x483   : > { %5097 = vst [vmem:[#allocation3 + $0x68] sm:$0xff] %v5021_v19  ;;  %v3585_v46 = vpop.f32.mrf.mxu3  ;;  %v4819_v33 = vsel %vm335_vm0, %v4523_v3, -inf  ;;  %v8901_v3 = vld [vmem:[#allocation58_spill] sm:$0xff] }
 0x484   : > { %v4368_v7 = vadd.f32 %v8337_v21, %v4329_v58  ;;  %v3638_v9 = vadd.f32 %v3585_v46, %v3253_v56  ;;  %v4248_v17 = vpop.f32.mrf.mxu1 }
 0x486   : > { %v8370_v16 = vmax.f32 %v4368_v7, 0.0  ;;  %v4031_v44 = vadd.f32 %v8319_v26, %v3638_v9  ;;  %v8897_v9 = vld [vmem:[#allocation89_spill] sm:$0xff] }
 0x487   : > { %v2604_v28 = vadd.f32 %v8898_v51, %v8897_v9 }
 0x488   : > { %v4526_v62 = vrot.slane %v8370_v16, 6  ;;  %v4291_v18 = vadd.f32 %v4238_v30, %v4031_v44  ;;  %v3210_v4 = vpop.f32.mrf.mxu2  ;;  %v4524_v58 = vrot.slane %v8370_v16, 2  ;;  %v4525_v56 = vrot.slane %v8370_v16, 4 }
 0x489   : > { %v2996_v44 = vadd.f32 %v8899_v15, %v2603_v38  ;;  %v8900_v38 = vld [vmem:[#allocation123_spill] sm:$0xff] }
 0x48a   : > { %v4805_v25 = vsel %vm335_vm0, %v4526_v62, -inf  ;;  %v4330_v63 = vmul.f32 %v8327_v14, %v4291_v18  ;;  %v3988_v18 = vpop.f32.mrf.mxu0  ;;  %v2997_v6 = vadd.f32 %v8900_v38, %v2604_v28  ;;  %v8908_v28 = vld [vmem:[#allocation67_spill] sm:$0xff] }
 0x48b   : > { %v4806_v48 = vmax.f32 %v4804_v11, %v4805_v25  ;;  %v3588_v26 = vpop.f32.mrf.mxu3  ;;  %v4822_v11 = vsel %vm335_vm0, %v8370_v16, -inf  ;;  %v4828_v25 = vsel %vm335_vm0, %v4525_v56, -inf }
 0x48c   : > { %v3639_v45 = vadd.f32 %v3588_v26, %v3254_v54  ;;  %v4369_v30 = vadd.f32 %v8337_v21, %v4330_v63 }
 0x48d   : > { %5024 = vst [vmem:[#allocation1 + $0x20] ss:$4 sm:$0xff] %v4806_v48 }
 0x48e   : > { %v4032_v1 = vadd.f32 %v3981_v23, %v3639_v45  ;;  %v4405_v13 = vmax.f32 %v4369_v30, 0.0  ;;  %v4810_v23 = vsel %vm335_vm0, %v4403_v52, -inf  ;;  %v4825_v52 = vsel %vm335_vm0, %v4524_v58, -inf }
 0x48f   : > { %v3256_v30 = vadd.f32 %v8380_v12, %v2996_v44 }
 0x490   : > { %v4292_v60 = vadd.f32 %v4241_v34, %v4032_v1  ;;  %v4527_v0 = vrot.slane %v4405_v13, 2  ;;  %v4528_v35 = vrot.slane %v4405_v13, 4  ;;  %v4529_v8 = vrot.slane %v4405_v13, 6 }
 0x491   : > { %v4808_v20 = vsel %vm335_vm0, %v4405_v13, -inf  ;;  %v3213_v13 = vpop.f32.mrf.mxu2 }
 0x492   : > { %v4809_v57 = vmax.f32 %v4807_v37, %v4808_v20  ;;  %v4331_v32 = vmul.f32 %v8327_v14, %v4292_v60  ;;  %v4811_v24 = vsel %vm335_vm0, %v4527_v0, -inf  ;;  %v4814_v34 = vsel %vm335_vm0, %v4528_v35, -inf  ;;  %v8902_v37 = vld [vmem:[#allocation118_spill] sm:$0xff] }
 0x493   : > { %v4817_v39 = vsel %vm335_vm0, %v4529_v8, -inf  ;;  %v3590_v53 = vpop.f32.mrf.mxu3  ;;  %v4812_v59 = vmax.f32 %v4810_v23, %v4811_v24  ;;  %v4815_v47 = vmax.f32 %v4813_v2, %v4814_v34  ;;  %v2605_v60 = vadd.f32 %v8902_v37, %v8901_v3  ;;  %v5112_v0 = vld [vmem:[#allocation3 + $0x30] ss:$2 sm:$0xff]  ;;  %v5128_v35 = vld [vmem:[#allocation3 + $0x31] ss:$2 sm:$0xff]  ;;  %v3991_v8 = vpop.f32.mrf.mxu0  ;;  %v8903_v24 = vld [vmem:[#allocation51_spill] sm:$0xff] }
 0x494   : > { %v4818_v40 = vmax.f32 %v4816_v29, %v4817_v39  ;;  %5025 = vst [vmem:[#allocation1 + $0x21] ss:$4 sm:$0xff] %v4809_v57  ;;  %v4370_v19 = vadd.f32 %v8337_v21, %v4331_v32  ;;  %v3640_v7 = vadd.f32 %v3590_v53, %v3255_v27  ;;  %v3257_v27 = vadd.f32 %v3210_v4, %v2997_v6  ;;  %v4251_v32 = vpop.f32.mrf.mxu1  ;;  %v8904_v39 = vld [vmem:[#allocation94_spill] sm:$0xff]  ;;  %v8905_v53 = vld [vmem:[#allocation17_spill] sm:$0xff] }
 0x495   : > { %5026 = vst [vmem:[#allocation1 + $0x22] ss:$4 sm:$0xff] %v4812_v59  ;;  %v5141_v23 = vmax.f32 %v5112_v0, %v5128_v35  ;;  %v2998_v34 = vadd.f32 %v8903_v24, %v2605_v60  ;;  %v2606_v59 = vadd.f32 %v8905_v53, %v8904_v39  ;;  %v8910_v35 = vld [vmem:[#allocation33_spill] sm:$0xff] }
 0x496   : > { %v4406_v46 = vmax.f32 %v4370_v19, 0.0  ;;  %5027 = vst [vmem:[#allocation1 + $0x23] ss:$4 sm:$0xff] %v4815_v47  ;;  %v4033_v43 = vadd.f32 %v8365_v49, %v3640_v7  ;;  %v8907_v7 = vld [vmem:[#allocation30_spill] sm:$0xff] }
 0x497   : > { %5029 = vst [vmem:[#allocation1] ss:$4 sm:$0xff] %v4818_v40  ;;  %v3258_v58 = vadd.f32 %v3213_v13, %v2998_v34 }
 0x498   : > { %v4530_v31 = vrot.slane %v4406_v46, 2  ;;  %v4531_v36 = vrot.slane %v4406_v46, 4  ;;  %v4532_v10 = vrot.slane %v4406_v46, 6  ;;  %v4820_v62 = vsel %vm335_vm0, %v4406_v46, -inf  ;;  %5149 = vst [vmem:[%s8272_s19 + $0x10] sm:$0xff] %v5141_v23  ;;  %v8906_v46 = vld [vmem:[#allocation64_spill] sm:$0xff] }
 0x499   : > { %v4821_v54 = vmax.f32 %v4819_v33, %v4820_v62  ;;  %v4293_v42 = vadd.f32 %v8375_v41, %v4033_v43  ;;  %v3215_v47 = vpop.f32.mrf.mxu2  ;;  %v2607_v9 = vadd.f32 %v8907_v7, %v8906_v46  ;;  %v2999_v33 = vadd.f32 %v8908_v28, %v2606_v59 }
 0x49a   : > { %v4823_v48 = vsel %vm335_vm0, %v4530_v31, -inf  ;;  %v4826_v63 = vsel %vm335_vm0, %v4531_v36, -inf  ;;  %v4829_v26 = vsel %vm335_vm0, %v4532_v10, -inf }
 0x49b   : > { %v4824_v45 = vmax.f32 %v4822_v11, %v4823_v48  ;;  %v4827_v61 = vmax.f32 %v4825_v52, %v4826_v63  ;;  %v4830_v22 = vmax.f32 %v4828_v25, %v4829_v26  ;;  %5030 = vst [vmem:[#allocation1 + $0x1] ss:$4 sm:$0xff] %v4821_v54  ;;  %v3593_v16 = vpop.f32.mrf.mxu3  ;;  %v4332_v12 = vmul.f32 %v8327_v14, %v4293_v42  ;;  %v3993_v15 = vpop.f32.mrf.mxu0  ;;  %v8909_v54 = vld [vmem:[#allocation72_spill] sm:$0xff] }
 0x49c   : > { %v3641_v1 = vadd.f32 %v3593_v16, %v3256_v30  ;;  %v4253_v11 = vpop.f32.mrf.mxu1  ;;  %v3259_v25 = vadd.f32 %v3215_v47, %v2999_v33  ;;  %v3000_v48 = vadd.f32 %v8909_v54, %v2607_v9  ;;  %v8913_v54 = vld [vmem:[#allocation69_spill] sm:$0xff] }
 0x49d   : > { %5031 = vst [vmem:[#allocation1 + $0x2] ss:$4 sm:$0xff] %v4824_v45  ;;  %v5028_v55 = vld.sshfl [vmem:[#allocation1 + $0x20] sm:$0xff pattern:$0x73625140] }
 0x49e   : > { %5032 = vst [vmem:[#allocation1 + $0x3] ss:$4 sm:$0xff] %v4827_v61  ;;  %v4034_v49 = vadd.f32 %v8388_v50, %v3641_v1  ;;  %v4371_v50 = vadd.f32 %v8337_v21, %v4332_v12 }
 0x49f   : > { %5099 = vst [vmem:[#allocation3 + $0x78] sm:$0xff] %v5028_v55 }
 0x4a0   : > { %5033 = vst [vmem:[#allocation1 + $0x20] ss:$4 sm:$0xff] %v4830_v22  ;;  %v4294_v57 = vadd.f32 %v8392_v5, %v4034_v49  ;;  %v4407_v4 = vmax.f32 %v4371_v50, 0.0 }
 0x4a2   : > { %v4333_v40 = vmul.f32 %v8327_v14, %v4294_v57  ;;  %v4533_v36 = vrot.slane %v4407_v4, 2  ;;  %v4534_v62 = vrot.slane %v4407_v4, 4  ;;  %v4535_v61 = vrot.slane %v4407_v4, 6 }
 0x4a3   : > { %v3595_v20 = vpop.f32.mrf.mxu3  ;;  %v4831_v22 = vsel %vm335_vm0, %v4407_v4, -inf  ;;  %v3996_v23 = vpop.f32.mrf.mxu0 }
 0x4a4   : > { %v3642_v41 = vadd.f32 %v3595_v20, %v3257_v27  ;;  %v4372_v44 = vadd.f32 %v8337_v21, %v4333_v40  ;;  %v4834_v30 = vsel %vm335_vm0, %v4533_v36, -inf  ;;  %v4837_v1 = vsel %vm335_vm0, %v4534_v62, -inf  ;;  %v4256_v47 = vpop.f32.mrf.mxu1 }
 0x4a5   : > { %v5034_v2 = vld.sshfl [vmem:[#allocation1] sm:$0xff pattern:$0x73625140] }
 0x4a6   : > { %5100 = vst [vmem:[#allocation3 + $0x80] sm:$0xff] %v5034_v2  ;;  %v4035_v29 = vadd.f32 %v3988_v18, %v3642_v41  ;;  %v4408_v63 = vmax.f32 %v4372_v44, 0.0  ;;  %v4840_v41 = vsel %vm335_vm0, %v4535_v61, -inf  ;;  %v8912_v44 = vld [vmem:[#allocation84_spill] sm:$0xff] }
 0x4a8   : > { %v4295_v19 = vadd.f32 %v4248_v17, %v4035_v29  ;;  %v3218_v17 = vpop.f32.mrf.mxu2  ;;  %v4536_v60 = vrot.slane %v4408_v63, 2  ;;  %v4537_v27 = vrot.slane %v4408_v63, 4  ;;  %v4843_v34 = vsel %vm335_vm0, %v4408_v63, -inf }
 0x4a9   : > { %v3260_v57 = vadd.f32 %v3218_v17, %v3000_v48  ;;  %v4538_v28 = vrot.slane %v4408_v63, 6  ;;  %v8914_v48 = vld [vmem:[#allocation19_spill] sm:$0xff] }
 0x4aa   : > { %v4334_v56 = vmul.f32 %v8327_v14, %v4295_v19  ;;  %v4846_v39 = vsel %vm335_vm0, %v4536_v60, -inf  ;;  %v4849_v40 = vsel %vm335_vm0, %v4537_v27, -inf  ;;  %v2609_v63 = vadd.f32 %v8914_v48, %v8913_v54  ;;  %v8917_v27 = vld [vmem:[#allocation25_spill] sm:$0xff] }
 0x4ab   : > { %v3598_v5 = vpop.f32.mrf.mxu3 }
 0x4ac   : > { %v3643_v51 = vadd.f32 %v3598_v5, %v3258_v58  ;;  %v4373_v31 = vadd.f32 %v8337_v21, %v4334_v56 }
 0x4ad   : > { %v5134_v54 = vld [vmem:[#allocation3 + $0x79] ss:$2 sm:$0xff] }
 0x4ae   : > { %v4036_v10 = vadd.f32 %v3991_v8, %v3643_v51  ;;  %v8437_v18 = vmax.f32 %v4373_v31, 0.0  ;;  %v8911_v8 = vld [vmem:[#allocation21_spill] sm:$0xff] }
 0x4af   : > { %v2608_v20 = vadd.f32 %v8911_v8, %v8910_v35 }
 0x4b0   : > { %v4296_v52 = vadd.f32 %v4251_v32, %v4036_v10  ;;  %v4539_v26 = vrot.slane %v8437_v18, 2  ;;  %v4540_v43 = vrot.slane %v8437_v18, 4  ;;  %v4541_v45 = vrot.slane %v8437_v18, 6  ;;  %v3220_v51 = vpop.f32.mrf.mxu2  ;;  %v3998_v10 = vpop.f32.mrf.mxu0 }
 0x4b1   : > { %v3001_v31 = vadd.f32 %v8912_v44, %v2608_v20 }
 0x4b2   : > { %v4335_v16 = vmul.f32 %v8327_v14, %v4296_v52  ;;  %v4832_v55 = vsel %vm335_vm0, %v4539_v26, -inf  ;;  %v4835_v42 = vsel %vm335_vm0, %v4540_v43, -inf  ;;  %v4838_v38 = vsel %vm335_vm0, %v4541_v45, -inf }
 0x4b3   : > { %v3600_v6 = vpop.f32.mrf.mxu3  ;;  %v4833_v13 = vmax.f32 %v4831_v22, %v4832_v55  ;;  %v4836_v49 = vmax.f32 %v4834_v30, %v4835_v42  ;;  %v4839_v3 = vmax.f32 %v4837_v1, %v4838_v38  ;;  %v3261_v43 = vadd.f32 %v3220_v51, %v3001_v31  ;;  %v4258_v30 = vpop.f32.mrf.mxu1  ;;  %v5114_v42 = vld [vmem:[#allocation3 + $0x48] ss:$2 sm:$0xff]  ;;  %v5130_v38 = vld [vmem:[#allocation3 + $0x49] ss:$2 sm:$0xff]  ;;  %v5118_v31 = vld [vmem:[#allocation3 + $0x78] ss:$2 sm:$0xff] }
 0x4b4   : > { %v4374_v37 = vadd.f32 %v8337_v21, %v4335_v16  ;;  %v3644_v12 = vadd.f32 %v3600_v6, %v3259_v25  ;;  %v4855_v45 = vsel %vm335_vm0, %v8437_v18, -inf }
 0x4b5   : > { %5036 = vst [vmem:[#allocation1] ss:$4 sm:$0xff] %v4833_v13  ;;  %v8915_v13 = vld [vmem:[#allocation57_spill] sm:$0xff] }
 0x4b6   : > { %v4410_v0 = vmax.f32 %v4374_v37, 0.0  ;;  %5037 = vst [vmem:[#allocation1 + $0x1] ss:$4 sm:$0xff] %v4836_v49  ;;  %v4037_v2 = vadd.f32 %v3993_v15, %v3644_v12  ;;  %v3002_v49 = vadd.f32 %v8915_v13, %v2609_v63  ;;  %v8916_v12 = vld [vmem:[#allocation39_spill] sm:$0xff] }
 0x4b7   : > { %5038 = vst [vmem:[#allocation1 + $0x2] ss:$4 sm:$0xff] %v4839_v3  ;;  %v5142_v3 = vmax.f32 %v5114_v42, %v5130_v38 }
 0x4b8   : > { %v4542_v32 = vrot.slane %v4410_v0, 2  ;;  %v4543_v50 = vrot.slane %v4410_v0, 4  ;;  %v4544_v29 = vrot.slane %v4410_v0, 6  ;;  %v4841_v24 = vsel %vm335_vm0, %v4410_v0, -inf  ;;  %v3223_v37 = vpop.f32.mrf.mxu2  ;;  %v4001_v8 = vpop.f32.mrf.mxu0 }
 0x4b9   : > { %v4842_v53 = vmax.f32 %v4840_v41, %v4841_v24  ;;  %v4297_v59 = vadd.f32 %v4253_v11, %v4037_v2  ;;  %v4852_v11 = vsel %vm335_vm0, %v4538_v28, -inf  ;;  %5150 = vst [vmem:[%s8272_s19 + $0x18] sm:$0xff] %v5142_v3  ;;  %v2610_v0 = vadd.f32 %v8917_v27, %v8916_v12  ;;  %v8918_v24 = vld [vmem:[#allocation79_spill] sm:$0xff] }
 0x4ba   : > { %v4844_v19 = vsel %vm335_vm0, %v4542_v32, -inf  ;;  %v4847_v4 = vsel %vm335_vm0, %v4543_v50, -inf  ;;  %v4850_v58 = vsel %vm335_vm0, %v4544_v29, -inf  ;;  %v3262_v35 = vadd.f32 %v3223_v37, %v3002_v49 }
 0x4bb   : > { %v4845_v56 = vmax.f32 %v4843_v34, %v4844_v19  ;;  %v4848_v5 = vmax.f32 %v4846_v39, %v4847_v4  ;;  %v4851_v46 = vmax.f32 %v4849_v40, %v4850_v58  ;;  %5039 = vst [vmem:[#allocation1 + $0x3] ss:$4 sm:$0xff] %v4842_v53  ;;  %v4336_v7 = vmul.f32 %v8327_v14, %v4297_v59  ;;  %v3603_v9 = vpop.f32.mrf.mxu3  ;;  %v4261_v50 = vpop.f32.mrf.mxu1 }
 0x4bc   : > { %v3645_v15 = vadd.f32 %v3603_v9, %v3260_v57  ;;  %v3003_v34 = vadd.f32 %v8918_v24, %v2610_v0 }
 0x4bd   : > { %5040 = vst [vmem:[#allocation1 + $0x20] ss:$4 sm:$0xff] %v4845_v56  ;;  %v4375_v33 = vadd.f32 %v8337_v21, %v4336_v7 }
 0x4be   : > { %5041 = vst [vmem:[#allocation1 + $0x21] ss:$4 sm:$0xff] %v4848_v5  ;;  %v4038_v25 = vadd.f32 %v3996_v23, %v3645_v15 }
 0x4bf   : > { %5042 = vst [vmem:[#allocation1 + $0x22] ss:$4 sm:$0xff] %v4851_v46  ;;  %v8464_v36 = vmax.f32 %v4375_v33, 0.0  ;;  %v5116_v33 = vld [vmem:[#allocation3 + $0x60] ss:$2 sm:$0xff] }
 0x4c0   : > { %v4298_v55 = vadd.f32 %v4256_v47, %v4038_v25  ;;  %v3225_v47 = vpop.f32.mrf.mxu2  ;;  %v4003_v15 = vpop.f32.mrf.mxu0 }
 0x4c1   : > { %v4545_v62 = vrot.slane %v8464_v36, 2  ;;  %v4853_v52 = vsel %vm335_vm0, %v8464_v36, -inf  ;;  %v4546_v39 = vrot.slane %v8464_v36, 4  ;;  %v3263_v58 = vadd.f32 %v3225_v47, %v3003_v34 }
 0x4c2   : > { %v4854_v26 = vmax.f32 %v4852_v11, %v4853_v52  ;;  %v5044_v1 = vld.sshfl [vmem:[#allocation1] sm:$0xff pattern:$0x73625140]  ;;  %v4337_v18 = vmul.f32 %v8327_v14, %v4298_v55  ;;  %v4547_v56 = vrot.slane %v8464_v36, 6  ;;  %v5132_v52 = vld [vmem:[#allocation3 + $0x61] ss:$2 sm:$0xff]  ;;  %v5144_v55 = vmax.f32 %v5118_v31, %v5134_v54 }
 0x4c3   : > { %v4856_v61 = vsel %vm335_vm0, %v4545_v62, -inf  ;;  %v3605_v22 = vpop.f32.mrf.mxu3  ;;  %5102 = vst [vmem:[#allocation3 + $0x90] sm:$0xff] %v5044_v1  ;;  %v4858_v5 = vsel %vm335_vm0, %v4546_v39, -inf  ;;  %v5143_v48 = vmax.f32 %v5116_v33, %v5132_v52  ;;  %v4263_v63 = vpop.f32.mrf.mxu1 }
 0x4c4   : > { %v4857_v16 = vmax.f32 %v4855_v45, %v4856_v61  ;;  %5043 = vst [vmem:[#allocation1 + $0x23] ss:$4 sm:$0xff] %v4854_v26  ;;  %v3646_v17 = vadd.f32 %v3605_v22, %v3261_v43  ;;  %v4376_v57 = vadd.f32 %v8337_v21, %v4337_v18  ;;  %v4861_v25 = vsel %vm335_vm0, %v4547_v56, -inf }
 0x4c5   : > { %5151 = vst [vmem:[%s8272_s19 + $0x20] sm:$0xff] %v5143_v48 }
 0x4c6   : > { %v4039_v6 = vadd.f32 %v3998_v10, %v3646_v17  ;;  %5046 = vst [vmem:[#allocation1] ss:$4 sm:$0xff] %v4857_v16  ;;  %v4412_v40 = vmax.f32 %v4376_v57, 0.0 }
 0x4c7   : > { %5152 = vst [vmem:[%s8272_s19 + $0x28] sm:$0xff] %v5144_v55 }
 0x4c8   : > { %v4299_v60 = vadd.f32 %v4258_v30, %v4039_v6  ;;  %v4548_v44 = vrot.slane %v4412_v40, 2  ;;  %v4549_v10 = vrot.slane %v4412_v40, 4  ;;  %v4864_v36 = vsel %vm335_vm0, %v4412_v40, -inf }
 0x4ca   : > { %v4338_v20 = vmul.f32 %v8327_v14, %v4299_v60  ;;  %v4867_v22 = vsel %vm335_vm0, %v4548_v44, -inf  ;;  %v4870_v42 = vsel %vm335_vm0, %v4549_v10, -inf  ;;  %v4550_v60 = vrot.slane %v4412_v40, 6 }
 0x4cb   : > { %v3608_v23 = vpop.f32.mrf.mxu3  ;;  %v5045_v41 = vld.sshfl [vmem:[#allocation1 + $0x20] sm:$0xff pattern:$0x73625140] }
 0x4cc   : > { %v3647_v2 = vadd.f32 %v3608_v23, %v3262_v35  ;;  %5103 = vst [vmem:[#allocation3 + $0x98] sm:$0xff] %v5045_v41  ;;  %v4377_v32 = vadd.f32 %v8337_v21, %v4338_v20  ;;  %v4873_v20 = vsel %vm335_vm0, %v4550_v60, -inf }
 0x4ce   : > { %v4040_v29 = vadd.f32 %v4001_v8, %v3647_v2  ;;  %v8485_v53 = vmax.f32 %v4377_v32, 0.0 }
 0x4d0   : > { %v4300_v59 = vadd.f32 %v4261_v50, %v4040_v29  ;;  %v4553_v19 = vrot.slane %v8485_v53, 6  ;;  %v4551_v0 = vrot.slane %v8485_v53, 2  ;;  %v4552_v35 = vrot.slane %v8485_v53, 4 }
 0x4d1   : > { %v4876_v57 = vsel %vm335_vm0, %v8485_v53, -inf }
 0x4d2   : > { %v4339_v4 = vmul.f32 %v8327_v14, %v4300_v59  ;;  %v4859_v46 = vsel %vm335_vm0, %v4553_v19, -inf  ;;  %v4882_v50 = vsel %vm335_vm0, %v4552_v35, -inf }
 0x4d3   : > { %v3610_v7 = vpop.f32.mrf.mxu3  ;;  %v4860_v9 = vmax.f32 %v4858_v5, %v4859_v46  ;;  %v5120_v17 = vld [vmem:[#allocation3 + $0x90] ss:$2 sm:$0xff]  ;;  %v5136_v1 = vld [vmem:[#allocation3 + $0x91] ss:$2 sm:$0xff] }
 0x4d4   : > { %v4378_v51 = vadd.f32 %v8337_v21, %v4339_v4  ;;  %v3648_v28 = vadd.f32 %v3610_v7, %v3263_v58  ;;  %v5145_v12 = vmax.f32 %v5120_v17, %v5136_v1 }
 0x4d5   : > { %5048 = vst [vmem:[#allocation1 + $0x20] ss:$4 sm:$0xff] %v4860_v9 }
 0x4d6   : > { %v4414_v62 = vmax.f32 %v4378_v51, 0.0  ;;  %v4041_v11 = vadd.f32 %v4003_v15, %v3648_v28  ;;  %5153 = vst [vmem:[%s8272_s19 + $0x30] sm:$0xff] %v5145_v12 }
 0x4d8   : > { %v4554_v26 = vrot.slane %v4414_v62, 2  ;;  %v4555_v43 = vrot.slane %v4414_v62, 4  ;;  %v4556_v45 = vrot.slane %v4414_v62, 6  ;;  %v4862_v61 = vsel %vm335_vm0, %v4414_v62, -inf }
 0x4d9   : > { %v4863_v30 = vmax.f32 %v4861_v25, %v4862_v61  ;;  %v4301_v16 = vadd.f32 %v4263_v63, %v4041_v11 }
 0x4da   : > { %v4865_v38 = vsel %vm335_vm0, %v4554_v26, -inf  ;;  %v4868_v6 = vsel %vm335_vm0, %v4555_v43, -inf  ;;  %v4871_v13 = vsel %vm335_vm0, %v4556_v45, -inf }
 0x4db   : > { %v4866_v49 = vmax.f32 %v4864_v36, %v4865_v38  ;;  %v4869_v3 = vmax.f32 %v4867_v22, %v4868_v6  ;;  %v4872_v37 = vmax.f32 %v4870_v42, %v4871_v13  ;;  %v4340_v18 = vmul.f32 %v8327_v14, %v4301_v16  ;;  %5049 = vst [vmem:[#allocation1 + $0x21] ss:$4 sm:$0xff] %v4863_v30 }
 0x4dd   : > { %v4379_v27 = vadd.f32 %v8337_v21, %v4340_v18  ;;  %5050 = vst [vmem:[#allocation1 + $0x22] ss:$4 sm:$0xff] %v4866_v49  ;;  %v4879_v21 = vsel %vm335_vm0, %v4551_v0, -inf }
 0x4de   : > { %5051 = vst [vmem:[#allocation1 + $0x23] ss:$4 sm:$0xff] %v4869_v3 }
 0x4df   : > { %v4415_v8 = vmax.f32 %v4379_v27, 0.0  ;;  %5053 = vst [vmem:[#allocation1] ss:$4 sm:$0xff] %v4872_v37 }
 0x4e1   : > { %v4557_v23 = vrot.slane %v4415_v8, 2  ;;  %v4558_v41 = vrot.slane %v4415_v8, 4  ;;  %v4559_v14 = vrot.slane %v4415_v8, 6  ;;  %v4874_v2 = vsel %vm335_vm0, %v4415_v8, -inf }
 0x4e2   : > { %v4875_v32 = vmax.f32 %v4873_v20, %v4874_v2 }
 0x4e3   : > { %v4877_v29 = vsel %vm335_vm0, %v4557_v23, -inf  ;;  %v4880_v24 = vsel %vm335_vm0, %v4558_v41, -inf  ;;  %v4883_v34 = vsel %vm335_vm0, %v4559_v14, -inf }
 0x4e4   : > { %v4878_v39 = vmax.f32 %v4876_v57, %v4877_v29  ;;  %v4881_v59 = vmax.f32 %v4879_v21, %v4880_v24  ;;  %v4884_v47 = vmax.f32 %v4882_v50, %v4883_v34  ;;  %5054 = vst [vmem:[#allocation1 + $0x1] ss:$4 sm:$0xff] %v4875_v32 }
 0x4e5   : > { %v5052_v40 = vld.sshfl [vmem:[#allocation1 + $0x20] sm:$0xff pattern:$0x73625140] }
 0x4e6   : > { %5055 = vst [vmem:[#allocation1 + $0x2] ss:$4 sm:$0xff] %v4878_v39 }
 0x4e7   : > { %5056 = vst [vmem:[#allocation1 + $0x3] ss:$4 sm:$0xff] %v4881_v59 }
 0x4e8   : > { %5057 = vst [vmem:[#allocation1 + $0x20] ss:$4 sm:$0xff] %v4884_v47 }
 0x4e9   : > { %5105 = vst [vmem:[#allocation3 + $0xa8] sm:$0xff] %v5052_v40 }
 0x4ee   : > { %v5058_v53 = vld.sshfl [vmem:[#allocation1] sm:$0xff pattern:$0x73625140] }
 0x4ef   : > { %5106 = vst [vmem:[#allocation3 + $0xb0] sm:$0xff] %v5058_v53 }
 0x4f6   : > { %v5122_v19 = vld [vmem:[#allocation3 + $0xa8] ss:$2 sm:$0xff]  ;;  %v5138_v4 = vld [vmem:[#allocation3 + $0xa9] ss:$2 sm:$0xff] }
 0x4f7   : > { %v5146_v58 = vmax.f32 %v5122_v19, %v5138_v4 }
 0x4f9   : > { %5154 = vst [vmem:[%s8272_s19 + $0x38] sm:$0xff] %v5146_v58 }
 0x4fa   : > { %6257 = shalt.err (!%p6254_p10)
}
 0x4fb   : > { %s6307_s4 = smov 128   ;;  %s6308_s19 = smov 8  }
 0x4fc   : > { %6060 = dma.vmem_to_hbm [thread:$0]  (%p6421_p3), %s5169_s29, 1024, %s5171_s23, %s5156_s16, %s6307_s4, %s6307_s4, %s6308_s19  }
 0x4fd PF: > { %s5185_s30 = sand.u32 1, %s6288_s24   ;;  %p8919_p12 = scmp.ge.s32.totalorder %s6300_s27, 2 }
 0x4fe   : > { %s5186_s12 = scalar_lea.sflag [#allocation6], %s5185_s30 }
 0x4ff   : > { %p6074_p13 = pnand %p8919_p12, %p6384_p6 }
 0x501   : > { %p6075_p0 = pneg %p6074_p13 }
 0x503   : > { %6283 = dma.done.wait (%p6075_p0), %s5186_s12, 1024  }
 0x504   : > { %6285 = vsyncadd (%p6075_p0), %s5186_s12, 4294966272  ;;  %s8920_s18 = sld [smem:[#allocation14_spill]]  ;;  %p21_p5 = scmp.ge.s32.totalorder %s6411_s22, 4  }
 0x505   : > { %s8921_s24 = smov %s6292_s25  ;;  %s8922_s25 = smov %s6296_s26 }
 0x506   : > { %s8924_s27 = smov %s6411_s22  ;;  %23 = sbr.rel (!%p21_p5) target bundleno = 9 (0x9), region = 131 }
 0x50a   : > { %s8923_s26 = smov %s8920_s18 }
 0x50b   :  { %5192 = vsyncpa [#allocation5], 1 }
 0x50c   :  { %5194 = vsyncpa [#allocation5 + $0x1], 1 }
 0x50d   :  { %5195 = vsyncpa [#allocation8], 1 }
 0x50e   :  { %5196 = vsyncpa [#allocation6], 1 }
 0x50f   :  { %5198 = vsyncpa [#allocation6 + $0x1], 1 }

</bundles_post_ra>
